<compile_context>
chip_gen: v5e
topology: v5e:2x2
jax: 0.10.0
libtpu: 0.0.40
codegen_flags: <defaults>
</compile_context>

<pallas_src>
import jax
import jax.numpy as jnp
from jax.experimental import pallas as pl
from jax.experimental.pallas import tpu as pltpu


def decoder_kernel(z_ref, w1_ref, b1_ref,
                   w2q_ref, s2_ref, b2_ref,
                   gamma_ref, beta_ref,
                   w3q_ref, s3_ref, b3_ref,
                   logits_ref, probs_ref):
    # ---- Linear(code_size, 512) + LeakyReLU(0.2) ----
    # z cast to bf16 in-kernel (tiny VPU convert); bf16 x bf16 on the MXU,
    # f32 accumulate.
    z = z_ref[...].astype(jnp.bfloat16)
    h1 = jnp.dot(z, w1_ref[...],
                 preferred_element_type=jnp.float32) + b1_ref[...]
    h1 = jnp.maximum(h1, 0.2 * h1)

    # ---- Linear(512, 512), weight-only int8 ----
    # Dequantize int8 -> bf16 (scale deferred: per-output-column scale is
    # applied to the f32 accumulator after the dot).
    w2 = w2q_ref[...].astype(jnp.bfloat16)
    h2 = jnp.dot(h1.astype(jnp.bfloat16), w2,
                 preferred_element_type=jnp.float32)
    h2 = h2 * s2_ref[...] + b2_ref[...]

    # ---- BatchNorm1d(512), training mode: batch stats, biased variance (f32) ----
    mean = jnp.mean(h2, axis=0, keepdims=True)
    diff = h2 - mean
    var = jnp.mean(diff * diff, axis=0, keepdims=True)
    h2n = diff * jax.lax.rsqrt(var + 1e-5)
    h2n = h2n * gamma_ref[...] + beta_ref[...]

    # ---- LeakyReLU(0.2) ----
    h2n = jnp.maximum(h2n, 0.2 * h2n)

    # ---- Linear(512, 32*32*1), weight-only int8 -> Bernoulli logits ----
    w3 = w3q_ref[...].astype(jnp.bfloat16)
    logits = jnp.dot(h2n.astype(jnp.bfloat16), w3,
                     preferred_element_type=jnp.float32)
    logits = logits * s3_ref[...] + b3_ref[...]
    logits_ref[...] = logits
    # Fused sigmoid -> probs (EUP slot is idle here, essentially free);
    # stored as bf16 to trim output writeback.
    probs_ref[...] = jax.nn.sigmoid(logits).astype(jnp.bfloat16)


def decoder_forward(z, params):
    """Runs the full decoder MLP in a single Pallas kernel (all weights fit VMEM).

    Returns (logits, probs) of shape (B, 1, 32, 32); Bernoulli(logits=img) is
    represented by its logits, probs = sigmoid(logits) is a fused freebie.
    """
    (w1, b1, w2q, s2, b2, gamma, beta, w3q, s3, b3) = params
    B, code = z.shape
    n_out = 32 * 32 * 1
    assert B >= 2, "training-mode BatchNorm1d requires batch size >= 2"

    flops = 2 * B * (code * 512 + 512 * 512 + 512 * n_out)
    bytes_accessed = (
        z.size * 4                                    # f32 input
        + w1.size * 2                                 # bf16 w1
        + (w2q.size + w3q.size) * 1                   # int8 w2/w3
        + (s2.size + s3.size) * 4                     # per-column scales
        + (b1.size + b2.size + b3.size + gamma.size + beta.size) * 4
        + B * n_out * 4                               # logits (f32)
        + B * n_out * 2                               # probs (bf16)
    )

    vmem_spec = pl.BlockSpec(memory_space=pltpu.MemorySpace.VMEM)
    logits_flat, probs_flat = pl.pallas_call(
        decoder_kernel,
        out_shape=(jax.ShapeDtypeStruct((B, n_out), jnp.float32),
                   jax.ShapeDtypeStruct((B, n_out), jnp.bfloat16)),
        in_specs=[vmem_spec] * 11,
        out_specs=(vmem_spec, vmem_spec),
        cost_estimate=pl.CostEstimate(flops=flops,
                                      transcendentals=B * n_out,
                                      bytes_accessed=bytes_accessed),
    )(z, w1, b1, w2q, s2, b2, gamma, beta, w3q, s3, b3)

    logits = logits_flat.reshape(B, 1, 32, 32)   # NCHW, like img_flat.view(...)
    probs = probs_flat.reshape(B, 1, 32, 32)     # Bernoulli(logits=img).probs
    return logits, probs


def _quantize_per_column(w):
    """Symmetric per-output-column int8 quantization: w ≈ w_q * scale."""
    amax = jnp.max(jnp.abs(w), axis=0, keepdims=True)       # (1, out)
    scale = jnp.maximum(amax, 1e-8) / 127.0
    w_q = jnp.clip(jnp.round(w / scale), -127.0, 127.0).astype(jnp.int8)
    return w_q, scale.astype(jnp.float32)


def init_params(key, code_size):
    """Deterministic synthetic parameters (shapes match the PyTorch module).

    Matmul weights are stored (in_features, out_features) == weight.T.
    w1 stays bf16 (tiny); w2/w3 are weight-only int8 with per-column f32
    scales; biases / BatchNorm affine params stay f32 (added post-accumulate).
    """
    ks = jax.random.split(key, 6)
    w1 = (jax.random.normal(ks[0], (code_size, 512), jnp.float32) * 0.05).astype(jnp.bfloat16)
    b1 = jax.random.normal(ks[1], (1, 512), jnp.float32) * 0.01
    w2 = jax.random.normal(ks[2], (512, 512), jnp.float32) * 0.05
    w2q, s2 = _quantize_per_column(w2)
    b2 = jax.random.normal(ks[3], (1, 512), jnp.float32) * 0.01
    gamma = jnp.ones((1, 512), jnp.float32)              # BatchNorm1d weight
    beta = jnp.zeros((1, 512), jnp.float32)              # BatchNorm1d bias
    w3 = jax.random.normal(ks[4], (512, 32 * 32 * 1), jnp.float32) * 0.05
    w3q, s3 = _quantize_per_column(w3)
    b3 = jax.random.normal(ks[5], (1, 32 * 32 * 1), jnp.float32) * 0.01
    return (w1, b1, w2q, s2, b2, gamma, beta, w3q, s3, b3)


if __name__ == "__main__":
    key = jax.random.PRNGKey(0)
    k_param, k_z = jax.random.split(key)

    B = 8            # small batch (sublane-friendly)
    code_size = 32   # latent code size

    params = init_params(k_param, code_size)
    z = jax.random.normal(k_z, (B, code_size), jnp.float32)

    logits, probs = decoder_forward(z, params)
    jax.block_until_ready((logits, probs))

    assert logits.shape == (B, 1, 32, 32)
    assert probs.shape == (B, 1, 32, 32)
    assert bool(jnp.all(jnp.isfinite(logits)))
    assert bool(jnp.all((probs >= 0.0) & (probs <= 1.0)))
    print("KERNEL_OK")
</pallas_src>

<mosaic_0001>
module attributes {stable_mosaic.version = 11 : i64} {
  func.func @decoder_kernel(%arg0: memref<8x32xf32, #tpu.memory_space<vmem>>, %arg1: memref<32x512xbf16, #tpu.memory_space<vmem>>, %arg2: memref<1x512xf32, #tpu.memory_space<vmem>>, %arg3: memref<512x512xi8, #tpu.memory_space<vmem>>, %arg4: memref<1x512xf32, #tpu.memory_space<vmem>>, %arg5: memref<1x512xf32, #tpu.memory_space<vmem>>, %arg6: memref<1x512xf32, #tpu.memory_space<vmem>>, %arg7: memref<1x512xf32, #tpu.memory_space<vmem>>, %arg8: memref<512x1024xi8, #tpu.memory_space<vmem>>, %arg9: memref<1x1024xf32, #tpu.memory_space<vmem>>, %arg10: memref<1x1024xf32, #tpu.memory_space<vmem>>, %arg11: memref<8x1024xf32, #tpu.memory_space<vmem>>, %arg12: memref<8x1024xbf16, #tpu.memory_space<vmem>>) attributes {dimension_semantics = [], scalar_prefetch = 0 : i64, scratch_operands = 0 : i64, tpu.core_type = #tpu.core_type<tc>} {
    %c0 = arith.constant 0 : index
    %c0_0 = arith.constant 0 : index
    %0 = vector.load %arg0[%c0, %c0_0] : memref<8x32xf32, #tpu.memory_space<vmem>>, vector<8x32xf32>
    %1 = arith.truncf %0 : vector<8x32xf32> to vector<8x32xbf16>
    %c0_1 = arith.constant 0 : index
    %c0_2 = arith.constant 0 : index
    %2 = vector.load %arg1[%c0_1, %c0_2] : memref<32x512xbf16, #tpu.memory_space<vmem>>, vector<32x512xbf16>
    %cst = arith.constant dense<0.000000e+00> : vector<8x512xf32>
    %3 = tpu.matmul %1, %2, %cst {dimension_numbers = #tpu.dot_dimension_numbers<[1], [0], [0], [1], [0, 0, 1, 1], [], []>} : vector<8x32xbf16>, vector<32x512xbf16>, vector<8x512xf32> -> vector<8x512xf32>
    %c0_3 = arith.constant 0 : index
    %c0_4 = arith.constant 0 : index
    %4 = vector.load %arg2[%c0_3, %c0_4] : memref<1x512xf32, #tpu.memory_space<vmem>>, vector<1x512xf32>
    %5 = vector.broadcast %4 : vector<1x512xf32> to vector<8x512xf32>
    %6 = arith.addf %3, %5 : vector<8x512xf32>
    %cst_5 = arith.constant 2.000000e-01 : f32
    %7 = vector.broadcast %cst_5 : f32 to vector<8x512xf32>
    %8 = arith.mulf %7, %6 : vector<8x512xf32>
    %9 = arith.maximumf %6, %8 : vector<8x512xf32>
    %c0_6 = arith.constant 0 : index
    %c0_7 = arith.constant 0 : index
    %10 = vector.load %arg3[%c0_6, %c0_7] : memref<512x512xi8, #tpu.memory_space<vmem>>, vector<512x512xi8>
    %11 = arith.sitofp %10 : vector<512x512xi8> to vector<512x512xbf16>
    %12 = arith.truncf %9 : vector<8x512xf32> to vector<8x512xbf16>
    %cst_8 = arith.constant dense<0.000000e+00> : vector<8x512xf32>
    %13 = tpu.matmul %12, %11, %cst_8 {dimension_numbers = #tpu.dot_dimension_numbers<[1], [0], [0], [1], [0, 0, 1, 1], [], []>} : vector<8x512xbf16>, vector<512x512xbf16>, vector<8x512xf32> -> vector<8x512xf32>
    %c0_9 = arith.constant 0 : index
    %c0_10 = arith.constant 0 : index
    %14 = vector.load %arg4[%c0_9, %c0_10] : memref<1x512xf32, #tpu.memory_space<vmem>>, vector<1x512xf32>
    %15 = vector.broadcast %14 : vector<1x512xf32> to vector<8x512xf32>
    %16 = arith.mulf %13, %15 : vector<8x512xf32>
    %c0_11 = arith.constant 0 : index
    %c0_12 = arith.constant 0 : index
    %17 = vector.load %arg5[%c0_11, %c0_12] : memref<1x512xf32, #tpu.memory_space<vmem>>, vector<1x512xf32>
    %18 = vector.broadcast %17 : vector<1x512xf32> to vector<8x512xf32>
    %19 = arith.addf %16, %18 : vector<8x512xf32>
    %cst_13 = arith.constant dense<0.000000e+00> : vector<512xf32>
    %20 = vector.multi_reduction <add>, %19, %cst_13 [0] : vector<8x512xf32> to vector<512xf32>
    %21 = vector.shape_cast %20 : vector<512xf32> to vector<1x512xf32>
    %cst_14 = arith.constant 8.000000e+00 : f32
    %22 = vector.broadcast %cst_14 : f32 to vector<1x512xf32>
    %23 = arith.divf %21, %22 : vector<1x512xf32>
    %24 = vector.broadcast %23 : vector<1x512xf32> to vector<8x512xf32>
    %25 = arith.subf %19, %24 : vector<8x512xf32>
    %26 = arith.mulf %25, %25 : vector<8x512xf32>
    %cst_15 = arith.constant dense<0.000000e+00> : vector<512xf32>
    %27 = vector.multi_reduction <add>, %26, %cst_15 [0] : vector<8x512xf32> to vector<512xf32>
    %28 = vector.shape_cast %27 : vector<512xf32> to vector<1x512xf32>
    %cst_16 = arith.constant 8.000000e+00 : f32
    %29 = vector.broadcast %cst_16 : f32 to vector<1x512xf32>
    %30 = arith.divf %28, %29 : vector<1x512xf32>
    %cst_17 = arith.constant 9.99999974E-6 : f32
    %31 = vector.broadcast %cst_17 : f32 to vector<1x512xf32>
    %32 = arith.addf %30, %31 : vector<1x512xf32>
    %33 = math.rsqrt %32 : vector<1x512xf32>
    %34 = vector.broadcast %33 : vector<1x512xf32> to vector<8x512xf32>
    %35 = arith.mulf %25, %34 : vector<8x512xf32>
    %c0_18 = arith.constant 0 : index
    %c0_19 = arith.constant 0 : index
    %36 = vector.load %arg6[%c0_18, %c0_19] : memref<1x512xf32, #tpu.memory_space<vmem>>, vector<1x512xf32>
    %37 = vector.broadcast %36 : vector<1x512xf32> to vector<8x512xf32>
    %38 = arith.mulf %35, %37 : vector<8x512xf32>
    %c0_20 = arith.constant 0 : index
    %c0_21 = arith.constant 0 : index
    %39 = vector.load %arg7[%c0_20, %c0_21] : memref<1x512xf32, #tpu.memory_space<vmem>>, vector<1x512xf32>
    %40 = vector.broadcast %39 : vector<1x512xf32> to vector<8x512xf32>
    %41 = arith.addf %38, %40 : vector<8x512xf32>
    %cst_22 = arith.constant 2.000000e-01 : f32
    %42 = vector.broadcast %cst_22 : f32 to vector<8x512xf32>
    %43 = arith.mulf %42, %41 : vector<8x512xf32>
    %44 = arith.maximumf %41, %43 : vector<8x512xf32>
    %c0_23 = arith.constant 0 : index
    %c0_24 = arith.constant 0 : index
    %45 = vector.load %arg8[%c0_23, %c0_24] : memref<512x1024xi8, #tpu.memory_space<vmem>>, vector<512x1024xi8>
    %46 = arith.sitofp %45 : vector<512x1024xi8> to vector<512x1024xbf16>
    %47 = arith.truncf %44 : vector<8x512xf32> to vector<8x512xbf16>
    %cst_25 = arith.constant dense<0.000000e+00> : vector<8x1024xf32>
    %48 = tpu.matmul %47, %46, %cst_25 {dimension_numbers = #tpu.dot_dimension_numbers<[1], [0], [0], [1], [0, 0, 1, 1], [], []>} : vector<8x512xbf16>, vector<512x1024xbf16>, vector<8x1024xf32> -> vector<8x1024xf32>
    %c0_26 = arith.constant 0 : index
    %c0_27 = arith.constant 0 : index
    %49 = vector.load %arg9[%c0_26, %c0_27] : memref<1x1024xf32, #tpu.memory_space<vmem>>, vector<1x1024xf32>
    %50 = vector.broadcast %49 : vector<1x1024xf32> to vector<8x1024xf32>
    %51 = arith.mulf %48, %50 : vector<8x1024xf32>
    %c0_28 = arith.constant 0 : index
    %c0_29 = arith.constant 0 : index
    %52 = vector.load %arg10[%c0_28, %c0_29] : memref<1x1024xf32, #tpu.memory_space<vmem>>, vector<1x1024xf32>
    %53 = vector.broadcast %52 : vector<1x1024xf32> to vector<8x1024xf32>
    %54 = arith.addf %51, %53 : vector<8x1024xf32>
    %c0_30 = arith.constant 0 : index
    %c0_31 = arith.constant 0 : index
    %55 = vector.load %arg11[%c0_30, %c0_31] : memref<8x1024xf32, #tpu.memory_space<vmem>>, vector<8x1024xf32>
    tpu.vector_store %arg11[%c0_30, %c0_31], %54 {strides = array<i32>} : memref<8x1024xf32, #tpu.memory_space<vmem>>, vector<8x1024xf32>,
    %56 = arith.negf %54 : vector<8x1024xf32>
    %57 = math.exp %56 : vector<8x1024xf32>
    %cst_32 = arith.constant 1.000000e+00 : f32
    %58 = vector.broadcast %cst_32 : f32 to vector<8x1024xf32>
    %59 = arith.addf %58, %57 : vector<8x1024xf32>
    %60 = arith.divf %58, %59 : vector<8x1024xf32>
    %61 = arith.truncf %60 : vector<8x1024xf32> to vector<8x1024xbf16>
    %c0_33 = arith.constant 0 : index
    %c0_34 = arith.constant 0 : index
    %62 = vector.load %arg12[%c0_33, %c0_34] : memref<8x1024xbf16, #tpu.memory_space<vmem>>, vector<8x1024xbf16>
    tpu.vector_store %arg12[%c0_33, %c0_34], %61 {strides = array<i32>} : memref<8x1024xbf16, #tpu.memory_space<vmem>>, vector<8x1024xbf16>,
    return
  }
}

</mosaic_0001>

<bundles_post_ra>
// kernel: tpu_custom_call.1
= control target key start
LH: loop header
LB: loop body
LE: loop exit
PB: predicated region body
PF: predicated region fallthrough
CT: control target
= control target key end

     0   :  { %18 = vsyncpa [#allocation3], 0  ;;  %s4911_s0 = inlined_call_operand.hbm [shape: f32[8,32], index: 0, kind: input, shape index: {}]   ;;  %s4912_s1 = inlined_call_operand.hbm [shape: bf16[32,512], index: 1, kind: input, shape index: {}]   ;;  %s4913_s2 = inlined_call_operand.hbm [shape: f32[1,512], index: 2, kind: input, shape index: {}]   ;;  %s4914_s3 = inlined_call_operand.hbm [shape: s8[512,512], index: 3, kind: input, shape index: {}]   ;;  %s4915_s4 = inlined_call_operand.hbm [shape: f32[1,512], index: 4, kind: input, shape index: {}]   ;;  %s4916_s5 = inlined_call_operand.hbm [shape: f32[1,512], index: 5, kind: input, shape index: {}]   ;;  %s4917_s6 = inlined_call_operand.hbm [shape: f32[1,512], index: 6, kind: input, shape index: {}]   ;;  %s4918_s7 = inlined_call_operand.hbm [shape: f32[1,512], index: 7, kind: input, shape index: {}]   ;;  %s4919_s8 = inlined_call_operand.hbm [shape: s8[512,1024], index: 8, kind: input, shape index: {}]   ;;  %s4920_s9 = inlined_call_operand.vmem [shape: f32[1,1024], index: 9, kind: input, shape index: {}]   ;;  %s4921_s10 = inlined_call_operand.hbm [shape: f32[1,1024], index: 10, kind: input, shape index: {}]   ;;  %s4922_s11 = inlined_call_operand.hbm [shape: f32[8,1024], index: 11, kind: output, shape index: {0}]   ;;  %s4923_s12 = inlined_call_operand.hbm [shape: bf16[8,1024], index: 12, kind: output, shape index: {1}]  }
   0x1   :  { %19 = vsyncpa [#allocation6], 0 }
   0x2   :  { %20 = vsyncpa [#allocation9], 0 }
   0x3   :  { %21 = vsyncpa [#allocation12], 0 }
   0x4   :  { %22 = vsyncpa [#allocation15], 0 }
   0x5   :  { %23 = vsyncpa [#allocation18], 0 }
   0x6   :  { %24 = vsyncpa [#allocation4], 0  ;;  %s41_s23 = sshll.u32 %s4912_s1, 4  ;;  %s42_s23 = int_to_ptr.hbm [resolvable:$true] %s41_s23 }
   0x7   :  { %25 = vsyncpa [#allocation21], 0  ;;  %s3911_s24 = smov [#allocation5]   ;;  %s65_s28 = sshll.u32 %s4914_s3, 4  ;;  %s66_s28 = int_to_ptr.hbm [resolvable:$true] %s65_s28 }
   0x8   :  { %s43_s25 = sshll.u32 %s3911_s24, 4  ;;  %s3912_s29 = smov 256   ;;  %s44_s25 = int_to_ptr.vmem [resolvable:$true] %s43_s25 }
   0x9   :  { %s3913_s30 = smov 16   ;;  %s3914_s13 = smov [#allocation8]  }
   0xa   :  { %49 = dma.hbm_to_vmem [thread:$0]  %s42_s23, 1024, %s44_s25, [#allocation6], %s3912_s29, %s3912_s29, %s3913_s30  }
   0xb   :  { %s67_s14 = sshll.u32 %s3914_s13, 4  ;;  %s3915_s15 = smov 512   ;;  %s68_s14 = int_to_ptr.vmem [resolvable:$true] %s67_s14 }
   0xc   :  { %s3916_s16 = smov 32   ;;  %s90_s18 = sshll.u32 %s4916_s5, 4  ;;  %s91_s18 = int_to_ptr.hbm [resolvable:$true] %s90_s18 }
   0xd   :  { %73 = dma.hbm_to_vmem [thread:$0]  %s66_s28, 8192, %s68_s14, [#allocation9], %s3915_s15, %s3915_s15, %s3916_s16  }
   0xe   :  { %s3917_s19 = smov [#allocation11]   ;;  %s112_s22 = sshll.u32 %s4918_s7, 4  ;;  %s113_s22 = int_to_ptr.hbm [resolvable:$true] %s112_s22 }
   0xf   :  { %s92_s20 = sshll.u32 %s3917_s19, 4  ;;  %s3918_s23 = smov [#allocation14]   ;;  %s93_s20 = int_to_ptr.vmem [resolvable:$true] %s92_s20 }
  0x10   :  { %95 = dma.hbm_to_vmem [thread:$0]  %s91_s18, 64, %s93_s20, [#allocation12]  }
  0x11   :  { %s114_s24 = sshll.u32 %s3918_s23, 4  ;;  %s31_s27 = sshll.u32 %s4911_s0, 4  ;;  %s115_s24 = int_to_ptr.vmem [resolvable:$true] %s114_s24  ;;  %s32_s27 = int_to_ptr.hbm [resolvable:$true] %s31_s27 }
  0x12   :  { %117 = dma.hbm_to_vmem [thread:$0]  %s113_s22, 64, %s115_s24, [#allocation15]  }
  0x13   :  { %s55_s29 = sshll.u32 %s4913_s2, 4  ;;  %s3919_s30 = smov [#allocation2]   ;;  %s56_s29 = int_to_ptr.hbm [resolvable:$true] %s55_s29 }
  0x14   :  { %s33_s13 = sshll.u32 %s3919_s30, 4  ;;  %s3920_s7 = smov [#allocation7]   ;;  %s34_s13 = int_to_ptr.vmem [resolvable:$true] %s33_s13 }
  0x15   :  { %36 = dma.hbm_to_vmem [thread:$0]  %s32_s27, 128, %s34_s13, [#allocation3]  }
  0x16   :  { %s57_s14 = sshll.u32 %s3920_s7, 4  ;;  %s79_s1 = sshll.u32 %s4915_s4, 4  ;;  %s58_s14 = int_to_ptr.vmem [resolvable:$true] %s57_s14  ;;  %s80_s1 = int_to_ptr.hbm [resolvable:$true] %s79_s1 }
  0x17   :  { %60 = dma.hbm_to_vmem [thread:$0]  %s56_s29, 64, %s58_s14, [#allocation6]  }
  0x18   :  { %s101_s18 = sshll.u32 %s4917_s6, 4  ;;  %s3921_s19 = smov [#allocation10]   ;;  %s102_s18 = int_to_ptr.hbm [resolvable:$true] %s101_s18 }
  0x19   :  { %s81_s2 = sshll.u32 %s3921_s19, 4  ;;  %s3922_s20 = smov [#allocation13]   ;;  %s82_s2 = int_to_ptr.vmem [resolvable:$true] %s81_s2 }
  0x1a   :  { %84 = dma.hbm_to_vmem [thread:$0]  %s80_s1, 64, %s82_s2, [#allocation9]  }
  0x1b   :  { %s103_s21 = sshll.u32 %s3922_s20, 4  ;;  %s122_s23 = sshll.u32 %s4919_s8, 4  ;;  %s104_s21 = int_to_ptr.vmem [resolvable:$true] %s103_s21  ;;  %s123_s23 = int_to_ptr.hbm [resolvable:$true] %s122_s23 }
  0x1c   :  { %106 = dma.hbm_to_vmem [thread:$0]  %s102_s18, 64, %s104_s21, [#allocation12]  }
  0x1d   :  { %s3923_s4 = smov [#allocation16]   ;;  %s138_s6 = sshll.u32 %s4921_s10, 4  ;;  %s139_s6 = int_to_ptr.hbm [resolvable:$true] %s138_s6 }
  0x1e   :  { %s124_s24 = sshll.u32 %s3923_s4, 4  ;;  %s3924_s27 = smov 1024   ;;  %s125_s24 = int_to_ptr.vmem [resolvable:$true] %s124_s24 }
  0x1f   :  { %s3925_s5 = smov 64   ;;  %s3926_s28 = smov [#allocation17]  }
  0x20   :  { %130 = dma.hbm_to_vmem [thread:$0]  %s123_s23, 16384, %s125_s24, [#allocation15], %s3924_s27, %s3924_s27, %s3925_s5  }
  0x21   :  { %s140_s29 = sshll.u32 %s3926_s28, 4  ;;  %s141_s29 = int_to_ptr.vmem [resolvable:$true] %s140_s29 }
  0x22   :  { %143 = dma.hbm_to_vmem [thread:$0]  %s139_s6, 128, %s141_s29, [#allocation18]  }
  0x23   :  { %3895 = dma.done.wait [#allocation3], 128  }
  0x24   :  { %3896 = vsyncadd [#allocation3], 4294967168 }
  0x25   :  { %3897 = dma.done.wait [#allocation6], 1088  }
  0x26   :  { %3898 = vsyncadd [#allocation6], 4294966208 }
  0x27   :  { %3899 = dma.done.wait [#allocation9], 8256  }
  0x28   :  { %3900 = vsyncadd [#allocation9], 4294959040 }
  0x29   :  { %3901 = dma.done.wait [#allocation12], 128  }
  0x2a   :  { %3902 = vsyncadd [#allocation12], 4294967168 }
  0x2b   :  { %3903 = dma.done.wait [#allocation15], 16448  }
  0x2c   :  { %3904 = vsyncadd [#allocation15], 4294950848 }
  0x2d   :  { %3905 = dma.done.wait [#allocation18], 128  }
  0x2e   :  { %3906 = vsyncadd [#allocation18], 4294967168  ;;  %v3512_v0 = vld [vmem:[#allocation5 + $0x20] sm:$0xf]  ;;  %v3544_v1 = vld [vmem:[#allocation5 + $0x2c] sm:$0xf0] }
  0x2f   :  { %v3542_v2 = vld [vmem:[#allocation5 + $0x24] sm:$0xf]  ;;  %v3513_v3 = vor.u32 %v3544_v1, %v3512_v0  ;;  %v3514_v4 = vld [vmem:[#allocation5 + $0x30] sm:$0xf0]  ;;  %v3520_v5 = vld [vmem:[#allocation5 + $0x28] sm:$0xf] }
  0x30   :  { %v3545_v6 = vld [vmem:[#allocation5 + $0x34] sm:$0xf0]  ;;  %v3517_v7 = vor.u32 %v3542_v2, %v3514_v4  ;;  %v3543_v9 = vld [vmem:[#allocation5 + $0x2c] sm:$0xf]  ;;  %v3522_v10 = vld [vmem:[#allocation5 + $0x38] sm:$0xf0] }
  0x31   :  { %v3521_v8 = vor.u32 %v3545_v6, %v3520_v5  ;;  %v3496_v11 = vld [vmem:[#allocation5] sm:$0xf]  ;;  %255 = vmatpush.bf16.msra.mxu0 %v3513_v3  ;;  %v3525_v12 = vor.u32 %v3543_v9, %v3522_v10  ;;  %v3540_v13 = vld [vmem:[#allocation5 + $0xc] sm:$0xf0]  ;;  %v3538_v14 = vld [vmem:[#allocation5 + $0x4] sm:$0xf] }
  0x32   :  { %v3498_v15 = vld [vmem:[#allocation5 + $0x10] sm:$0xf0]  ;;  %268 = vmatpush.bf16.msra.mxu1 %v3517_v7  ;;  %v3497_v16 = vor.u32 %v3540_v13, %v3496_v11  ;;  %v3504_v18 = vld [vmem:[#allocation5 + $0x8] sm:$0xf]  ;;  %v3541_v19 = vld [vmem:[#allocation5 + $0x14] sm:$0xf0] }
  0x33   :  { %281 = vmatpush.bf16.msra.mxu2 %v3521_v8  ;;  %v3501_v17 = vor.u32 %v3538_v14, %v3498_v15  ;;  %v3539_v20 = vld [vmem:[#allocation5 + $0xc] sm:$0xf]  ;;  %294 = vmatpush.bf16.msra.mxu3 %v3525_v12  ;;  %v3505_v21 = vor.u32 %v3541_v19, %v3504_v18  ;;  %v3506_v22 = vld [vmem:[#allocation5 + $0x18] sm:$0xf0]  ;;  %vm245_vm0 = vcmask 261120   ;;  %v321_v24 = vld [vmem:[#allocation8 + $0x60] sm:$0xff] }
  0x34   :  { %v185_v23 = vld [vmem:[#allocation2] sm:$0xff]  ;;  %v3509_v25 = vor.u32 %v3539_v20, %v3506_v22  ;;  %v429_v27 = vunpack.c.2.s8 %v321_v24  ;;  %v433_v28 = vunpack.c.3.s8 %v321_v24  ;;  %v337_v29 = vld [vmem:[#allocation8 + $0xe0] sm:$0xff]  ;;  %v421_v32 = vunpack.c.0.s8 %v321_v24  ;;  %s3463_s14 = sshll.u32 %s4922_s11, 4  ;;  %s3929_s11 = smov [#allocation20]   ;;  %s3464_s14 = int_to_ptr.hbm [resolvable:$true] %s3463_s14 }
  0x35   :  { %v186_v26 = vpack.c.bf16 %v185_v23, %v185_v23  ;;  %256 = vmatpush.bf16.msra.mxu0 %v3497_v16  ;;  %v493_v30 = vunpack.c.2.s8 %v337_v29  ;;  %v497_v31 = vunpack.c.3.s8 %v337_v29  ;;  %v425_v33 = vunpack.c.1.s8 %v321_v24  ;;  %v353_v34 = vld [vmem:[#allocation8 + $0x160] sm:$0xff]  ;;  %s3472_s15 = sshll.u32 %s3929_s11, 4  ;;  %s3474_s0 = sshll.u32 %s4923_s12, 4  ;;  %s3473_s15 = int_to_ptr.vmem [resolvable:$true] %s3472_s15  ;;  %s3475_s0 = int_to_ptr.hbm [resolvable:$true] %s3474_s0 }
  0x36   :  { %269 = vmatpush.bf16.msra.mxu1 %v3501_v17  ;;  %v685_v35 = vcvt.s32.f32 %v429_v27  ;;  %v689_v36 = vcvt.s32.f32 %v433_v28  ;;  %v485_v37 = vunpack.c.0.s8 %v337_v29  ;;  %v489_v38 = vunpack.c.1.s8 %v337_v29  ;;  %v369_v39 = vld [vmem:[#allocation8 + $0x1e0] sm:$0xff] }
  0x37   :  { %282 = vmatpush.bf16.msra.mxu2 %v3505_v21  ;;  %295 = vmatpush.bf16.msra.mxu3 %v3509_v25  ;;  %v749_v40 = vcvt.s32.f32 %v493_v30  ;;  %v753_v41 = vcvt.s32.f32 %v497_v31  ;;  %v677_v42 = vcvt.s32.f32 %v421_v32  ;;  %v681_v43 = vcvt.s32.f32 %v425_v33  ;;  %v317_v44 = vld [vmem:[#allocation8 + $0x40] sm:$0xff] }
  0x38   :  { %3526 = vmatmul.msk.bf16.vlgmr.msra.gmra.mxu0 %vm245_vm0, %v186_v26  ;;  %v913_v45 = vpack.c.bf16 %v689_v36, %v685_v35  ;;  %v741_v46 = vcvt.s32.f32 %v485_v37  ;;  %v745_v47 = vcvt.s32.f32 %v489_v38  ;;  %v557_v48 = vunpack.c.2.s8 %v353_v34  ;;  %v333_v49 = vld [vmem:[#allocation8 + $0xc0] sm:$0xff] }
  0x39   :  { %3527 = vmatmul.msk.bf16.vlgmr.msra.gmra.mxu1 %vm245_vm0, %v186_v26  ;;  %v945_v50 = vpack.c.bf16 %v753_v41, %v749_v40  ;;  %v909_v51 = vpack.c.bf16 %v681_v43, %v677_v42  ;;  %v561_v52 = vunpack.c.3.s8 %v353_v34  ;;  %v621_v53 = vunpack.c.2.s8 %v369_v39  ;;  %v349_v14 = vld [vmem:[#allocation8 + $0x140] sm:$0xff] }
  0x3a   :  { %3528 = vmatmul.msk.bf16.vlgmr.msra.gmra.mxu2 %vm245_vm0, %v186_v26  ;;  %3529 = vmatmul.msk.bf16.vlgmr.msra.gmra.mxu3 %vm245_vm0, %v186_v26  ;;  %v941_v54 = vpack.c.bf16 %v745_v47, %v741_v46  ;;  %v813_v55 = vcvt.s32.f32 %v557_v48  ;;  %v625_v56 = vunpack.c.3.s8 %v369_v39  ;;  %v413_v57 = vunpack.c.2.s8 %v317_v44  ;;  %v365_v19 = vld [vmem:[#allocation8 + $0x1c0] sm:$0xff] }
  0x3b   :  { %1017 = vmatpush.bf16.msrb.mxu0 %v913_v45  ;;  %1030 = vmatpush.bf16.msrb.mxu1 %v945_v50  ;;  %v817_v58 = vcvt.s32.f32 %v561_v52  ;;  %v877_v59 = vcvt.s32.f32 %v621_v53  ;;  %v417_v60 = vunpack.c.3.s8 %v317_v44  ;;  %v477_v61 = vunpack.c.2.s8 %v333_v49  ;;  %v313_v24 = vld [vmem:[#allocation8 + $0x20] sm:$0xff] }
  0x3c   :  { %v881_v62 = vcvt.s32.f32 %v625_v56  ;;  %v669_v63 = vcvt.s32.f32 %v413_v57  ;;  %v481_v0 = vunpack.c.3.s8 %v333_v49  ;;  %v549_v1 = vunpack.c.0.s8 %v353_v34  ;;  %v329_v33 = vld [vmem:[#allocation8 + $0xa0] sm:$0xff] }
  0x3d   :  { %v977_v2 = vpack.c.bf16 %v817_v58, %v813_v55  ;;  %v673_v3 = vcvt.s32.f32 %v417_v60  ;;  %v733_v4 = vcvt.s32.f32 %v477_v61  ;;  %v553_v5 = vunpack.c.1.s8 %v353_v34  ;;  %v345_v58 = vld [vmem:[#allocation8 + $0x120] sm:$0xff] }
  0x3e   :  { %v1009_v6 = vpack.c.bf16 %v881_v62, %v877_v59  ;;  %v737_v7 = vcvt.s32.f32 %v481_v0  ;;  %v805_v8 = vcvt.s32.f32 %v549_v1  ;;  %v613_v9 = vunpack.c.0.s8 %v369_v39 }
  0x3f   :  { %1018 = vmatpush.bf16.msrb.mxu0 %v909_v51  ;;  %1031 = vmatpush.bf16.msrb.mxu1 %v941_v54  ;;  %v905_v10 = vpack.c.bf16 %v673_v3, %v669_v63  ;;  %v809_v11 = vcvt.s32.f32 %v553_v5  ;;  %v617_v12 = vunpack.c.1.s8 %v369_v39  ;;  %v405_v13 = vunpack.c.0.s8 %v317_v44  ;;  %v361_v63 = vld [vmem:[#allocation8 + $0x1a0] sm:$0xff] }
  0x40   :  { %1043 = vmatpush.bf16.msrb.mxu2 %v977_v2  ;;  %1056 = vmatpush.bf16.msrb.mxu3 %v1009_v6  ;;  %v937_v15 = vpack.c.bf16 %v737_v7, %v733_v4  ;;  %v869_v16 = vcvt.s32.f32 %v613_v9  ;;  %v409_v17 = vunpack.c.1.s8 %v317_v44  ;;  %v469_v18 = vunpack.c.0.s8 %v333_v49  ;;  %v309_v4 = vld [vmem:[#allocation8] sm:$0xff] }
  0x41   :  { %v973_v20 = vpack.c.bf16 %v809_v11, %v805_v8  ;;  %v873_v21 = vcvt.s32.f32 %v617_v12  ;;  %v661_v22 = vcvt.s32.f32 %v405_v13  ;;  %v473_v23 = vunpack.c.1.s8 %v333_v49  ;;  %v325_v13 = vld [vmem:[#allocation8 + $0x80] sm:$0xff] }
  0x42   :  { %v665_v25 = vcvt.s32.f32 %v409_v17  ;;  %v725_v26 = vcvt.s32.f32 %v469_v18  ;;  %v541_v27 = vunpack.c.2.s8 %v349_v14  ;;  %v545_v28 = vunpack.c.3.s8 %v349_v14 }
  0x43   :  { %1019 = vmatpush.bf16.msrb.mxu0 %v905_v10  ;;  %1032 = vmatpush.bf16.msrb.mxu1 %v937_v15  ;;  %v1005_v29 = vpack.c.bf16 %v873_v21, %v869_v16  ;;  %v729_v30 = vcvt.s32.f32 %v473_v23  ;;  %v605_v31 = vunpack.c.2.s8 %v365_v19  ;;  %v609_v32 = vunpack.c.3.s8 %v365_v19 }
  0x44   :  { %1044 = vmatpush.bf16.msrb.mxu2 %v973_v20  ;;  %v901_v34 = vpack.c.bf16 %v665_v25, %v661_v22  ;;  %v797_v35 = vcvt.s32.f32 %v541_v27  ;;  %v801_v36 = vcvt.s32.f32 %v545_v28  ;;  %v397_v37 = vunpack.c.2.s8 %v313_v24 }
  0x45   :  { %1057 = vmatpush.bf16.msrb.mxu3 %v1005_v29  ;;  %v933_v38 = vpack.c.bf16 %v729_v30, %v725_v26  ;;  %v861_v39 = vcvt.s32.f32 %v605_v31  ;;  %v865_v40 = vcvt.s32.f32 %v609_v32  ;;  %v401_v41 = vunpack.c.3.s8 %v313_v24 }
  0x46   :  { %v969_v42 = vpack.c.bf16 %v801_v36, %v797_v35  ;;  %v653_v43 = vcvt.s32.f32 %v397_v37  ;;  %v461_v44 = vunpack.c.2.s8 %v329_v33  ;;  %v465_v45 = vunpack.c.3.s8 %v329_v33 }
  0x47   :  { %1020 = vmatpush.bf16.msrb.mxu0 %v901_v34  ;;  %1033 = vmatpush.bf16.msrb.mxu1 %v933_v38  ;;  %v1001_v46 = vpack.c.bf16 %v865_v40, %v861_v39  ;;  %v657_v47 = vcvt.s32.f32 %v401_v41  ;;  %v533_v48 = vunpack.c.0.s8 %v349_v14  ;;  %v537_v49 = vunpack.c.1.s8 %v349_v14  ;;  %v322_v38 = vld [vmem:[#allocation8 + $0x68] sm:$0xff] }
  0x48   :  { %1045 = vmatpush.bf16.msrb.mxu2 %v969_v42  ;;  %v717_v50 = vcvt.s32.f32 %v461_v44  ;;  %v721_v51 = vcvt.s32.f32 %v465_v45  ;;  %v597_v52 = vunpack.c.0.s8 %v365_v19  ;;  %v601_v53 = vunpack.c.1.s8 %v365_v19 }
  0x49   :  { %1058 = vmatpush.bf16.msrb.mxu3 %v1001_v46  ;;  %v897_v54 = vpack.c.bf16 %v657_v47, %v653_v43  ;;  %v789_v55 = vcvt.s32.f32 %v533_v48  ;;  %v793_v56 = vcvt.s32.f32 %v537_v49  ;;  %v389_v57 = vunpack.c.0.s8 %v313_v24  ;;  %v338_v43 = vld [vmem:[#allocation8 + $0xe8] sm:$0xff]  ;;  %v341_v48 = vld [vmem:[#allocation8 + $0x100] sm:$0xff] }
  0x4a   :  { %v929_v59 = vpack.c.bf16 %v721_v51, %v717_v50  ;;  %v853_v60 = vcvt.s32.f32 %v597_v52  ;;  %v857_v61 = vcvt.s32.f32 %v601_v53  ;;  %v393_v62 = vunpack.c.1.s8 %v313_v24 }
  0x4b   :  { %1021 = vmatpush.bf16.msrb.mxu0 %v897_v54  ;;  %v965_v0 = vpack.c.bf16 %v793_v56, %v789_v55  ;;  %v645_v1 = vcvt.s32.f32 %v389_v57  ;;  %v453_v2 = vunpack.c.0.s8 %v329_v33  ;;  %v457_v3 = vunpack.c.1.s8 %v329_v33  ;;  %v357_v57 = vld [vmem:[#allocation8 + $0x180] sm:$0xff] }
  0x4c   :  { %1034 = vmatpush.bf16.msrb.mxu1 %v929_v59  ;;  %v997_v5 = vpack.c.bf16 %v857_v61, %v853_v60  ;;  %v649_v6 = vcvt.s32.f32 %v393_v62  ;;  %v525_v7 = vunpack.c.2.s8 %v345_v58  ;;  %v529_v8 = vunpack.c.3.s8 %v345_v58 }
  0x4d   :  { %1046 = vmatpush.bf16.msrb.mxu2 %v965_v0  ;;  %v709_v9 = vcvt.s32.f32 %v453_v2  ;;  %v713_v10 = vcvt.s32.f32 %v457_v3  ;;  %v589_v11 = vunpack.c.2.s8 %v361_v63  ;;  %v593_v12 = vunpack.c.3.s8 %v361_v63 }
  0x4e   :  { %1059 = vmatpush.bf16.msrb.mxu3 %v997_v5  ;;  %v893_v14 = vpack.c.bf16 %v649_v6, %v645_v1  ;;  %v781_v15 = vcvt.s32.f32 %v525_v7  ;;  %v785_v16 = vcvt.s32.f32 %v529_v8  ;;  %v381_v17 = vunpack.c.2.s8 %v309_v4 }
  0x4f   :  { %v925_v18 = vpack.c.bf16 %v713_v10, %v709_v9  ;;  %v845_v19 = vcvt.s32.f32 %v589_v11  ;;  %v849_v20 = vcvt.s32.f32 %v593_v12  ;;  %v385_v21 = vunpack.c.3.s8 %v309_v4 }
  0x50   :  { %1022 = vmatpush.bf16.msrb.mxu0 %v893_v14  ;;  %v961_v22 = vpack.c.bf16 %v785_v16, %v781_v15  ;;  %v637_v23 = vcvt.s32.f32 %v381_v17  ;;  %v445_v24 = vunpack.c.2.s8 %v325_v13  ;;  %v449_v25 = vunpack.c.3.s8 %v325_v13 }
  0x51   :  { %1035 = vmatpush.bf16.msrb.mxu1 %v925_v18  ;;  %v993_v26 = vpack.c.bf16 %v849_v20, %v845_v19  ;;  %v641_v27 = vcvt.s32.f32 %v385_v21  ;;  %v517_v28 = vunpack.c.0.s8 %v345_v58  ;;  %v521_v29 = vunpack.c.1.s8 %v345_v58  ;;  %v354_v18 = vld [vmem:[#allocation8 + $0x168] sm:$0xff] }
  0x52   :  { %1047 = vmatpush.bf16.msrb.mxu2 %v961_v22  ;;  %v701_v30 = vcvt.s32.f32 %v445_v24  ;;  %v705_v31 = vcvt.s32.f32 %v449_v25  ;;  %v581_v32 = vunpack.c.0.s8 %v361_v63  ;;  %v585_v33 = vunpack.c.1.s8 %v361_v63 }
  0x53   :  { %1060 = vmatpush.bf16.msrb.mxu3 %v993_v26  ;;  %v889_v34 = vpack.c.bf16 %v641_v27, %v637_v23  ;;  %v773_v35 = vcvt.s32.f32 %v517_v28  ;;  %v777_v36 = vcvt.s32.f32 %v521_v29  ;;  %v373_v37 = vunpack.c.0.s8 %v309_v4  ;;  %v370_v23 = vld [vmem:[#allocation8 + $0x1e8] sm:$0xff] }
  0x54   :  { %v921_v39 = vpack.c.bf16 %v705_v31, %v701_v30  ;;  %v837_v40 = vcvt.s32.f32 %v581_v32  ;;  %v841_v41 = vcvt.s32.f32 %v585_v33  ;;  %v377_v42 = vunpack.c.1.s8 %v309_v4  ;;  %v318_v28 = vld [vmem:[#allocation8 + $0x48] sm:$0xff] }
  0x55   :  { %1023 = vmatpush.bf16.msrb.mxu0 %v889_v34  ;;  %v957_v44 = vpack.c.bf16 %v777_v36, %v773_v35  ;;  %v629_v45 = vcvt.s32.f32 %v373_v37  ;;  %v437_v46 = vunpack.c.0.s8 %v325_v13  ;;  %v441_v47 = vunpack.c.1.s8 %v325_v13  ;;  %v334_v37 = vld [vmem:[#allocation8 + $0xc8] sm:$0xff] }
  0x56   :  { %1036 = vmatpush.bf16.msrb.mxu1 %v921_v39  ;;  %v989_v49 = vpack.c.bf16 %v841_v41, %v837_v40  ;;  %v633_v50 = vcvt.s32.f32 %v377_v42  ;;  %v430_v51 = vunpack.c.2.s8 %v322_v38  ;;  %v434_v52 = vunpack.c.3.s8 %v322_v38 }
  0x57   :  { %1048 = vmatpush.bf16.msrb.mxu2 %v957_v44  ;;  %v693_v53 = vcvt.s32.f32 %v437_v46  ;;  %v697_v54 = vcvt.s32.f32 %v441_v47  ;;  %v494_v55 = vunpack.c.2.s8 %v338_v43  ;;  %v498_v56 = vunpack.c.3.s8 %v338_v43 }
  0x58   :  { %1061 = vmatpush.bf16.msrb.mxu3 %v989_v49  ;;  %v885_v58 = vpack.c.bf16 %v633_v50, %v629_v45  ;;  %v686_v59 = vcvt.s32.f32 %v430_v51  ;;  %v690_v60 = vcvt.s32.f32 %v434_v52  ;;  %v509_v61 = vunpack.c.2.s8 %v341_v48 }
  0x59   :  { %v917_v62 = vpack.c.bf16 %v697_v54, %v693_v53  ;;  %v750_v63 = vcvt.s32.f32 %v494_v55  ;;  %v754_v0 = vcvt.s32.f32 %v498_v56  ;;  %v513_v1 = vunpack.c.3.s8 %v341_v48 }
  0x5a   :  { %1024 = vmatpush.bf16.msrb.mxu0 %v885_v58  ;;  %v914_v2 = vpack.c.bf16 %v690_v60, %v686_v59  ;;  %v765_v3 = vcvt.s32.f32 %v509_v61  ;;  %v573_v4 = vunpack.c.2.s8 %v357_v57  ;;  %v577_v5 = vunpack.c.3.s8 %v357_v57 }
  0x5b   :  { %1037 = vmatpush.bf16.msrb.mxu1 %v917_v62  ;;  %v946_v6 = vpack.c.bf16 %v754_v0, %v750_v63  ;;  %v769_v7 = vcvt.s32.f32 %v513_v1  ;;  %v422_v8 = vunpack.c.0.s8 %v322_v38  ;;  %v426_v9 = vunpack.c.1.s8 %v322_v38  ;;  %v350_v62 = vld [vmem:[#allocation8 + $0x148] sm:$0xff] }
  0x5c   :  { %v829_v10 = vcvt.s32.f32 %v573_v4  ;;  %v833_v11 = vcvt.s32.f32 %v577_v5  ;;  %v486_v12 = vunpack.c.0.s8 %v338_v43  ;;  %v490_v13 = vunpack.c.1.s8 %v338_v43 }
  0x5d   :  { %v953_v14 = vpack.c.bf16 %v769_v7, %v765_v3  ;;  %v678_v15 = vcvt.s32.f32 %v422_v8  ;;  %v682_v16 = vcvt.s32.f32 %v426_v9  ;;  %v501_v17 = vunpack.c.0.s8 %v341_v48  ;;  %v366_v3 = vld [vmem:[#allocation8 + $0x1c8] sm:$0xff] }
  0x5e   :  { %1069 = vmatpush.bf16.msra.mxu0 %v914_v2  ;;  %v985_v19 = vpack.c.bf16 %v833_v11, %v829_v10  ;;  %v742_v20 = vcvt.s32.f32 %v486_v12  ;;  %v746_v21 = vcvt.s32.f32 %v490_v13  ;;  %v505_v22 = vunpack.c.1.s8 %v341_v48  ;;  %v314_v8 = vld [vmem:[#allocation8 + $0x28] sm:$0xff] }
  0x5f   :  { %1082 = vmatpush.bf16.msra.mxu1 %v946_v6  ;;  %1049 = vmatpush.bf16.msrb.mxu2 %v953_v14  ;;  %v910_v24 = vpack.c.bf16 %v682_v16, %v678_v15  ;;  %v757_v25 = vcvt.s32.f32 %v501_v17  ;;  %v565_v26 = vunpack.c.0.s8 %v357_v57  ;;  %v569_v27 = vunpack.c.1.s8 %v357_v57  ;;  %v330_v17 = vld [vmem:[#allocation8 + $0xa8] sm:$0xff] }
  0x60   :  { %1062 = vmatpush.bf16.msrb.mxu3 %v985_v19  ;;  %v942_v29 = vpack.c.bf16 %v746_v21, %v742_v20  ;;  %v761_v30 = vcvt.s32.f32 %v505_v22  ;;  %v558_v31 = vunpack.c.2.s8 %v354_v18  ;;  %v562_v32 = vunpack.c.3.s8 %v354_v18 }
  0x61   :  { %v821_v33 = vcvt.s32.f32 %v565_v26  ;;  %v825_v34 = vcvt.s32.f32 %v569_v27  ;;  %v622_v35 = vunpack.c.2.s8 %v370_v23  ;;  %v626_v36 = vunpack.c.3.s8 %v370_v23 }
  0x62   :  { %1070 = vmatpush.bf16.msra.mxu0 %v910_v24  ;;  %v949_v38 = vpack.c.bf16 %v761_v30, %v757_v25  ;;  %v814_v39 = vcvt.s32.f32 %v558_v31  ;;  %v818_v40 = vcvt.s32.f32 %v562_v32  ;;  %v414_v41 = vunpack.c.2.s8 %v318_v28 }
  0x63   :  { %1083 = vmatpush.bf16.msra.mxu1 %v942_v29  ;;  %v981_v42 = vpack.c.bf16 %v825_v34, %v821_v33  ;;  %v878_v43 = vcvt.s32.f32 %v622_v35  ;;  %v882_v44 = vcvt.s32.f32 %v626_v36  ;;  %v418_v45 = vunpack.c.3.s8 %v318_v28 }
  0x64   :  { %1050 = vmatpush.bf16.msrb.mxu2 %v949_v38  ;;  %v978_v46 = vpack.c.bf16 %v818_v40, %v814_v39  ;;  %v670_v47 = vcvt.s32.f32 %v414_v41  ;;  %v478_v48 = vunpack.c.2.s8 %v334_v37  ;;  %v482_v49 = vunpack.c.3.s8 %v334_v37 }
  0x65   :  { %1063 = vmatpush.bf16.msrb.mxu3 %v981_v42  ;;  %v1010_v50 = vpack.c.bf16 %v882_v44, %v878_v43  ;;  %v674_v51 = vcvt.s32.f32 %v418_v45  ;;  %v550_v52 = vunpack.c.0.s8 %v354_v18  ;;  %v554_v53 = vunpack.c.1.s8 %v354_v18 }
  0x66   :  { %v734_v54 = vcvt.s32.f32 %v478_v48  ;;  %v738_v55 = vcvt.s32.f32 %v482_v49  ;;  %v614_v56 = vunpack.c.0.s8 %v370_v23  ;;  %v618_v57 = vunpack.c.1.s8 %v370_v23 }
  0x67   :  { %v906_v58 = vpack.c.bf16 %v674_v51, %v670_v47  ;;  %v806_v59 = vcvt.s32.f32 %v550_v52  ;;  %v810_v60 = vcvt.s32.f32 %v554_v53  ;;  %v406_v61 = vunpack.c.0.s8 %v318_v28  ;;  %v346_v52 = vld [vmem:[#allocation8 + $0x128] sm:$0xff] }
  0x68   :  { %1095 = vmatpush.bf16.msra.mxu2 %v978_v46  ;;  %v938_v63 = vpack.c.bf16 %v738_v55, %v734_v54  ;;  %v870_v0 = vcvt.s32.f32 %v614_v56  ;;  %v874_v1 = vcvt.s32.f32 %v618_v57  ;;  %v410_v2 = vunpack.c.1.s8 %v318_v28  ;;  %v4029_v46 = vld [vmem:[#allocation7] sm:$0xf]  ;;  %v362_v53 = vld [vmem:[#allocation8 + $0x1a8] sm:$0xff] }
  0x69   :  { %1108 = vmatpush.bf16.msra.mxu3 %v1010_v50  ;;  %1071 = vmatpush.bf16.msra.mxu0 %v906_v58  ;;  %v974_v4 = vpack.c.bf16 %v810_v60, %v806_v59  ;;  %v662_v5 = vcvt.s32.f32 %v406_v61  ;;  %v470_v6 = vunpack.c.0.s8 %v334_v37  ;;  %v474_v7 = vunpack.c.1.s8 %v334_v37 }
  0x6a   :  { %1084 = vmatpush.bf16.msra.mxu1 %v938_v63  ;;  %v1006_v9 = vpack.c.bf16 %v874_v1, %v870_v0  ;;  %v666_v10 = vcvt.s32.f32 %v410_v2  ;;  %v542_v11 = vunpack.c.2.s8 %v350_v62  ;;  %v546_v12 = vunpack.c.3.s8 %v350_v62  ;;  %v326_v63 = vld [vmem:[#allocation8 + $0x88] sm:$0xff] }
  0x6b   :  { %v726_v13 = vcvt.s32.f32 %v470_v6  ;;  %v730_v14 = vcvt.s32.f32 %v474_v7  ;;  %v606_v15 = vunpack.c.2.s8 %v366_v3  ;;  %v610_v16 = vunpack.c.3.s8 %v366_v3 }
  0x6c   :  { %1096 = vmatpush.bf16.msra.mxu2 %v974_v4  ;;  %v902_v18 = vpack.c.bf16 %v666_v10, %v662_v5  ;;  %v798_v19 = vcvt.s32.f32 %v542_v11  ;;  %v802_v20 = vcvt.s32.f32 %v546_v12  ;;  %v398_v21 = vunpack.c.2.s8 %v314_v8 }
  0x6d   :  { %1109 = vmatpush.bf16.msra.mxu3 %v1006_v9  ;;  %v934_v22 = vpack.c.bf16 %v730_v14, %v726_v13  ;;  %v862_v23 = vcvt.s32.f32 %v606_v15  ;;  %v866_v24 = vcvt.s32.f32 %v610_v16  ;;  %v402_v25 = vunpack.c.3.s8 %v314_v8 }
  0x6e   :  { %1072 = vmatpush.bf16.msra.mxu0 %v902_v18  ;;  %v970_v26 = vpack.c.bf16 %v802_v20, %v798_v19  ;;  %v654_v27 = vcvt.s32.f32 %v398_v21  ;;  %v462_v28 = vunpack.c.2.s8 %v330_v17  ;;  %v466_v29 = vunpack.c.3.s8 %v330_v17 }
  0x6f   :  { %1085 = vmatpush.bf16.msra.mxu1 %v934_v22  ;;  %v1002_v30 = vpack.c.bf16 %v866_v24, %v862_v23  ;;  %v658_v31 = vcvt.s32.f32 %v402_v25  ;;  %v534_v32 = vunpack.c.0.s8 %v350_v62  ;;  %v538_v33 = vunpack.c.1.s8 %v350_v62  ;;  %v310_v62 = vld [vmem:[#allocation8 + $0x8] sm:$0xff] }
  0x70   :  { %1097 = vmatpush.bf16.msra.mxu2 %v970_v26  ;;  %v718_v34 = vcvt.s32.f32 %v462_v28  ;;  %v722_v35 = vcvt.s32.f32 %v466_v29  ;;  %v598_v36 = vunpack.c.0.s8 %v366_v3  ;;  %v602_v37 = vunpack.c.1.s8 %v366_v3  ;;  %v323_v28 = vld [vmem:[#allocation8 + $0x70] sm:$0xff] }
  0x71   :  { %1110 = vmatpush.bf16.msra.mxu3 %v1002_v30  ;;  %v898_v38 = vpack.c.bf16 %v658_v31, %v654_v27  ;;  %v790_v39 = vcvt.s32.f32 %v534_v32  ;;  %v794_v40 = vcvt.s32.f32 %v538_v33  ;;  %v390_v47 = vunpack.c.0.s8 %v314_v8  ;;  %v339_v29 = vld [vmem:[#allocation8 + $0xf0] sm:$0xff] }
  0x72   :  { %v930_v41 = vpack.c.bf16 %v722_v35, %v718_v34  ;;  %v854_v42 = vcvt.s32.f32 %v598_v36  ;;  %v858_v43 = vcvt.s32.f32 %v602_v37  ;;  %v394_v48 = vunpack.c.1.s8 %v314_v8 }
  0x73   :  { %1073 = vmatpush.bf16.msra.mxu0 %v898_v38  ;;  %v966_v44 = vpack.c.bf16 %v794_v40, %v790_v39  ;;  %v454_v49 = vunpack.c.0.s8 %v330_v17  ;;  %v458_v50 = vunpack.c.1.s8 %v330_v17  ;;  %v197_v51 = vperm.slane %v4029_v46, 0  ;;  %v342_v38 = vld [vmem:[#allocation8 + $0x108] sm:$0xff] }
  0x74   :  { %1086 = vmatpush.bf16.msra.mxu1 %v930_v41  ;;  %v998_v45 = vpack.c.bf16 %v858_v43, %v854_v42  ;;  %v646_v54 = vcvt.s32.f32 %v390_v47  ;;  %v650_v55 = vcvt.s32.f32 %v394_v48  ;;  %v526_v58 = vunpack.c.2.s8 %v346_v52  ;;  %v358_v43 = vld [vmem:[#allocation8 + $0x188] sm:$0xff] }
  0x75   :  { %1098 = vmatpush.bf16.msra.mxu2 %v966_v44  ;;  %v710_v56 = vcvt.s32.f32 %v454_v49  ;;  %v714_v57 = vcvt.s32.f32 %v458_v50  ;;  %v530_v59 = vunpack.c.3.s8 %v346_v52  ;;  %v590_v60 = vunpack.c.2.s8 %v362_v53 }
  0x76   :  { %1111 = vmatpush.bf16.msra.mxu3 %v998_v45  ;;  %v594_v61 = vunpack.c.3.s8 %v362_v53  ;;  %v894_v0 = vpack.c.bf16 %v650_v55, %v646_v54  ;;  %v382_v2 = vunpack.c.2.s8 %v310_v62  ;;  %v386_v3 = vunpack.c.3.s8 %v310_v62 }
  0x77   :  { %v926_v1 = vpack.c.bf16 %v714_v57, %v710_v56  ;;  %v198_v4 = vperm.slane %v4029_v46, 1  ;;  %v782_v5 = vcvt.s32.f32 %v526_v58  ;;  %v786_v6 = vcvt.s32.f32 %v530_v59 }
  0x78   :  { %v846_v7 = vcvt.s32.f32 %v590_v60  ;;  %1074 = vmatpush.bf16.msra.mxu0 %v894_v0  ;;  %v850_v8 = vcvt.s32.f32 %v594_v61  ;;  %v638_v9 = vcvt.s32.f32 %v382_v2  ;;  %v642_v10 = vcvt.s32.f32 %v386_v3 }
  0x79   :  { %1087 = vmatpush.bf16.msra.mxu1 %v926_v1  ;;  %v446_v11 = vunpack.c.2.s8 %v326_v63  ;;  %v962_v12 = vpack.c.bf16 %v786_v6, %v782_v5  ;;  %v450_v13 = vunpack.c.3.s8 %v326_v63  ;;  %v518_v14 = vunpack.c.0.s8 %v346_v52 }
  0x7a   :  { %v522_v15 = vunpack.c.1.s8 %v346_v52  ;;  %v994_v16 = vpack.c.bf16 %v850_v8, %v846_v7  ;;  %v890_v17 = vpack.c.bf16 %v642_v10, %v638_v9  ;;  %v582_v19 = vunpack.c.0.s8 %v362_v53 }
  0x7b   :  { %v702_v18 = vcvt.s32.f32 %v446_v11  ;;  %1099 = vmatpush.bf16.msra.mxu2 %v962_v12  ;;  %v706_v20 = vcvt.s32.f32 %v450_v13  ;;  %v774_v21 = vcvt.s32.f32 %v518_v14  ;;  %v586_v23 = vunpack.c.1.s8 %v362_v53  ;;  %v355_v11 = vld [vmem:[#allocation8 + $0x170] sm:$0xff] }
  0x7c   :  { %v778_v22 = vcvt.s32.f32 %v522_v15  ;;  %1112 = vmatpush.bf16.msra.mxu3 %v994_v16  ;;  %1075 = vmatpush.bf16.msra.mxu0 %v890_v17  ;;  %v838_v24 = vcvt.s32.f32 %v582_v19  ;;  %v374_v25 = vunpack.c.0.s8 %v310_v62  ;;  %v378_v26 = vunpack.c.1.s8 %v310_v62  ;;  %v371_v16 = vld [vmem:[#allocation8 + $0x1f0] sm:$0xff] }
  0x7d   :  { %v438_v27 = vunpack.c.0.s8 %v326_v63  ;;  %v922_v30 = vpack.c.bf16 %v706_v20, %v702_v18  ;;  %v199_v31 = vperm.slane %v4029_v46, 2  ;;  %v200_v32 = vperm.slane %v4029_v46, 3 }
  0x7e   :  { %v958_v33 = vpack.c.bf16 %v778_v22, %v774_v21  ;;  %v842_v34 = vcvt.s32.f32 %v586_v23  ;;  %v630_v35 = vcvt.s32.f32 %v374_v25  ;;  %v634_v36 = vcvt.s32.f32 %v378_v26  ;;  %v319_v21 = vld [vmem:[#allocation8 + $0x50] sm:$0xff] }
  0x7f   :  { %v442_v37 = vunpack.c.1.s8 %v326_v63  ;;  %1088 = vmatpush.bf16.msra.mxu1 %v922_v30  ;;  %v694_v39 = vcvt.s32.f32 %v438_v27  ;;  %v431_v40 = vunpack.c.2.s8 %v323_v28  ;;  %v435_v41 = vunpack.c.3.s8 %v323_v28  ;;  %v335_v26 = vld [vmem:[#allocation8 + $0xd0] sm:$0xff] }
  0x80   :  { %1100 = vmatpush.bf16.msra.mxu2 %v958_v33  ;;  %v495_v42 = vunpack.c.2.s8 %v339_v29  ;;  %v990_v44 = vpack.c.bf16 %v842_v34, %v838_v24  ;;  %v886_v45 = vpack.c.bf16 %v634_v36, %v630_v35  ;;  %v499_v48 = vunpack.c.3.s8 %v339_v29 }
  0x81   :  { %v698_v47 = vcvt.s32.f32 %v442_v37  ;;  %v4035_v49 = vcvt.s32.f32 %v431_v40  ;;  %v4037_v50 = vcvt.s32.f32 %v435_v41  ;;  %v510_v53 = vunpack.c.2.s8 %v342_v38 }
  0x82   :  { %v4039_v52 = vcvt.s32.f32 %v495_v42  ;;  %1113 = vmatpush.bf16.msra.mxu3 %v990_v44  ;;  %1076 = vmatpush.bf16.msra.mxu0 %v886_v45  ;;  %v4041_v55 = vcvt.s32.f32 %v499_v48  ;;  %v514_v56 = vunpack.c.3.s8 %v342_v38  ;;  %v574_v57 = vunpack.c.2.s8 %v358_v43 }
  0x83   :  { %v918_v54 = vpack.c.bf16 %v698_v47, %v694_v39  ;;  %v915_v58 = vpack.c.bf16 %v4037_v50, %v4035_v49  ;;  %v766_v59 = vcvt.s32.f32 %v510_v53  ;;  %v578_v60 = vunpack.c.3.s8 %v358_v43  ;;  %v327_v49 = vld [vmem:[#allocation8 + $0x90] sm:$0xff] }
  0x84   :  { %v423_v61 = vunpack.c.0.s8 %v323_v28  ;;  %v947_v62 = vpack.c.bf16 %v4041_v55, %v4039_v52  ;;  %v770_v63 = vcvt.s32.f32 %v514_v56  ;;  %v830_v0 = vcvt.s32.f32 %v574_v57 }
  0x85   :  { %1089 = vmatpush.bf16.msra.mxu1 %v918_v54  ;;  %v427_v1 = vunpack.c.1.s8 %v323_v28  ;;  %v834_v2 = vcvt.s32.f32 %v578_v60  ;;  %v487_v5 = vunpack.c.0.s8 %v339_v29  ;;  %v491_v6 = vunpack.c.1.s8 %v339_v29 }
  0x86   :  { %v4047_v3 = vcvt.s32.f32 %v423_v61  ;;  %v954_v7 = vpack.c.bf16 %v770_v63, %v766_v59  ;;  %v502_v9 = vunpack.c.0.s8 %v342_v38  ;;  %v506_v10 = vunpack.c.1.s8 %v342_v38 }
  0x87   :  { %v4049_v8 = vcvt.s32.f32 %v427_v1  ;;  %v986_v12 = vpack.c.bf16 %v834_v2, %v830_v0  ;;  %v4051_v13 = vcvt.s32.f32 %v487_v5  ;;  %v4053_v14 = vcvt.s32.f32 %v491_v6  ;;  %v351_v1 = vld [vmem:[#allocation8 + $0x150] sm:$0xff] }
  0x88   :  { %v566_v15 = vunpack.c.0.s8 %v358_v43  ;;  %1101 = vmatpush.bf16.msra.mxu2 %v954_v7  ;;  %v758_v18 = vcvt.s32.f32 %v502_v9  ;;  %v762_v19 = vcvt.s32.f32 %v506_v10  ;;  %v570_v20 = vunpack.c.1.s8 %v358_v43  ;;  %v367_v9 = vld [vmem:[#allocation8 + $0x1d0] sm:$0xff] }
  0x89   :  { %v911_v17 = vpack.c.bf16 %v4049_v8, %v4047_v3  ;;  %1114 = vmatpush.bf16.msra.mxu3 %v986_v12  ;;  %v943_v22 = vpack.c.bf16 %v4053_v14, %v4051_v13  ;;  %v559_v24 = vunpack.c.2.s8 %v355_v11  ;;  %v563_v25 = vunpack.c.3.s8 %v355_v11 }
  0x8a   :  { %v822_v23 = vcvt.s32.f32 %v566_v15  ;;  %v950_v27 = vpack.c.bf16 %v762_v19, %v758_v18  ;;  %v826_v28 = vcvt.s32.f32 %v570_v20  ;;  %v623_v29 = vunpack.c.2.s8 %v371_v16 }
  0x8b   :  { %v627_v30 = vunpack.c.3.s8 %v371_v16  ;;  %v4059_v33 = vcvt.s32.f32 %v559_v24  ;;  %v4061_v34 = vcvt.s32.f32 %v563_v25  ;;  %v415_v35 = vunpack.c.2.s8 %v319_v21 }
  0x8c   :  { %v419_v36 = vunpack.c.3.s8 %v319_v21  ;;  %1102 = vmatpush.bf16.msra.mxu2 %v950_v27  ;;  %v982_v37 = vpack.c.bf16 %v826_v28, %v822_v23  ;;  %v4063_v38 = vcvt.s32.f32 %v623_v29  ;;  %v479_v40 = vunpack.c.2.s8 %v335_v26  ;;  %v4101_v23 = vld [vmem:[#allocation8 + $0xb0] sm:$0xff] }
  0x8d   :  { %v4065_v39 = vcvt.s32.f32 %v627_v30  ;;  %v979_v41 = vpack.c.bf16 %v4061_v34, %v4059_v33  ;;  %v4069_v42 = vcvt.s32.f32 %v415_v35  ;;  %v483_v44 = vunpack.c.3.s8 %v335_v26 }
  0x8e   :  { %v4071_v43 = vcvt.s32.f32 %v419_v36  ;;  %1115 = vmatpush.bf16.msra.mxu3 %v982_v37  ;;  %v4075_v47 = vcvt.s32.f32 %v479_v40  ;;  %v551_v48 = vunpack.c.0.s8 %v355_v11  ;;  %v555_v53 = vunpack.c.1.s8 %v355_v11 }
  0x8f   :  { %v4079_v56 = vcvt.s32.f32 %v483_v44  ;;  %v615_v57 = vunpack.c.0.s8 %v371_v16  ;;  %v619_v59 = vunpack.c.1.s8 %v371_v16  ;;  %v407_v63 = vunpack.c.0.s8 %v319_v21  ;;  %v315_v16 = vld [vmem:[#allocation8 + $0x30] sm:$0xff] }
  0x90   :  { %v4081_v60 = vcvt.s32.f32 %v551_v48  ;;  %v4083_v61 = vcvt.s32.f32 %v555_v53  ;;  %v411_v0 = vunpack.c.1.s8 %v319_v21  ;;  %v471_v7 = vunpack.c.0.s8 %v335_v26 }
  0x91   :  { %v4087_v5 = vcvt.s32.f32 %v615_v57  ;;  %v4089_v6 = vcvt.s32.f32 %v619_v59  ;;  %v4093_v11 = vcvt.s32.f32 %v407_v63  ;;  %v475_v15 = vunpack.c.1.s8 %v335_v26 }
  0x92   :  { %v4095_v12 = vcvt.s32.f32 %v411_v0  ;;  %v4099_v19 = vcvt.s32.f32 %v471_v7  ;;  %v543_v20 = vunpack.c.2.s8 %v351_v1  ;;  %v547_v21 = vunpack.c.3.s8 %v351_v1 }
  0x93   :  { %v4105_v25 = vcvt.s32.f32 %v475_v15  ;;  %v607_v27 = vunpack.c.2.s8 %v367_v9  ;;  %v611_v28 = vunpack.c.3.s8 %v367_v9  ;;  %v399_v30 = vunpack.c.2.s8 %v315_v16 }
  0x94   :  { %v4107_v29 = vcvt.s32.f32 %v543_v20  ;;  %v4109_v26 = vcvt.s32.f32 %v547_v21  ;;  %v403_v35 = vunpack.c.3.s8 %v315_v16  ;;  %v463_v48 = vunpack.c.2.s8 %v4101_v23 }
  0x95   :  { %v4113_v40 = vcvt.s32.f32 %v607_v27  ;;  %v4115_v44 = vcvt.s32.f32 %v611_v28  ;;  %v4122_v63 = vcvt.s32.f32 %v399_v30  ;;  %v467_v20 = vunpack.c.3.s8 %v4101_v23 }
  0x96   :  { %v4124_v0 = vcvt.s32.f32 %v403_v35  ;;  %v4131_v21 = vcvt.s32.f32 %v463_v48  ;;  %v535_v28 = vunpack.c.0.s8 %v351_v1  ;;  %v599_v35 = vunpack.c.0.s8 %v367_v9 }
  0x97   :  { %v4135_v59 = vcvt.s32.f32 %v467_v20  ;;  %v603_v37 = vunpack.c.1.s8 %v367_v9  ;;  %v391_v15 = vunpack.c.0.s8 %v315_v16 }
  0x98   :  { %v4143_v10 = vcvt.s32.f32 %v599_v35  ;;  %v455_v35 = vunpack.c.0.s8 %v4101_v23 }
  0xb5   :  { %v258_v36 = vpop.f32.mrf.mxu0 }
  0xb6   :  { %v259_v53 = vadd.f32 %v258_v36, %v197_v51  ;;  %v271_v57 = vpop.f32.mrf.mxu1  ;;  %v539_v36 = vunpack.c.1.s8 %v351_v1  ;;  %v4145_v51 = vcvt.s32.f32 %v603_v37  ;;  %v4147_v1 = vld [vmem:[#allocation8 + $0x130] sm:$0xff] }
  0xb7   :  { %v272_v7 = vadd.f32 %v271_v57, %v198_v4  ;;  %v4137_v4 = vcvt.s32.f32 %v535_v28  ;;  %v4155_v28 = vld [vmem:[#allocation8 + $0x1b0] sm:$0xff]  ;;  %v527_v48 = vunpack.c.2.s8 %v4147_v1  ;;  %v531_v46 = vunpack.c.3.s8 %v4147_v1 }
  0xb8   :  { %v301_v27 = vmul.f32 0.2, %v259_v53  ;;  %v4139_v57 = vcvt.s32.f32 %v539_v36 }
  0xb9   :  { %v302_v30 = vmul.f32 0.2, %v272_v7 }
  0xba   :  { %v305_v24 = vmax.f32 %v259_v53, %v301_v27  ;;  %v395_v53 = vunpack.c.1.s8 %v315_v16  ;;  %v4153_v27 = vcvt.s32.f32 %v391_v15 }
  0xbb   :  { %v306_v18 = vmax.f32 %v272_v7, %v302_v30 }
  0xbc   :  { %v4149_v20 = vpack.c.bf16 %v305_v24, %v305_v24  ;;  %v4167_v15 = vcvt.s32.f32 %v395_v53 }
  0xbd   :  { %v284_v2 = vpop.f32.mrf.mxu2  ;;  %v4157_v7 = vpack.c.bf16 %v306_v18, %v306_v18  ;;  %v297_v37 = vpop.f32.mrf.mxu3  ;;  %v459_v18 = vunpack.c.1.s8 %v4101_v23 }
  0xbe   :  { %v285_v36 = vadd.f32 %v284_v2, %v199_v31  ;;  %v260_v30 = vpop.f32.mrf.mxu0  ;;  %v298_v9 = vadd.f32 %v297_v37, %v200_v32  ;;  %1025 = vmatmul.bf16.vlgmr.msrb.gmra.mxu0 %v4149_v20  ;;  %v273_v16 = vpop.f32.mrf.mxu1  ;;  %v4175_v2 = vcvt.s32.f32 %v455_v35  ;;  %v591_v32 = vunpack.c.2.s8 %v4155_v28  ;;  %v311_v37 = vld [vmem:[#allocation8 + $0x10] sm:$0xff] }
  0xbf   :  { %1038 = vmatmul.bf16.vlgmr.msrb.gmra.mxu1 %v4157_v7  ;;  %1121 = vmatpush.bf16.msrb.mxu0 %v915_v58  ;;  %v895_v23 = vpack.c.bf16 %v4167_v15, %v4153_v27  ;;  %v4184_v30 = vcvt.s32.f32 %v459_v18  ;;  %v4186_v16 = vcvt.s32.f32 %v527_v48  ;;  %v4188_v58 = vcvt.s32.f32 %v531_v46 }
  0xc0   :  { %v303_v31 = vmul.f32 0.2, %v285_v36  ;;  %v304_v53 = vmul.f32 0.2, %v298_v9  ;;  %1134 = vmatpush.bf16.msrb.mxu1 %v947_v62  ;;  %v595_v35 = vunpack.c.3.s8 %v4155_v28  ;;  %v4191_v24 = vcvt.s32.f32 %v591_v32 }
  0xc1   :  { %v927_v52 = vpack.c.bf16 %v4184_v30, %v4175_v2  ;;  %v383_v55 = vunpack.c.2.s8 %v311_v37  ;;  %v387_v62 = vunpack.c.3.s8 %v311_v37  ;;  %v963_v48 = vpack.c.bf16 %v4188_v58, %v4186_v16 }
  0xc2   :  { %v307_v50 = vmax.f32 %v285_v36, %v303_v31  ;;  %v308_v54 = vmax.f32 %v298_v9, %v304_v53  ;;  %v4202_v36 = vcvt.s32.f32 %v595_v35  ;;  %v447_v18 = vunpack.c.2.s8 %v327_v49 }
  0xc3   :  { %1122 = vmatpush.bf16.msrb.mxu0 %v911_v17  ;;  %v4209_v46 = vcvt.s32.f32 %v383_v55  ;;  %v4211_v32 = vcvt.s32.f32 %v387_v62  ;;  %v451_v53 = vunpack.c.3.s8 %v327_v49  ;;  %v587_v35 = vunpack.c.1.s8 %v4155_v28 }
  0xc4   :  { %v4195_v45 = vpack.c.bf16 %v307_v50, %v307_v50  ;;  %v4204_v31 = vpack.c.bf16 %v308_v54, %v308_v54  ;;  %1135 = vmatpush.bf16.msrb.mxu1 %v943_v22  ;;  %v995_v8 = vpack.c.bf16 %v4202_v36, %v4191_v24  ;;  %v4216_v17 = vcvt.s32.f32 %v447_v18  ;;  %v324_v18 = vld [vmem:[#allocation8 + $0x78] sm:$0xff] }
  0xc5   :  { %v286_v9 = vpop.f32.mrf.mxu2  ;;  %v299_v3 = vpop.f32.mrf.mxu3  ;;  %v519_v54 = vunpack.c.0.s8 %v4147_v1  ;;  %v523_v50 = vunpack.c.1.s8 %v4147_v1  ;;  %v891_v13 = vpack.c.bf16 %v4211_v32, %v4209_v46  ;;  %v4226_v14 = vcvt.s32.f32 %v451_v53 }
  0xc6   :  { %1051 = vmatmul.bf16.vlgmr.msrb.gmra.mxu2 %v4195_v45  ;;  %1064 = vmatmul.bf16.vlgmr.msrb.gmra.mxu3 %v4204_v31  ;;  %v583_v22 = vunpack.c.0.s8 %v4155_v28  ;;  %v4924_v55 = vpack.c.bf16 %v4065_v39, %v4063_v38  ;;  %v4925_v1 = vpack.c.bf16 %v4071_v43, %v4069_v42  ;;  %v375_v34 = vunpack.c.0.s8 %v311_v37  ;;  %v340_v43 = vld [vmem:[#allocation8 + $0xf8] sm:$0xff] }
  0xc7   :  { %1147 = vmatpush.bf16.msrb.mxu2 %v979_v41  ;;  %v4236_v62 = vcvt.s32.f32 %v519_v54  ;;  %v4238_v33 = vcvt.s32.f32 %v523_v50  ;;  %v379_v41 = vunpack.c.1.s8 %v311_v37  ;;  %v4926_v9 = vpack.c.bf16 %v4079_v56, %v4075_v47  ;;  %v343_v50 = vld [vmem:[#allocation8 + $0x110] sm:$0xff] }
  0xc8   :  { %1160 = vmatpush.bf16.msrb.mxu3 %v4924_v55  ;;  %1123 = vmatpush.bf16.msrb.mxu0 %v4925_v1  ;;  %v923_v28 = vpack.c.bf16 %v4226_v14, %v4216_v17  ;;  %v4245_v38 = vcvt.s32.f32 %v583_v22  ;;  %v4247_v39 = vcvt.s32.f32 %v587_v35  ;;  %v439_v42 = vunpack.c.0.s8 %v327_v49  ;;  %v359_v1 = vld [vmem:[#allocation8 + $0x190] sm:$0xff] }
  0xc9   :  { %1136 = vmatpush.bf16.msrb.mxu1 %v4926_v9  ;;  %v959_v53 = vpack.c.bf16 %v4238_v33, %v4236_v62  ;;  %v4251_v3 = vcvt.s32.f32 %v375_v34  ;;  %v4253_v37 = vcvt.s32.f32 %v379_v41  ;;  %v443_v54 = vunpack.c.1.s8 %v327_v49 }
  0xca   :  { %v4927_v47 = vpack.c.bf16 %v4083_v61, %v4081_v60  ;;  %v4260_v22 = vcvt.s32.f32 %v439_v42  ;;  %v432_v35 = vunpack.c.2.s8 %v324_v18  ;;  %v436_v55 = vunpack.c.3.s8 %v324_v18 }
  0xcb   :  { %v4928_v34 = vpack.c.bf16 %v4089_v6, %v4087_v5  ;;  %v4929_v49 = vpack.c.bf16 %v4095_v12, %v4093_v11  ;;  %v887_v60 = vpack.c.bf16 %v4253_v37, %v4251_v3  ;;  %v4270_v61 = vcvt.s32.f32 %v443_v54  ;;  %v356_v11 = vld [vmem:[#allocation8 + $0x178] sm:$0xff] }
  0xcc   :  { %1148 = vmatpush.bf16.msrb.mxu2 %v4927_v47  ;;  %v496_v41 = vunpack.c.2.s8 %v340_v43  ;;  %v500_v9 = vunpack.c.3.s8 %v340_v43  ;;  %v4930_v42 = vpack.c.bf16 %v4105_v25, %v4099_v19  ;;  %v4275_v47 = vcvt.s32.f32 %v432_v35 }
  0xcd   :  { %1161 = vmatpush.bf16.msrb.mxu3 %v4928_v34  ;;  %1124 = vmatpush.bf16.msrb.mxu0 %v4929_v49  ;;  %v4277_v56 = vcvt.s32.f32 %v436_v55  ;;  %v511_v5 = vunpack.c.2.s8 %v343_v50  ;;  %v515_v6 = vunpack.c.3.s8 %v343_v50  ;;  %v575_v54 = vunpack.c.2.s8 %v359_v1 }
  0xce   :  { %1137 = vmatpush.bf16.msrb.mxu1 %v4930_v42  ;;  %v4281_v12 = vcvt.s32.f32 %v496_v41  ;;  %v4283_v34 = vcvt.s32.f32 %v500_v9  ;;  %v4931_v49 = vpack.c.bf16 %v4109_v26, %v4107_v29  ;;  %1077 = vmatmul.bf16.vlgmr.msra.gmra.mxu0 %v4149_v20  ;;  %v579_v55 = vunpack.c.3.s8 %v359_v1 }
  0xcf   :  { %v4291_v25 = vcvt.s32.f32 %v511_v5  ;;  %v4293_v35 = vcvt.s32.f32 %v515_v6  ;;  %v4932_v41 = vpack.c.bf16 %v4115_v44, %v4113_v40  ;;  %1090 = vmatmul.bf16.vlgmr.msra.gmra.mxu1 %v4157_v7  ;;  %v4301_v26 = vcvt.s32.f32 %v575_v54 }
  0xd0   :  { %1149 = vmatpush.bf16.msrb.mxu2 %v4931_v49  ;;  %v424_v9 = vunpack.c.0.s8 %v324_v18  ;;  %v428_v42 = vunpack.c.1.s8 %v324_v18  ;;  %v4933_v5 = vpack.c.bf16 %v4124_v0, %v4122_v63  ;;  %v4934_v6 = vpack.c.bf16 %v4135_v59, %v4131_v21 }
  0xd1   :  { %1162 = vmatpush.bf16.msrb.mxu3 %v4932_v41  ;;  %v955_v40 = vpack.c.bf16 %v4293_v35, %v4291_v25  ;;  %v4311_v44 = vcvt.s32.f32 %v579_v55  ;;  %v488_v49 = vunpack.c.0.s8 %v340_v43  ;;  %v492_v41 = vunpack.c.1.s8 %v340_v43  ;;  %v372_v43 = vld [vmem:[#allocation8 + $0x1f8] sm:$0xff] }
  0xd2   :  { %1125 = vmatpush.bf16.msrb.mxu0 %v4933_v5  ;;  %1138 = vmatpush.bf16.msrb.mxu1 %v4934_v6  ;;  %v4313_v29 = vcvt.s32.f32 %v424_v9  ;;  %v4315_v54 = vcvt.s32.f32 %v428_v42  ;;  %v503_v18 = vunpack.c.0.s8 %v343_v50  ;;  %v507_v19 = vunpack.c.1.s8 %v343_v50  ;;  %v320_v5 = vld [vmem:[#allocation8 + $0x58] sm:$0xff] }
  0xd3   :  { %v4935_v63 = vpack.c.bf16 %v4139_v57, %v4137_v4  ;;  %v987_v59 = vpack.c.bf16 %v4311_v44, %v4301_v26  ;;  %v4322_v0 = vcvt.s32.f32 %v488_v49  ;;  %v4324_v21 = vcvt.s32.f32 %v492_v41  ;;  %v336_v41 = vld [vmem:[#allocation8 + $0xd8] sm:$0xff] }
  0xd4   :  { %v567_v55 = vunpack.c.0.s8 %v359_v1  ;;  %v4936_v9 = vpack.c.bf16 %v4145_v51, %v4143_v10  ;;  %v912_v50 = vpack.c.bf16 %v4315_v54, %v4313_v29  ;;  %v4331_v42 = vcvt.s32.f32 %v503_v18 }
  0xd5   :  { %1150 = vmatpush.bf16.msrb.mxu2 %v4935_v63  ;;  %v4333_v4 = vcvt.s32.f32 %v507_v19  ;;  %v571_v57 = vunpack.c.1.s8 %v359_v1  ;;  %v944_v10 = vpack.c.bf16 %v4324_v21, %v4322_v0  ;;  %v560_v6 = vunpack.c.2.s8 %v356_v11 }
  0xd6   :  { %1163 = vmatpush.bf16.msrb.mxu3 %v4936_v9  ;;  %1126 = vmatpush.bf16.msrb.mxu0 %v895_v23  ;;  %v4343_v51 = vcvt.s32.f32 %v567_v55  ;;  %v564_v49 = vunpack.c.3.s8 %v356_v11  ;;  %v624_v27 = vunpack.c.2.s8 %v372_v43  ;;  %v628_v15 = vunpack.c.3.s8 %v372_v43 }
  0xd7   :  { %1139 = vmatpush.bf16.msrb.mxu1 %v927_v52  ;;  %1103 = vmatmul.bf16.vlgmr.msra.gmra.mxu2 %v4195_v45  ;;  %v951_v1 = vpack.c.bf16 %v4333_v4, %v4331_v42  ;;  %v4348_v19 = vcvt.s32.f32 %v571_v57  ;;  %v4354_v2 = vcvt.s32.f32 %v560_v6  ;;  %v416_v30 = vunpack.c.2.s8 %v320_v5 }
  0xd8   :  { %1116 = vmatmul.bf16.vlgmr.msra.gmra.mxu3 %v4204_v31  ;;  %v4356_v23 = vcvt.s32.f32 %v564_v49  ;;  %v420_v52 = vunpack.c.3.s8 %v320_v5  ;;  %v4363_v63 = vcvt.s32.f32 %v624_v27  ;;  %v4365_v55 = vcvt.s32.f32 %v628_v15  ;;  %v352_v15 = vld [vmem:[#allocation8 + $0x158] sm:$0xff] }
  0xd9   :  { %1151 = vmatpush.bf16.msrb.mxu2 %v963_v48  ;;  %v983_v18 = vpack.c.bf16 %v4348_v19, %v4343_v51  ;;  %v480_v9 = vunpack.c.2.s8 %v336_v41  ;;  %v4375_v16 = vcvt.s32.f32 %v416_v30  ;;  %v484_v48 = vunpack.c.3.s8 %v336_v41 }
  0xda   :  { %1164 = vmatpush.bf16.msrb.mxu3 %v995_v8  ;;  %1127 = vmatpush.bf16.msrb.mxu0 %v891_v13  ;;  %v980_v24 = vpack.c.bf16 %v4356_v23, %v4354_v2  ;;  %v4377_v58 = vcvt.s32.f32 %v420_v52  ;;  %v1012_v36 = vpack.c.bf16 %v4365_v55, %v4363_v63  ;;  %v552_v57 = vunpack.c.0.s8 %v356_v11  ;;  %v316_v2 = vld [vmem:[#allocation8 + $0x38] sm:$0xff] }
  0xdb   :  { %1140 = vmatpush.bf16.msrb.mxu1 %v923_v28  ;;  %v4381_v8 = vcvt.s32.f32 %v480_v9  ;;  %v556_v46 = vunpack.c.1.s8 %v356_v11  ;;  %v4388_v17 = vcvt.s32.f32 %v484_v48  ;;  %v616_v13 = vunpack.c.0.s8 %v372_v43  ;;  %v4428_v23 = vld [vmem:[#allocation8 + $0xb8] sm:$0xff] }
  0xdc   :  { %v908_v32 = vpack.c.bf16 %v4377_v58, %v4375_v16  ;;  %v620_v14 = vunpack.c.1.s8 %v372_v43  ;;  %v4937_v28 = vpack.c.bf16 %v4247_v39, %v4245_v38  ;;  %v4393_v6 = vcvt.s32.f32 %v552_v57  ;;  %v368_v43 = vld [vmem:[#allocation8 + $0x1d8] sm:$0xff] }
  0xdd   :  { %1152 = vmatpush.bf16.msrb.mxu2 %v959_v53  ;;  %v4395_v49 = vcvt.s32.f32 %v556_v46  ;;  %v408_v11 = vunpack.c.0.s8 %v320_v5  ;;  %v412_v27 = vunpack.c.1.s8 %v320_v5  ;;  %v4938_v62 = vpack.c.bf16 %v4270_v61, %v4260_v22 }
  0xde   :  { %1165 = vmatpush.bf16.msrb.mxu3 %v4937_v28  ;;  %1128 = vmatpush.bf16.msrb.mxu0 %v887_v60  ;;  %v940_v33 = vpack.c.bf16 %v4388_v17, %v4381_v8  ;;  %v4405_v38 = vcvt.s32.f32 %v616_v13  ;;  %v4407_v39 = vcvt.s32.f32 %v620_v14  ;;  %v472_v53 = vunpack.c.0.s8 %v336_v41  ;;  %v348_v13 = vld [vmem:[#allocation8 + $0x138] sm:$0xff] }
  0xdf   :  { %1141 = vmatpush.bf16.msrb.mxu1 %v4938_v62  ;;  %v4939_v5 = vpack.c.bf16 %v4277_v56, %v4275_v47  ;;  %v4940_v3 = vpack.c.bf16 %v4283_v34, %v4281_v12  ;;  %v976_v37 = vpack.c.bf16 %v4395_v49, %v4393_v6  ;;  %v4417_v22 = vcvt.s32.f32 %v408_v11  ;;  %v312_v49 = vld [vmem:[#allocation8 + $0x18] sm:$0xff] }
  0xe0   :  { %v4419_v60 = vcvt.s32.f32 %v412_v27  ;;  %v476_v61 = vunpack.c.1.s8 %v336_v41  ;;  %v1008_v56 = vpack.c.bf16 %v4407_v39, %v4405_v38  ;;  %v4426_v47 = vcvt.s32.f32 %v472_v53 }
  0xe1   :  { %1153 = vmatpush.bf16.msrb.mxu2 %v955_v40  ;;  %v544_v12 = vunpack.c.2.s8 %v352_v15  ;;  %v548_v34 = vunpack.c.3.s8 %v352_v15  ;;  %1129 = vmatmul.bf16.vlgmr.msrb.gmra.mxu0 %v4149_v20  ;;  %v608_v35 = vunpack.c.2.s8 %v368_v43  ;;  %v612_v40 = vunpack.c.3.s8 %v368_v43 }
  0xe2   :  { %1173 = vmatpush.bf16.msra.mxu0 %v4939_v5  ;;  %1166 = vmatpush.bf16.msrb.mxu3 %v987_v59  ;;  %v904_v41 = vpack.c.bf16 %v4419_v60, %v4417_v22  ;;  %v732_v25 = vcvt.s32.f32 %v476_v61  ;;  %v400_v63 = vunpack.c.2.s8 %v316_v2  ;;  %v404_v55 = vunpack.c.3.s8 %v316_v2 }
  0xe3   :  { %1186 = vmatpush.bf16.msra.mxu1 %v4940_v3  ;;  %v800_v30 = vcvt.s32.f32 %v544_v12  ;;  %v804_v52 = vcvt.s32.f32 %v548_v34  ;;  %v864_v44 = vcvt.s32.f32 %v608_v35  ;;  %v868_v59 = vcvt.s32.f32 %v612_v40 }
  0xe4   :  { %1142 = vmatmul.bf16.vlgmr.msrb.gmra.mxu1 %v4157_v7  ;;  %v936_v26 = vpack.c.bf16 %v732_v25, %v4426_v47  ;;  %v464_v9 = vunpack.c.2.s8 %v4428_v23  ;;  %v656_v58 = vcvt.s32.f32 %v400_v63  ;;  %v660_v48 = vcvt.s32.f32 %v404_v55 }
  0xe5   :  { %1154 = vmatpush.bf16.msrb.mxu2 %v951_v1  ;;  %v972_v16 = vpack.c.bf16 %v804_v52, %v800_v30  ;;  %v468_v29 = vunpack.c.3.s8 %v4428_v23  ;;  %v1004_v54 = vpack.c.bf16 %v868_v59, %v864_v44  ;;  %v536_v21 = vunpack.c.0.s8 %v352_v15 }
  0xe6   :  { %1174 = vmatpush.bf16.msra.mxu0 %v912_v50  ;;  %1167 = vmatpush.bf16.msrb.mxu3 %v983_v18  ;;  %v720_v0 = vcvt.s32.f32 %v464_v9  ;;  %v540_v50 = vunpack.c.1.s8 %v352_v15  ;;  %v600_v57 = vunpack.c.0.s8 %v368_v43  ;;  %v604_v42 = vunpack.c.1.s8 %v368_v43 }
  0xe7   :  { %1187 = vmatpush.bf16.msra.mxu1 %v944_v10  ;;  %v900_v10 = vpack.c.bf16 %v660_v48, %v656_v58  ;;  %v724_v8 = vcvt.s32.f32 %v468_v29  ;;  %v792_v4 = vcvt.s32.f32 %v536_v21  ;;  %v392_v46 = vunpack.c.0.s8 %v316_v2 }
  0xe8   :  { %v796_v1 = vcvt.s32.f32 %v540_v50  ;;  %v396_v17 = vunpack.c.1.s8 %v316_v2  ;;  %1155 = vmatmul.bf16.vlgmr.msrb.gmra.mxu2 %v4195_v45  ;;  %v856_v19 = vcvt.s32.f32 %v600_v57  ;;  %v860_v18 = vcvt.s32.f32 %v604_v42 }
  0xe9   :  { %1199 = vmatpush.bf16.msra.mxu2 %v980_v24  ;;  %1168 = vmatmul.bf16.vlgmr.msrb.gmra.mxu3 %v4204_v31  ;;  %v932_v51 = vpack.c.bf16 %v724_v8, %v720_v0  ;;  %v456_v24 = vunpack.c.0.s8 %v4428_v23  ;;  %v648_v28 = vcvt.s32.f32 %v392_v46  ;;  %v460_v6 = vunpack.c.1.s8 %v4428_v23  ;;  %v360_v0 = vld [vmem:[#allocation8 + $0x198] sm:$0xff] }
  0xea   :  { %1212 = vmatpush.bf16.msra.mxu3 %v1012_v36  ;;  %1175 = vmatpush.bf16.msra.mxu0 %v908_v32  ;;  %v364_v36 = vld [vmem:[#allocation8 + $0x1b8] sm:$0xff]  ;;  %v968_v14 = vpack.c.bf16 %v796_v1, %v792_v4  ;;  %v652_v32 = vcvt.s32.f32 %v396_v17  ;;  %v1000_v11 = vpack.c.bf16 %v860_v18, %v856_v19  ;;  %v528_v15 = vunpack.c.2.s8 %v348_v13 }
  0xeb   :  { %1188 = vmatpush.bf16.msra.mxu1 %v940_v33  ;;  %v712_v27 = vcvt.s32.f32 %v456_v24  ;;  %v532_v62 = vunpack.c.3.s8 %v348_v13  ;;  %v328_v33 = vld [vmem:[#allocation8 + $0x98] sm:$0xff]  ;;  %v716_v39 = vcvt.s32.f32 %v460_v6  ;;  %v592_v53 = vunpack.c.2.s8 %v364_v36 }
  0xec   :  { %v896_v38 = vpack.c.bf16 %v652_v32, %v648_v28  ;;  %v596_v43 = vunpack.c.3.s8 %v364_v36  ;;  %v784_v5 = vcvt.s32.f32 %v528_v15  ;;  %v388_v22 = vunpack.c.3.s8 %v312_v49 }
  0xed   :  { %1200 = vmatpush.bf16.msra.mxu2 %v976_v37  ;;  %v788_v3 = vcvt.s32.f32 %v532_v62  ;;  %v384_v37 = vunpack.c.2.s8 %v312_v49  ;;  %v928_v60 = vpack.c.bf16 %v716_v39, %v712_v27  ;;  %v848_v61 = vcvt.s32.f32 %v592_v53 }
  0xee   :  { %1213 = vmatpush.bf16.msra.mxu3 %v1008_v56  ;;  %1176 = vmatpush.bf16.msra.mxu0 %v904_v41  ;;  %v852_v2 = vcvt.s32.f32 %v596_v43  ;;  %v448_v56 = vunpack.c.2.s8 %v328_v33  ;;  %v644_v34 = vcvt.s32.f32 %v388_v22  ;;  %v452_v23 = vunpack.c.3.s8 %v328_v33  ;;  %v1432_v43 = vld [vmem:[#allocation16 + $0xc0] sm:$0xff] }
  0xef   :  { %1189 = vmatpush.bf16.msra.mxu1 %v936_v26  ;;  %v964_v47 = vpack.c.bf16 %v788_v3, %v784_v5  ;;  %v640_v12 = vcvt.s32.f32 %v384_v37  ;;  %v520_v35 = vunpack.c.0.s8 %v348_v13  ;;  %v524_v40 = vunpack.c.1.s8 %v348_v13 }
  0xf0   :  { %v996_v41 = vpack.c.bf16 %v852_v2, %v848_v61  ;;  %v704_v25 = vcvt.s32.f32 %v448_v56  ;;  %v708_v52 = vcvt.s32.f32 %v452_v23  ;;  %v584_v63 = vunpack.c.0.s8 %v364_v36 }
  0xf1   :  { %1201 = vmatpush.bf16.msra.mxu2 %v972_v16  ;;  %v892_v30 = vpack.c.bf16 %v644_v34, %v640_v12  ;;  %v588_v55 = vunpack.c.1.s8 %v364_v36  ;;  %v776_v26 = vcvt.s32.f32 %v520_v35  ;;  %v780_v44 = vcvt.s32.f32 %v524_v40  ;;  %v344_v16 = vld [vmem:[#allocation8 + $0x118] sm:$0xff] }
  0xf2   :  { %1214 = vmatpush.bf16.msra.mxu3 %v1004_v54  ;;  %1177 = vmatpush.bf16.msra.mxu0 %v900_v10  ;;  %v376_v59 = vunpack.c.0.s8 %v312_v49  ;;  %v380_v9 = vunpack.c.1.s8 %v312_v49  ;;  %v924_v58 = vpack.c.bf16 %v708_v52, %v704_v25  ;;  %v840_v48 = vcvt.s32.f32 %v584_v63 }
  0xf3   :  { %1190 = vmatpush.bf16.msra.mxu1 %v932_v51  ;;  %v844_v29 = vcvt.s32.f32 %v588_v55  ;;  %v440_v54 = vunpack.c.0.s8 %v328_v33  ;;  %v960_v21 = vpack.c.bf16 %v780_v44, %v776_v26  ;;  %v444_v8 = vunpack.c.1.s8 %v328_v33 }
  0xf4   :  { %v632_v50 = vcvt.s32.f32 %v376_v59  ;;  %v636_v10 = vcvt.s32.f32 %v380_v9  ;;  %v512_v4 = vunpack.c.2.s8 %v344_v16  ;;  %v516_v1 = vunpack.c.3.s8 %v344_v16  ;;  %v1416_v59 = vld [vmem:[#allocation16 + $0x40] sm:$0xff] }
  0xf5   :  { %1202 = vmatpush.bf16.msra.mxu2 %v968_v14  ;;  %v992_v57 = vpack.c.bf16 %v844_v29, %v840_v48  ;;  %v696_v42 = vcvt.s32.f32 %v440_v54  ;;  %v700_v17 = vcvt.s32.f32 %v444_v8  ;;  %v576_v13 = vunpack.c.2.s8 %v360_v0  ;;  %v1464_v9 = vld [vmem:[#allocation16 + $0x1c0] sm:$0xff] }
  0xf6   :  { %1215 = vmatpush.bf16.msra.mxu3 %v1000_v11  ;;  %1178 = vmatpush.bf16.msra.mxu0 %v896_v38  ;;  %v888_v46 = vpack.c.bf16 %v636_v10, %v632_v50  ;;  %v580_v51 = vunpack.c.3.s8 %v360_v0  ;;  %v768_v19 = vcvt.s32.f32 %v512_v4  ;;  %v772_v18 = vcvt.s32.f32 %v516_v1  ;;  %v4463_v50 = vld [vmem:[#allocation10] sm:$0xf] }
  0xf7   :  { %1191 = vmatpush.bf16.msra.mxu1 %v928_v60  ;;  %v504_v24 = vunpack.c.0.s8 %v344_v16  ;;  %v508_v36 = vunpack.c.1.s8 %v344_v16  ;;  %v920_v14 = vpack.c.bf16 %v700_v17, %v696_v42  ;;  %v832_v28 = vcvt.s32.f32 %v576_v13 }
  0xf8   :  { %v836_v32 = vcvt.s32.f32 %v580_v51  ;;  %v568_v6 = vunpack.c.0.s8 %v360_v0  ;;  %v572_v49 = vunpack.c.1.s8 %v360_v0  ;;  %v956_v11 = vpack.c.bf16 %v772_v18, %v768_v19 }
  0xf9   :  { %1203 = vmatpush.bf16.msra.mxu2 %v964_v47  ;;  %v760_v27 = vcvt.s32.f32 %v504_v24  ;;  %v764_v15 = vcvt.s32.f32 %v508_v36  ;;  %v1648_v5 = vunpack.c.2.s8 %v1432_v43  ;;  %v1656_v3 = vunpack.c.3.s8 %v1432_v43 }
  0xfa   :  { %1216 = vmatpush.bf16.msra.mxu3 %v996_v41  ;;  %1179 = vmatpush.bf16.msra.mxu0 %v892_v30  ;;  %v988_v62 = vpack.c.bf16 %v836_v32, %v832_v28  ;;  %v824_v33 = vcvt.s32.f32 %v568_v6  ;;  %v828_v38 = vcvt.s32.f32 %v572_v49  ;;  %v3927_v37 = vmov 8.0  }
  0xfb   :  { %1192 = vmatpush.bf16.msra.mxu1 %v924_v58  ;;  %v952_v39 = vpack.c.bf16 %v764_v15, %v760_v27  ;;  %3565 = vrcp.f32 %v3927_v37  ;;  %v2160_v22 = vcvt.s32.f32 %v1648_v5  ;;  %v2168_v60 = vcvt.s32.f32 %v1656_v3 }
  0xfc   :  { %v984_v53 = vpack.c.bf16 %v828_v38, %v824_v33  ;;  %v1632_v2 = vunpack.c.0.s8 %v1432_v43  ;;  %v1640_v56 = vunpack.c.1.s8 %v1432_v43  ;;  %v1584_v48 = vunpack.c.2.s8 %v1416_v59  ;;  %v1408_v33 = vld [vmem:[#allocation16] sm:$0xff] }
  0xfd   :  { %1204 = vmatpush.bf16.msra.mxu2 %v960_v21  ;;  %v2616_v61 = vpack.c.bf16 %v2168_v60, %v2160_v22  ;;  %v1592_v29 = vunpack.c.3.s8 %v1416_v59  ;;  %v1776_v54 = vunpack.c.2.s8 %v1464_v9  ;;  %v1784_v21 = vunpack.c.3.s8 %v1464_v9  ;;  %v1456_v38 = vld [vmem:[#allocation16 + $0x180] sm:$0xff] }
  0xfe   :  { %1217 = vmatpush.bf16.msra.mxu3 %v992_v57  ;;  %1180 = vmatpush.bf16.msra.mxu0 %v888_v46  ;;  %v2152_v47 = vcvt.s32.f32 %v1640_v56  ;;  %v2096_v10 = vcvt.s32.f32 %v1584_v48  ;;  %v4466_v46 = vld [vmem:[#allocation11] sm:$0xf]  ;;  %v1568_v13 = vunpack.c.0.s8 %v1416_v59  ;;  %v1576_v51 = vunpack.c.1.s8 %v1416_v59 }
  0xff   :  { %1193 = vmatpush.bf16.msra.mxu1 %v920_v14  ;;  %v2104_v8 = vcvt.s32.f32 %v1592_v29  ;;  %v2288_v57 = vcvt.s32.f32 %v1776_v54  ;;  %v2296_v1 = vcvt.s32.f32 %v1784_v21  ;;  %v1760_v19 = vunpack.c.0.s8 %v1464_v9  ;;  %v1448_v54 = vld [vmem:[#allocation16 + $0x140] sm:$0xff] }
 0x100   :  { %v1227_v24 = vperm.slane %v4463_v50, 0  ;;  %v1768_v14 = vunpack.c.1.s8 %v1464_v9  ;;  %v2080_v6 = vcvt.s32.f32 %v1568_v13  ;;  %v2088_v49 = vcvt.s32.f32 %v1576_v51 }
 0x101   :  { %1205 = vmatpush.bf16.msra.mxu2 %v956_v11  ;;  %1181 = vmatmul.bf16.vlgmr.msra.gmra.mxu0 %v4149_v20  ;;  %v2144_v20 = vcvt.s32.f32 %v1632_v2  ;;  %v4460_v12 = vpop.eup %3565  ;;  %v2584_v17 = vpack.c.bf16 %v2104_v8, %v2096_v10  ;;  %v2680_v36 = vpack.c.bf16 %v2296_v1, %v2288_v57  ;;  %v2272_v11 = vcvt.s32.f32 %v1760_v19 }
 0x102   :  { %1218 = vmatpush.bf16.msra.mxu3 %v988_v62  ;;  %1194 = vmatmul.bf16.vlgmr.msra.gmra.mxu1 %v4157_v7  ;;  %v1424_v7 = vld [vmem:[#allocation16 + $0x80] sm:$0xff]  ;;  %v1278_v40 = vmul.f32 8.0, %v4460_v12  ;;  %v1241_v27 = vperm.slane %v4466_v46, 0  ;;  %vm1282_vm1 = vweird.f32 %v4460_v12  ;;  %v2280_v62 = vcvt.s32.f32 %v1768_v14 }
 0x103   :  { %2820 = vmatpush.bf16.msrb.mxu0 %v2616_v61  ;;  %v1616_v23 = vunpack.c.2.s8 %v1424_v7  ;;  %v1600_v52 = vunpack.c.0.s8 %v1424_v7  ;;  %v1608_v63 = vunpack.c.1.s8 %v1424_v7  ;;  %2833 = vmatpush.bf16.msrb.mxu1 %v2680_v36  ;;  %v2576_v43 = vpack.c.bf16 %v2088_v49, %v2080_v6 }
 0x104   :  { %v1279_v44 = vsub.f32 1.0, %v1278_v40  ;;  %v1552_v5 = vunpack.c.2.s8 %v1408_v33  ;;  %v1560_v3 = vunpack.c.3.s8 %v1408_v33  ;;  %v2672_v22 = vpack.c.bf16 %v2280_v62, %v2272_v11 }
 0x105   :  { %1206 = vmatpush.bf16.msra.mxu2 %v952_v39  ;;  %v2128_v25 = vcvt.s32.f32 %v1616_v23  ;;  %v2112_v55 = vcvt.s32.f32 %v1600_v52  ;;  %v2120_v26 = vcvt.s32.f32 %v1608_v63  ;;  %v1744_v60 = vunpack.c.2.s8 %v1456_v38 }
 0x106   :  { %1219 = vmatpush.bf16.msra.mxu3 %v984_v53  ;;  %v1280_v4 = vmul.f32 %v4460_v12, %v1279_v44  ;;  %v1752_v61 = vunpack.c.3.s8 %v1456_v38  ;;  %v1228_v56 = vperm.slane %v4463_v50, 1  ;;  %v1728_v63 = vunpack.c.0.s8 %v1456_v38 }
 0x107   :  { %v2592_v58 = vpack.c.bf16 %v2120_v26, %v2112_v55  ;;  %2834 = vmatpush.bf16.msrb.mxu1 %v2672_v22  ;;  %v1736_v55 = vunpack.c.1.s8 %v1456_v38  ;;  %v1720_v13 = vunpack.c.3.s8 %v1448_v54 }
 0x108   :  { %1207 = vmatmul.bf16.vlgmr.msra.gmra.mxu2 %v4195_v45  ;;  %v2608_v45 = vpack.c.bf16 %v2152_v47, %v2144_v20  ;;  %v1281_v15 = vadd.f32 %v4460_v12, %v1280_v4  ;;  %v2064_v20 = vcvt.s32.f32 %v1552_v5 }
 0x109   :  { %1220 = vmatmul.bf16.vlgmr.msra.gmra.mxu3 %v4204_v31  ;;  %v1624_v31 = vunpack.c.3.s8 %v1424_v7  ;;  %v2072_v7 = vcvt.s32.f32 %v1560_v3  ;;  %v2248_v48 = vcvt.s32.f32 %v1736_v55 }
 0x10a   :  { %2821 = vmatpush.bf16.msrb.mxu0 %v2608_v45  ;;  %v4476_v47 = vsel %vm1282_vm1, %v4460_v12, %v1281_v15  ;;  %v2264_v45 = vcvt.s32.f32 %v1752_v61  ;;  %v1696_v15 = vunpack.c.0.s8 %v1448_v54 }
 0x10b   :  { %v2136_v35 = vcvt.s32.f32 %v1624_v31  ;;  %v1242_v31 = vperm.slane %v4466_v46, 1 }
 0x10d   :  { %v2600_v30 = vpack.c.bf16 %v2136_v35, %v2128_v25  ;;  %v1544_v25 = vunpack.c.1.s8 %v1408_v33  ;;  %v1433_v35 = vld [vmem:[#allocation16 + $0xc8] sm:$0xff] }
 0x10e   :  { %v1649_v9 = vunpack.c.2.s8 %v1433_v35  ;;  %v1657_v29 = vunpack.c.3.s8 %v1433_v35  ;;  %v1633_v36 = vunpack.c.0.s8 %v1433_v35  ;;  %v1641_v6 = vunpack.c.1.s8 %v1433_v35 }
 0x10f   :  { %2822 = vmatpush.bf16.msrb.mxu0 %v2600_v30  ;;  %v2568_v30 = vpack.c.bf16 %v2072_v7, %v2064_v20  ;;  %v2056_v59 = vcvt.s32.f32 %v1544_v25 }
 0x110   :  { %v2161_v57 = vcvt.s32.f32 %v1649_v9  ;;  %v2153_v38 = vcvt.s32.f32 %v1641_v6 }
 0x113   :  { %2823 = vmatpush.bf16.msrb.mxu0 %v2592_v58  ;;  %v2240_v58 = vcvt.s32.f32 %v1728_v63 }
 0x115   :  { %v2656_v1 = vpack.c.bf16 %v2248_v48, %v2240_v58 }
 0x117   :  { %2824 = vmatpush.bf16.msrb.mxu0 %v2584_v17  ;;  %v2169_v17 = vcvt.s32.f32 %v1657_v29 }
 0x119   :  { %v2617_v14 = vpack.c.bf16 %v2169_v17, %v2161_v57 }
 0x11b   :  { %2825 = vmatpush.bf16.msrb.mxu0 %v2576_v43  ;;  %v1425_v43 = vld [vmem:[#allocation16 + $0x88] sm:$0xff] }
 0x11c   :  { %v1617_v25 = vunpack.c.2.s8 %v1425_v43  ;;  %v1625_v35 = vunpack.c.3.s8 %v1425_v43 }
 0x11e   :  { %v2129_v9 = vcvt.s32.f32 %v1617_v25 }
 0x11f   :  { %2826 = vmatpush.bf16.msrb.mxu0 %v2568_v30 }
 0x13b   :  { %v1026_v34 = vpop.f32.mrf.mxu0 }
 0x13c   :  { %v1039_v41 = vpop.f32.mrf.mxu1 }
 0x13d   :  { %v1040_v42 = vadd.f32 %v1039_v41, %v1026_v34  ;;  %v2256_v34 = vcvt.s32.f32 %v1744_v60  ;;  %v1536_v41 = vunpack.c.0.s8 %v1408_v33  ;;  %v2208_v60 = vcvt.s32.f32 %v1696_v15 }
 0x13f   :  { %v2664_v52 = vpack.c.bf16 %v2264_v45, %v2256_v34  ;;  %v2048_v44 = vcvt.s32.f32 %v1536_v41  ;;  %v1440_v34 = vld [vmem:[#allocation16 + $0x100] sm:$0xff] }
 0x140   :  { %v1680_v63 = vunpack.c.2.s8 %v1440_v34  ;;  %v1688_v55 = vunpack.c.3.s8 %v1440_v34 }
 0x141   :  { %2835 = vmatpush.bf16.msrb.mxu1 %v2664_v52  ;;  %v2560_v8 = vpack.c.bf16 %v2056_v59, %v2048_v44 }
 0x142   :  { %v2192_v48 = vcvt.s32.f32 %v1680_v63  ;;  %v2200_v29 = vcvt.s32.f32 %v1688_v55 }
 0x143   :  { %v1028_v16 = vpop.f32.mrf.mxu0  ;;  %2827 = vmatpush.bf16.msrb.mxu0 %v2560_v8 }
 0x144   :  { %v1041_v0 = vpop.f32.mrf.mxu1  ;;  %v2632_v57 = vpack.c.bf16 %v2200_v29, %v2192_v48 }
 0x145   :  { %v1496_v0 = vld [vmem:[#allocation16 + $0x2c0] sm:$0xff]  ;;  %2836 = vmatpush.bf16.msrb.mxu1 %v2656_v1 }
 0x146   :  { %v1904_v51 = vunpack.c.2.s8 %v1496_v0  ;;  %v1896_v20 = vunpack.c.1.s8 %v1496_v0 }
 0x147   :  { %2872 = vmatpush.bf16.msra.mxu0 %v2617_v14 }
 0x148   :  { %v2408_v52 = vcvt.s32.f32 %v1896_v20 }
 0x149   :  { %v1052_v18 = vpop.f32.mrf.mxu2  ;;  %v1065_v32 = vpop.f32.mrf.mxu3 }
 0x14a   :  { %v1053_v28 = vadd.f32 %v1052_v18, %v1040_v42  ;;  %v1712_v42 = vunpack.c.2.s8 %v1448_v54 }
 0x14b   :  { %v1078_v53 = vpop.f32.mrf.mxu0 }
 0x14c   :  { %v1066_v39 = vadd.f32 %v1065_v32, %v1053_v28  ;;  %v1091_v37 = vpop.f32.mrf.mxu1  ;;  %v2224_v18 = vcvt.s32.f32 %v1712_v42  ;;  %v2232_v28 = vcvt.s32.f32 %v1720_v13  ;;  %v2416_v32 = vcvt.s32.f32 %v1904_v51 }
 0x14d   :  { %v1092_v16 = vadd.f32 %v1091_v37, %v1078_v53  ;;  %v1888_v53 = vunpack.c.0.s8 %v1496_v0  ;;  %v1601_v42 = vunpack.c.0.s8 %v1425_v43  ;;  %v1664_v51 = vunpack.c.0.s8 %v1440_v34 }
 0x14e   :  { %v1235_v2 = vmul.f32 %v1227_v24, %v1066_v39  ;;  %v1912_v24 = vunpack.c.3.s8 %v1496_v0  ;;  %v2648_v33 = vpack.c.bf16 %v2232_v28, %v2224_v18  ;;  %v1704_v39 = vunpack.c.1.s8 %v1448_v54 }
 0x14f   :  { %v2400_v7 = vcvt.s32.f32 %v1888_v53 }
 0x150   :  { %v4478_v23 = vadd.f32 %v1241_v27, %v1235_v2  ;;  %v2424_v11 = vcvt.s32.f32 %v1912_v24  ;;  %v2145_v27 = vcvt.s32.f32 %v1633_v36  ;;  %2837 = vmatpush.bf16.msrb.mxu1 %v2648_v33  ;;  %v2216_v2 = vcvt.s32.f32 %v1704_v39  ;;  %v4498_v36 = vld [vmem:[#allocation16 + $0x48] sm:$0xff] }
 0x151   :  { %v1054_v40 = vpop.f32.mrf.mxu2  ;;  %v1067_v12 = vpop.f32.mrf.mxu3  ;;  %v2736_v58 = vpack.c.bf16 %v2408_v52, %v2400_v7  ;;  %v1672_v24 = vunpack.c.1.s8 %v1440_v34  ;;  %v1465_v33 = vld [vmem:[#allocation16 + $0x1c8] sm:$0xff]  ;;  %v1480_v34 = vld [vmem:[#allocation16 + $0x240] sm:$0xff] }
 0x152   :  { %v1253_v26 = vrot.slane %v4478_v23, 4  ;;  %v2744_v22 = vpack.c.bf16 %v2424_v11, %v2416_v32  ;;  %v2609_v61 = vpack.c.bf16 %v2153_v38, %v2145_v27  ;;  %v2640_v30 = vpack.c.bf16 %v2216_v2, %v2208_v60 }
 0x153   :  { %v1080_v10 = vpop.f32.mrf.mxu0  ;;  %v2176_v32 = vcvt.s32.f32 %v1664_v51  ;;  %v2184_v15 = vcvt.s32.f32 %v1672_v24  ;;  %v1593_v60 = vunpack.c.3.s8 %v4498_v36  ;;  %v1777_v7 = vunpack.c.2.s8 %v1465_v33 }
 0x154   :  { %v1254_v21 = vadd.f32 %v1253_v26, %v4478_v23  ;;  %v1093_v4 = vpop.f32.mrf.mxu1  ;;  %2846 = vmatpush.bf16.msrb.mxu2 %v2744_v22  ;;  %2873 = vmatpush.bf16.msra.mxu0 %v2609_v61  ;;  %v1488_v26 = vld [vmem:[#allocation16 + $0x280] sm:$0xff]  ;;  %v1840_v48 = vunpack.c.2.s8 %v1480_v34  ;;  %v1761_v51 = vunpack.c.0.s8 %v1465_v33 }
 0x155   :  { %2838 = vmatpush.bf16.msrb.mxu1 %v2640_v30  ;;  %v1872_v10 = vunpack.c.2.s8 %v1488_v26  ;;  %v1609_v4 = vunpack.c.1.s8 %v1425_v43  ;;  %v1856_v6 = vunpack.c.0.s8 %v1488_v26  ;;  %v1785_v30 = vunpack.c.3.s8 %v1465_v33 }
 0x156   :  { %v1255_v19 = vrot.slane %v1254_v21, 2 }
 0x157   :  { %v2121_v18 = vcvt.s32.f32 %v1609_v4  ;;  %v2368_v43 = vcvt.s32.f32 %v1856_v6 }
 0x158   :  { %v1256_v49 = vadd.f32 %v1255_v19, %v1254_v21  ;;  %2847 = vmatpush.bf16.msrb.mxu2 %v2736_v58  ;;  %v2113_v19 = vcvt.s32.f32 %v1601_v42  ;;  %v2297_v58 = vcvt.s32.f32 %v1785_v30 }
 0x159   :  { %2839 = vmatpush.bf16.msrb.mxu1 %v2632_v57  ;;  %v2352_v57 = vcvt.s32.f32 %v1840_v48 }
 0x15a   :  { %v1104_v62 = vpop.f32.mrf.mxu2  ;;  %v1257_v5 = vrot.slane %v1256_v49, 1  ;;  %v2593_v27 = vpack.c.bf16 %v2121_v18, %v2113_v19 }
 0x15b   :  { %v1105_v3 = vadd.f32 %v1104_v62, %v1092_v16  ;;  %v1117_v37 = vpop.f32.mrf.mxu3  ;;  %v2137_v16 = vcvt.s32.f32 %v1625_v35  ;;  %v1864_v62 = vunpack.c.1.s8 %v1488_v26  ;;  %v2105_v35 = vcvt.s32.f32 %v1593_v60 }
 0x15c   :  { %v1258_v45 = vadd.f32 %v1257_v5, %v1256_v49  ;;  %v1585_v5 = vunpack.c.2.s8 %v4498_v36 }
 0x15d   :  { %v1118_v41 = vadd.f32 %v1117_v37, %v1105_v3  ;;  %v2601_v21 = vpack.c.bf16 %v2137_v16, %v2129_v9  ;;  %v1229_v3 = vperm.slane %v4463_v50, 2  ;;  %v2624_v37 = vpack.c.bf16 %v2184_v15, %v2176_v32  ;;  %v4518_v32 = vld [vmem:[#allocation14] sm:$0xf] }
 0x15e   :  { %v4483_v40 = vpop.f32.mrf.mxu0  ;;  %v1284_v12 = vmul.f32 %v4476_v47, %v1258_v45  ;;  %v2376_v22 = vcvt.s32.f32 %v1864_v62  ;;  %v2097_v20 = vcvt.s32.f32 %v1585_v5  ;;  %v4504_v45 = vld [vmem:[#allocation13] sm:$0xf] }
 0x15f   :  { %v1236_v44 = vmul.f32 %v1228_v56, %v1118_v41  ;;  %v1880_v56 = vunpack.c.3.s8 %v1488_v26  ;;  %2874 = vmatpush.bf16.msra.mxu0 %v2601_v21  ;;  %2840 = vmatpush.bf16.msrb.mxu1 %v2624_v37  ;;  %v1374_v21 = vperm.slane %v4504_v45, 0  ;;  %v1388_v37 = vperm.slane %v4518_v32, 0 }
 0x160   :  { %v4489_v54 = vsub.f32 %v4478_v23, %v1284_v12  ;;  %v2384_v23 = vcvt.s32.f32 %v1872_v10  ;;  %v2720_v25 = vpack.c.bf16 %v2376_v22, %v2368_v43  ;;  %v1243_v12 = vperm.slane %v4466_v46, 2 }
 0x161   :  { %v1143_v59 = vpop.f32.mrf.mxu1  ;;  %v4493_v0 = vadd.f32 %v1242_v31, %v1236_v44  ;;  %v2392_v31 = vcvt.s32.f32 %v1880_v56  ;;  %v2289_v44 = vcvt.s32.f32 %v1777_v7  ;;  %v2585_v16 = vpack.c.bf16 %v2105_v35, %v2097_v20 }
 0x162   :  { %v1106_v8 = vpop.f32.mrf.mxu2  ;;  %v1292_v1 = vmul.f32 %v4489_v54, %v4489_v54  ;;  %v1144_v41 = vadd.f32 %v1143_v59, %v4483_v40  ;;  %v1848_v59 = vunpack.c.3.s8 %v1480_v34  ;;  %v1569_v56 = vunpack.c.0.s8 %v4498_v36 }
 0x163   :  { %v1259_v17 = vrot.slane %v4493_v0, 4  ;;  %v1119_v13 = vpop.f32.mrf.mxu3  ;;  %v2728_v11 = vpack.c.bf16 %v2392_v31, %v2384_v23  ;;  %2875 = vmatpush.bf16.msra.mxu0 %v2593_v27  ;;  %v2681_v8 = vpack.c.bf16 %v2297_v58, %v2289_v44  ;;  %v1769_v31 = vunpack.c.1.s8 %v1465_v33 }
 0x164   :  { %v1296_v14 = vrot.slane %v1292_v1, 4  ;;  %v2081_v23 = vcvt.s32.f32 %v1569_v56  ;;  %v1244_v44 = vperm.slane %v4466_v46, 3 }
 0x165   :  { %v1260_v28 = vadd.f32 %v1259_v17, %v4493_v0  ;;  %2848 = vmatpush.bf16.msrb.mxu2 %v2728_v11  ;;  %v1577_v17 = vunpack.c.1.s8 %v4498_v36  ;;  %2885 = vmatpush.bf16.msra.mxu1 %v2681_v8  ;;  %v2281_v36 = vcvt.s32.f32 %v1769_v31  ;;  %v1824_v11 = vunpack.c.0.s8 %v1480_v34 }
 0x166   :  { %v1132_v49 = vpop.f32.mrf.mxu0  ;;  %v1297_v38 = vadd.f32 %v1296_v14, %v1292_v1  ;;  %v2360_v1 = vcvt.s32.f32 %v1848_v59 }
 0x167   :  { %v1261_v39 = vrot.slane %v1260_v28, 2  ;;  %2876 = vmatpush.bf16.msra.mxu0 %v2585_v16  ;;  %v2089_v14 = vcvt.s32.f32 %v1577_v17  ;;  %v2273_v49 = vcvt.s32.f32 %v1761_v51  ;;  %v2336_v5 = vcvt.s32.f32 %v1824_v11  ;;  %v4550_v51 = vld [vmem:[#allocation16 + $0xd0] sm:$0xff] }
 0x168   :  { %v1298_v61 = vrot.slane %v1297_v38, 2  ;;  %v2712_v24 = vpack.c.bf16 %v2360_v1, %v2352_v57  ;;  %v1375_v1 = vperm.slane %v4504_v45, 1 }
 0x169   :  { %v1145_v53 = vpop.f32.mrf.mxu1  ;;  %v1262_v2 = vadd.f32 %v1261_v39, %v1260_v28  ;;  %2849 = vmatpush.bf16.msrb.mxu2 %v2720_v25  ;;  %v4516_v28 = vld [vmem:[#allocation16 + $0x8] sm:$0xff]  ;;  %v2673_v43 = vpack.c.bf16 %v2281_v36, %v2273_v49  ;;  %v1230_v25 = vperm.slane %v4463_v50, 3 }
 0x16a   :  { %v1299_v52 = vadd.f32 %v1298_v61, %v1297_v38  ;;  %v1832_v38 = vunpack.c.1.s8 %v1480_v34  ;;  %v4526_v39 = vld [vmem:[#allocation16 + $0x188] sm:$0xff]  ;;  %v4532_v61 = vld [vmem:[#allocation16 + $0x200] sm:$0xff]  ;;  %v1561_v20 = vunpack.c.3.s8 %v4516_v28 }
 0x16b   :  { %v1263_v63 = vrot.slane %v1262_v2, 1  ;;  %v1156_v55 = vpop.f32.mrf.mxu2  ;;  %2886 = vmatpush.bf16.msra.mxu1 %v2673_v43  ;;  %v1745_v34 = vunpack.c.2.s8 %v4526_v39  ;;  %v1753_v30 = vunpack.c.3.s8 %v4526_v39  ;;  %v1816_v16 = vunpack.c.3.s8 %v4532_v61 }
 0x16c   :  { %v1169_v26 = vpop.f32.mrf.mxu3  ;;  %v1157_v9 = vadd.f32 %v1156_v55, %v1144_v41  ;;  %v1300_v29 = vrot.slane %v1299_v52, 1  ;;  %v2344_v60 = vcvt.s32.f32 %v1832_v38  ;;  %v1729_v36 = vunpack.c.0.s8 %v4526_v39 }
 0x16d   :  { %v1264_v40 = vadd.f32 %v1263_v63, %v1262_v2  ;;  %2850 = vmatpush.bf16.msrb.mxu2 %v2712_v24  ;;  %v2073_v63 = vcvt.s32.f32 %v1561_v20  ;;  %v2257_v55 = vcvt.s32.f32 %v1745_v34  ;;  %v2328_v56 = vcvt.s32.f32 %v1816_v16  ;;  %v4581_v16 = vld [vmem:[#allocation16 + $0x2c8] sm:$0xff] }
 0x16e   :  { %v1170_v10 = vadd.f32 %v1169_v26, %v1157_v9  ;;  %v1301_v42 = vadd.f32 %v1300_v29, %v1299_v52  ;;  %v2704_v35 = vpack.c.bf16 %v2344_v60, %v2336_v5  ;;  %v1808_v26 = vunpack.c.2.s8 %v4532_v61 }
 0x16f   :  { %v1285_v4 = vmul.f32 %v4476_v47, %v1264_v40  ;;  %v2265_v9 = vcvt.s32.f32 %v1753_v30  ;;  %v1537_v40 = vunpack.c.0.s8 %v4516_v28  ;;  %v1737_v11 = vunpack.c.1.s8 %v4526_v39 }
 0x170   :  { %v1237_v13 = vmul.f32 %v1229_v3, %v1170_v10  ;;  %v1320_v19 = vmul.f32 %v1301_v42, %v4476_v47  ;;  %v1553_v3 = vunpack.c.2.s8 %v4516_v28  ;;  %v2320_v29 = vcvt.s32.f32 %v1808_v26 }
 0x171   :  { %v4514_v18 = vsub.f32 %v4493_v0, %v1285_v4  ;;  %v2577_v0 = vpack.c.bf16 %v2089_v14, %v2081_v23  ;;  %2851 = vmatpush.bf16.msrb.mxu2 %v2704_v35  ;;  %v2665_v57 = vpack.c.bf16 %v2265_v9, %v2257_v55  ;;  %v1545_v42 = vunpack.c.1.s8 %v4516_v28 }
 0x172   :  { %v4520_v6 = vadd.f32 %v1243_v12, %v1237_v13  ;;  %v4522_v27 = vadd.f32 1e-05, %v1320_v19  ;;  %v2065_v7 = vcvt.s32.f32 %v1553_v3  ;;  %v2049_v23 = vcvt.s32.f32 %v1537_v40  ;;  %v4559_v3 = vld [vmem:[#allocation16 + $0x3c0] sm:$0xff] }
 0x173   :  { %v1293_v15 = vmul.f32 %v4514_v18, %v4514_v18  ;;  %v1158_v62 = vpop.f32.mrf.mxu2  ;;  %2877 = vmatpush.bf16.msra.mxu0 %v2577_v0  ;;  %v1389_v19 = vperm.slane %v4518_v32, 1  ;;  %2887 = vmatpush.bf16.msra.mxu1 %v2665_v57  ;;  %v2696_v24 = vpack.c.bf16 %v2328_v56, %v2320_v29  ;;  %v2057_v14 = vcvt.s32.f32 %v1545_v42 }
 0x174   :  { %v1171_v33 = vpop.f32.mrf.mxu3  ;;  %v1265_v53 = vrot.slane %v4520_v6, 4  ;;  %3567 = vrsqrt.f32 %v4522_v27  ;;  %v2569_v48 = vpack.c.bf16 %v2073_v63, %v2065_v7  ;;  %vm1334_vm2 = vweird.f32 %v4522_v27 }
 0x175   :  { %v1302_v22 = vrot.slane %v1293_v15, 4  ;;  %2852 = vmatpush.bf16.msrb.mxu2 %v2696_v24  ;;  %v2561_v62 = vpack.c.bf16 %v2057_v14, %v2049_v23  ;;  %v1650_v33 = vunpack.c.2.s8 %v4550_v51  ;;  %v1658_v0 = vunpack.c.3.s8 %v4550_v51 }
 0x176   :  { %v1266_v2 = vadd.f32 %v1265_v53, %v4520_v6  ;;  %v2241_v43 = vcvt.s32.f32 %v1729_v36  ;;  %v2249_v5 = vcvt.s32.f32 %v1737_v11  ;;  %v1792_v60 = vunpack.c.0.s8 %v4532_v61 }
 0x177   :  { %v1303_v41 = vadd.f32 %v1302_v22, %v1293_v15  ;;  %2878 = vmatpush.bf16.msra.mxu0 %v2569_v48  ;;  %v4563_v39 = vcvt.s32.f32 %v1650_v33  ;;  %v1800_v34 = vunpack.c.1.s8 %v4532_v61  ;;  %v2032_v55 = vunpack.c.2.s8 %v4559_v3 }
 0x178   :  { %v1267_v52 = vrot.slane %v1266_v2, 2  ;;  %v2657_v7 = vpack.c.bf16 %v2249_v5, %v2241_v43  ;;  %v2304_v63 = vcvt.s32.f32 %v1792_v60  ;;  %v2040_v61 = vunpack.c.3.s8 %v4559_v3 }
 0x179   :  { %v1304_v12 = vrot.slane %v1303_v41, 2  ;;  %v2312_v9 = vcvt.s32.f32 %v1800_v34  ;;  %v2544_v48 = vcvt.s32.f32 %v2032_v55  ;;  %v1376_v11 = vperm.slane %v4504_v45, 2 }
 0x17a   :  { %v1268_v58 = vadd.f32 %v1267_v52, %v1266_v2  ;;  %v4543_v59 = vpop.eup %3567  ;;  %v4574_v52 = vcvt.s32.f32 %v1658_v0  ;;  %2888 = vmatpush.bf16.msra.mxu1 %v2657_v7  ;;  %v2552_v56 = vcvt.s32.f32 %v2040_v61  ;;  %v2024_v50 = vunpack.c.1.s8 %v4559_v3 }
 0x17b   :  { %v1305_v10 = vadd.f32 %v1304_v12, %v1303_v41  ;;  %v1329_v4 = vmul.f32 %v4543_v59, %v4522_v27  ;;  %vm1335_vm3 = vweird.f32 %v4543_v59  ;;  %2879 = vmatpush.bf16.msra.mxu0 %v2561_v62  ;;  %v4570_v41 = vld [vmem:[#allocation16 + $0x148] sm:$0xff]  ;;  %v2688_v57 = vpack.c.bf16 %v2312_v9, %v2304_v63 }
 0x17c   :  { %v1269_v17 = vrot.slane %v1268_v58, 1  ;;  %vm1336_vm4 = vmor %vm1334_vm2, %vm1335_vm3  ;;  %v1713_v29 = vunpack.c.2.s8 %v4570_v41  ;;  %v1905_v27 = vunpack.c.2.s8 %v4581_v16  ;;  %v1634_v62 = vunpack.c.0.s8 %v4550_v51 }
 0x17d   :  { %v1306_v31 = vrot.slane %v1305_v10, 1  ;;  %v1330_v28 = vmul.f32 %v4543_v59, %v1329_v4  ;;  %2853 = vmatpush.bf16.msrb.mxu2 %v2688_v57  ;;  %v1889_v57 = vunpack.c.0.s8 %v4581_v16 }
 0x17e   :  { %v1182_v8 = vpop.f32.mrf.mxu0  ;;  %v1270_v49 = vadd.f32 %v1269_v17, %v1268_v58  ;;  %v1721_v17 = vunpack.c.3.s8 %v4570_v41  ;;  %v2225_v23 = vcvt.s32.f32 %v1713_v29 }
 0x17f   :  { %v1195_v13 = vpop.f32.mrf.mxu1  ;;  %v1307_v15 = vadd.f32 %v1306_v31, %v1305_v10  ;;  %v1331_v38 = vmul.f32 0.5, %v1330_v28 }
 0x180   :  { %v1286_v53 = vmul.f32 %v4476_v47, %v1270_v49  ;;  %v1196_v58 = vadd.f32 %v1195_v13, %v1182_v8  ;;  %v2618_v8 = vpack.c.bf16 %v4574_v52, %v4563_v39  ;;  %v2808_v13 = vpack.c.bf16 %v2552_v56, %v2544_v48 }
 0x181   :  { %v1321_v22 = vmul.f32 %v1307_v15, %v4476_v47  ;;  %v1332_v2 = vsub.f32 1.5, %v1331_v38  ;;  %v2233_v28 = vcvt.s32.f32 %v1721_v17  ;;  %v2417_v49 = vcvt.s32.f32 %v1905_v27 }
 0x182   :  { %v4567_v20 = vsub.f32 %v4520_v6, %v1286_v53  ;;  %2859 = vmatpush.bf16.msrb.mxu3 %v2808_v13  ;;  %v1705_v48 = vunpack.c.1.s8 %v4570_v41 }
 0x183   :  { %v4572_v35 = vadd.f32 1e-05, %v1321_v22  ;;  %v1333_v26 = vmul.f32 %v4543_v59, %v1332_v2  ;;  %v2649_v38 = vpack.c.bf16 %v2233_v28, %v2225_v23  ;;  %v2146_v2 = vcvt.s32.f32 %v1634_v62  ;;  %v4641_v28 = vld [vmem:[#allocation16 + $0x108] sm:$0xff] }
 0x184   :  { %v1294_v12 = vmul.f32 %v4567_v20, %v4567_v20 }
 0x185   :  { %3569 = vrsqrt.f32 %v4572_v35  ;;  %v1337_v40 = vsel %vm1336_vm4, %v4543_v59, %v1333_v26  ;;  %vm1344_vm5 = vweird.f32 %v4572_v35  ;;  %2889 = vmatpush.bf16.msra.mxu1 %v2649_v38 }
 0x186   :  { %v1184_v30 = vpop.f32.mrf.mxu0  ;;  %v1308_v10 = vrot.slane %v1294_v12, 4  ;;  %v1368_v42 = vmul.f32 %v1337_v40, %v4489_v54  ;;  %v1913_v54 = vunpack.c.3.s8 %v4581_v16 }
 0x187   :  { %v1197_v6 = vpop.f32.mrf.mxu1  ;;  %v2016_v30 = vunpack.c.0.s8 %v4559_v3 }
 0x188   :  { %v1309_v31 = vadd.f32 %v1308_v10, %v1294_v12  ;;  %v1382_v59 = vmul.f32 %v1374_v21, %v1368_v42  ;;  %v2425_v53 = vcvt.s32.f32 %v1913_v54  ;;  %v1642_v21 = vunpack.c.1.s8 %v4550_v51 }
 0x189   :  { %v2528_v61 = vcvt.s32.f32 %v2016_v30  ;;  %v2217_v42 = vcvt.s32.f32 %v1705_v48 }
 0x18a   :  { %v1310_v36 = vrot.slane %v1309_v31, 2  ;;  %v1396_v0 = vadd.f32 %v1388_v37, %v1382_v59  ;;  %v2745_v60 = vpack.c.bf16 %v2425_v53, %v2417_v49  ;;  %v2154_v37 = vcvt.s32.f32 %v1642_v21 }
 0x18b   :  { %v1208_v4 = vpop.f32.mrf.mxu2  ;;  %v4600_v33 = vpop.eup %3569  ;;  %v1689_v21 = vunpack.c.3.s8 %v4641_v28 }
 0x18c   :  { %v1209_v24 = vadd.f32 %v1208_v4, %v1196_v58  ;;  %v1221_v14 = vpop.f32.mrf.mxu3  ;;  %v1339_v43 = vmul.f32 %v4600_v33, %v4572_v35  ;;  %vm1345_vm6 = vweird.f32 %v4600_v33  ;;  %v1311_v5 = vadd.f32 %v1310_v36, %v1309_v31  ;;  %2898 = vmatpush.bf16.msra.mxu2 %v2745_v60  ;;  %v4620_v58 = vld [vmem:[#allocation16 + $0x90] sm:$0xff]  ;;  %v4646_v36 = vld [vmem:[#allocation16 + $0x288] sm:$0xff] }
 0x18d   :  { %v1400_v39 = vmul.f32 0.2, %v1396_v0  ;;  %v2610_v55 = vpack.c.bf16 %v2154_v37, %v2146_v2  ;;  %v1897_v4 = vunpack.c.1.s8 %v4581_v16  ;;  %v1618_v17 = vunpack.c.2.s8 %v4620_v58  ;;  %vm1346_vm7 = vmor %vm1344_vm5, %vm1345_vm6 }
 0x18e   :  { %v1222_v15 = vadd.f32 %v1221_v14, %v1209_v24  ;;  %v1340_v7 = vmul.f32 %v4600_v33, %v1339_v43  ;;  %v1312_v34 = vrot.slane %v1311_v5, 1  ;;  %v2401_v31 = vcvt.s32.f32 %v1889_v57  ;;  %v4634_v24 = vld [vmem:[#allocation16 + $0x380] sm:$0xff] }
 0x18f   :  { %v1404_v52 = vmax.f32 %v1396_v0, %v1400_v39  ;;  %v2409_v13 = vcvt.s32.f32 %v1897_v4  ;;  %v1626_v16 = vunpack.c.3.s8 %v4620_v58  ;;  %v2130_v59 = vcvt.s32.f32 %v1618_v17 }
 0x190   :  { %v1238_v22 = vmul.f32 %v1230_v25, %v1222_v15  ;;  %v1697_v25 = vunpack.c.0.s8 %v4570_v41  ;;  %v1341_v26 = vmul.f32 0.5, %v1340_v7  ;;  %v1313_v12 = vadd.f32 %v1312_v34, %v1311_v5 }
 0x191   :  { %v4622_v46 = vpack.c.bf16 %v1404_v52, %v1404_v52  ;;  %v2737_v15 = vpack.c.bf16 %v2409_v13, %v2401_v31  ;;  %v2138_v62 = vcvt.s32.f32 %v1626_v16  ;;  %v2000_v0 = vunpack.c.2.s8 %v4634_v24 }
 0x192   :  { %v4614_v51 = vadd.f32 %v1244_v44, %v1238_v22  ;;  %v2536_v44 = vcvt.s32.f32 %v2024_v50  ;;  %v2209_v29 = vcvt.s32.f32 %v1697_v25  ;;  %v1342_v40 = vsub.f32 1.5, %v1341_v26 }
 0x193   :  { %v1210_v63 = vpop.f32.mrf.mxu2  ;;  %v1322_v10 = vmul.f32 %v1313_v12, %v4476_v47  ;;  %2828 = vmatmul.bf16.vlgmr.msrb.gmra.mxu0 %v4622_v46  ;;  %v2008_v53 = vunpack.c.3.s8 %v4634_v24  ;;  %2899 = vmatpush.bf16.msra.mxu2 %v2737_v15  ;;  %v2602_v5 = vpack.c.bf16 %v2138_v62, %v2130_v59  ;;  %v2512_v22 = vcvt.s32.f32 %v2000_v0  ;;  %v1512_v62 = vld [vmem:[#allocation16 + $0x340] sm:$0xff] }
 0x194   :  { %v1271_v6 = vrot.slane %v4614_v51, 4  ;;  %v1223_v9 = vpop.f32.mrf.mxu3  ;;  %v2800_v56 = vpack.c.bf16 %v2536_v44, %v2528_v61  ;;  %v1343_v23 = vmul.f32 %v4600_v33, %v1342_v40  ;;  %2924 = vmatpush.bf16.msrb.mxu0 %v2618_v8  ;;  %v2641_v14 = vpack.c.bf16 %v2217_v42, %v2209_v29 }
 0x195   :  { %v4632_v27 = vadd.f32 1e-05, %v1322_v10  ;;  %v1390_v8 = vperm.slane %v4518_v32, 2  ;;  %v2520_v60 = vcvt.s32.f32 %v2008_v53  ;;  %v2201_v37 = vcvt.s32.f32 %v1689_v21 }
 0x196   :  { %v1272_v3 = vadd.f32 %v1271_v6, %v4614_v51  ;;  %2860 = vmatpush.bf16.msrb.mxu3 %v2800_v56  ;;  %v1347_v54 = vsel %vm1346_vm7, %v4600_v33, %v1343_v23  ;;  %2890 = vmatpush.bf16.msra.mxu1 %v2641_v14  ;;  %v1681_v33 = vunpack.c.2.s8 %v4641_v28  ;;  %v1881_v34 = vunpack.c.3.s8 %v4646_v36  ;;  %v4676_v56 = vld [vmem:[#allocation16 + $0x50] sm:$0xff] }
 0x197   :  { %3571 = vrsqrt.f32 %v4632_v27  ;;  %v1369_v35 = vmul.f32 %v1347_v54, %v4514_v18  ;;  %v1873_v18 = vunpack.c.2.s8 %v4646_v36  ;;  %v1602_v52 = vunpack.c.0.s8 %v4620_v58 }
 0x198   :  { %v1273_v41 = vrot.slane %v1272_v3, 2  ;;  %2925 = vmatpush.bf16.msrb.mxu0 %v2610_v55  ;;  %v2193_v2 = vcvt.s32.f32 %v1681_v33  ;;  %v2792_v55 = vpack.c.bf16 %v2520_v60, %v2512_v22  ;;  %v1610_v25 = vunpack.c.1.s8 %v4620_v58 }
 0x199   :  { %v1383_v43 = vmul.f32 %v1375_v1, %v1369_v35  ;;  %v2385_v30 = vcvt.s32.f32 %v1873_v18  ;;  %v2114_v9 = vcvt.s32.f32 %v1602_v52  ;;  %v1984_v44 = vunpack.c.0.s8 %v4634_v24 }
 0x19a   :  { %v1274_v49 = vadd.f32 %v1273_v41, %v1272_v3  ;;  %v2633_v50 = vpack.c.bf16 %v2201_v37, %v2193_v2  ;;  %2861 = vmatpush.bf16.msrb.mxu3 %v2792_v55  ;;  %v2122_v61 = vcvt.s32.f32 %v1610_v25  ;;  %v1992_v40 = vunpack.c.1.s8 %v4634_v24 }
 0x19b   :  { %v1397_v7 = vadd.f32 %v1389_v19, %v1383_v43  ;;  %v2393_v19 = vcvt.s32.f32 %v1881_v34  ;;  %v2496_v57 = vcvt.s32.f32 %v1984_v44  ;;  %v1673_v23 = vunpack.c.1.s8 %v4641_v28 }
 0x19c   :  { %v1275_v38 = vrot.slane %v1274_v49, 1  ;;  %2926 = vmatpush.bf16.msrb.mxu0 %v2602_v5  ;;  %2891 = vmatpush.bf16.msra.mxu1 %v2633_v50  ;;  %v2594_v3 = vpack.c.bf16 %v2122_v61, %v2114_v9  ;;  %v2504_v17 = vcvt.s32.f32 %v1992_v40  ;;  %v1857_v24 = vunpack.c.0.s8 %v4646_v36 }
 0x19d   :  { %v4660_v63 = vpop.eup %3571  ;;  %v1401_v26 = vmul.f32 0.2, %v1397_v7  ;;  %v2729_v58 = vpack.c.bf16 %v2393_v19, %v2385_v30  ;;  %v1865_v14 = vunpack.c.1.s8 %v4646_v36  ;;  %v2185_v59 = vcvt.s32.f32 %v1673_v23 }
 0x19e   :  { %v1276_v39 = vadd.f32 %v1275_v38, %v1274_v49  ;;  %v1349_v12 = vmul.f32 %v4660_v63, %v4632_v27  ;;  %vm1355_vm8 = vweird.f32 %v4660_v63  ;;  %v2784_v16 = vpack.c.bf16 %v2504_v17, %v2496_v57  ;;  %v1466_v49 = vld [vmem:[#allocation16 + $0x1d0] sm:$0xff] }
 0x19f   :  { %v1405_v48 = vmax.f32 %v1397_v7, %v1401_v26  ;;  %2900 = vmatpush.bf16.msra.mxu2 %v2729_v58  ;;  %v1586_v54 = vunpack.c.2.s8 %v4676_v56  ;;  %vm1354_vm9 = vweird.f32 %v4632_v27  ;;  %v2369_v35 = vcvt.s32.f32 %v1857_v24  ;;  %v1481_v27 = vld [vmem:[#allocation16 + $0x248] sm:$0xff]  ;;  %v1410_v17 = vld [vmem:[#allocation16 + $0x10] sm:$0xff] }
 0x1a0   :  { %v1287_v1 = vmul.f32 %v4476_v47, %v1276_v39  ;;  %v1350_v29 = vmul.f32 %v4660_v63, %v1349_v12  ;;  %2927 = vmatpush.bf16.msrb.mxu0 %v2594_v3  ;;  %v2377_v15 = vcvt.s32.f32 %v1865_v14  ;;  %2862 = vmatpush.bf16.msrb.mxu3 %v2784_v16  ;;  %v1594_v38 = vunpack.c.3.s8 %v4676_v56  ;;  %vm1356_vm10 = vmor %vm1354_vm9, %vm1355_vm8 }
 0x1a1   :  { %v4678_v42 = vpack.c.bf16 %v1405_v48, %v1405_v48  ;;  %v2098_v53 = vcvt.s32.f32 %v1586_v54  ;;  %v1377_v21 = vperm.slane %v4504_v45, 3  ;;  %v1778_v5 = vunpack.c.2.s8 %v1466_v49 }
 0x1a2   :  { %v4668_v6 = vsub.f32 %v4614_v51, %v1287_v1  ;;  %v1665_v51 = vunpack.c.0.s8 %v4641_v28  ;;  %v1351_v4 = vmul.f32 0.5, %v1350_v29  ;;  %v2721_v43 = vpack.c.bf16 %v2377_v15, %v2369_v35 }
 0x1a3   :  { %2841 = vmatmul.bf16.vlgmr.msrb.gmra.mxu1 %v4678_v42  ;;  %2880 = vmatmul.bf16.vlgmr.msra.gmra.mxu0 %v4622_v46  ;;  %v2106_v18 = vcvt.s32.f32 %v1594_v38  ;;  %v1786_v39 = vunpack.c.3.s8 %v1466_v49  ;;  %v1968_v60 = vunpack.c.2.s8 %v1512_v62  ;;  %v2290_v7 = vcvt.s32.f32 %v1778_v5 }
 0x1a4   :  { %v1295_v10 = vmul.f32 %v4668_v6, %v4668_v6  ;;  %v2177_v31 = vcvt.s32.f32 %v1665_v51  ;;  %v1352_v13 = vsub.f32 1.5, %v1351_v4  ;;  %2901 = vmatpush.bf16.msra.mxu2 %v2721_v43  ;;  %v1976_v34 = vunpack.c.3.s8 %v1512_v62 }
 0x1a5   :  { %v2586_v30 = vpack.c.bf16 %v2106_v18, %v2098_v53  ;;  %v2298_v52 = vcvt.s32.f32 %v1786_v39  ;;  %v2480_v1 = vcvt.s32.f32 %v1968_v60  ;;  %v1841_v55 = vunpack.c.2.s8 %v1481_v27 }
 0x1a6   :  { %v1314_v41 = vrot.slane %v1295_v10, 4  ;;  %v1353_v0 = vmul.f32 %v4660_v63, %v1352_v13  ;;  %v2625_v36 = vpack.c.bf16 %v2185_v59, %v2177_v31  ;;  %v2488_v26 = vcvt.s32.f32 %v1976_v34 }
 0x1a7   :  { %2928 = vmatpush.bf16.msrb.mxu0 %v2586_v30  ;;  %v2682_v12 = vpack.c.bf16 %v2298_v52, %v2290_v7  ;;  %v2353_v19 = vcvt.s32.f32 %v1841_v55  ;;  %v1570_v9 = vunpack.c.0.s8 %v4676_v56  ;;  %v1952_v4 = vunpack.c.0.s8 %v1512_v62 }
 0x1a8   :  { %v1315_v28 = vadd.f32 %v1314_v41, %v1295_v10  ;;  %v1357_v22 = vsel %vm1356_vm10, %v4660_v63, %v1353_v0  ;;  %2892 = vmatpush.bf16.msra.mxu1 %v2625_v36  ;;  %v1849_v63 = vunpack.c.3.s8 %v1481_v27  ;;  %v2776_v48 = vpack.c.bf16 %v2488_v26, %v2480_v1  ;;  %v4707_v0 = vld [vmem:[#allocation16 + $0x208] sm:$0xff] }
 0x1a9   :  { %v1370_v2 = vmul.f32 %v1357_v22, %v4567_v20  ;;  %v1578_v20 = vunpack.c.1.s8 %v4676_v56  ;;  %v2082_v58 = vcvt.s32.f32 %v1570_v9  ;;  %v1770_v10 = vunpack.c.1.s8 %v1466_v49 }
 0x1aa   :  { %v1316_v33 = vrot.slane %v1315_v28, 2  ;;  %v2361_v29 = vcvt.s32.f32 %v1849_v63  ;;  %2863 = vmatpush.bf16.msrb.mxu3 %v2776_v48  ;;  %v1960_v31 = vunpack.c.1.s8 %v1512_v62  ;;  %v2464_v14 = vcvt.s32.f32 %v1952_v4 }
 0x1ab   :  { %v1384_v50 = vmul.f32 %v1376_v11, %v1370_v2  ;;  %v2090_v40 = vcvt.s32.f32 %v1578_v20  ;;  %v1762_v11 = vunpack.c.0.s8 %v1466_v49  ;;  %v2282_v41 = vcvt.s32.f32 %v1770_v10 }
 0x1ac   :  { %v1317_v37 = vadd.f32 %v1316_v33, %v1315_v28  ;;  %2937 = vmatpush.bf16.msrb.mxu1 %v2682_v12  ;;  %v2713_v51 = vpack.c.bf16 %v2361_v29, %v2353_v19  ;;  %v1825_v13 = vunpack.c.0.s8 %v1481_v27  ;;  %v2472_v59 = vcvt.s32.f32 %v1960_v31  ;;  %v1504_v28 = vld [vmem:[#allocation16 + $0x300] sm:$0xff] }
 0x1ad   :  { %v1398_v61 = vadd.f32 %v1390_v8, %v1384_v50  ;;  %v2578_v23 = vpack.c.bf16 %v2090_v40, %v2082_v58  ;;  %v2274_v56 = vcvt.s32.f32 %v1762_v11  ;;  %v1833_v54 = vunpack.c.1.s8 %v1481_v27 }
 0x1ae   :  { %v1318_v25 = vrot.slane %v1317_v37, 1  ;;  %2902 = vmatpush.bf16.msra.mxu2 %v2713_v51  ;;  %v1554_v49 = vunpack.c.2.s8 %v1410_v17  ;;  %v1391_v15 = vperm.slane %v4518_v32, 3  ;;  %v2337_v62 = vcvt.s32.f32 %v1825_v13  ;;  %v1529_v51 = vld [vmem:[#allocation16 + $0x3c8] sm:$0xff]  ;;  %v1450_v13 = vld [vmem:[#allocation16 + $0x150] sm:$0xff] }
 0x1af   :  { %v1402_v3 = vmul.f32 0.2, %v1398_v61  ;;  %2929 = vmatpush.bf16.msrb.mxu0 %v2578_v23  ;;  %v2674_v16 = vpack.c.bf16 %v2282_v41, %v2274_v56  ;;  %v2768_v36 = vpack.c.bf16 %v2472_v59, %v2464_v14  ;;  %v2345_v38 = vcvt.s32.f32 %v1833_v54 }
 0x1b0   :  { %v1319_v44 = vadd.f32 %v1318_v25, %v1317_v37  ;;  %v1562_v53 = vunpack.c.3.s8 %v1410_v17  ;;  %v2066_v33 = vcvt.s32.f32 %v1554_v49  ;;  %v1936_v27 = vunpack.c.2.s8 %v1504_v28  ;;  %v4713_v25 = vld [vmem:[#allocation16 + $0xd8] sm:$0xff] }
 0x1b1   :  { %v1406_v8 = vmax.f32 %v1398_v61, %v1402_v3  ;;  %2938 = vmatpush.bf16.msrb.mxu1 %v2674_v16  ;;  %v1944_v22 = vunpack.c.3.s8 %v1504_v28  ;;  %2864 = vmatpush.bf16.msrb.mxu3 %v2768_v36  ;;  %v2705_v18 = vpack.c.bf16 %v2345_v38, %v2337_v62  ;;  %v1809_v60 = vunpack.c.2.s8 %v4707_v0 }
 0x1b2   :  { %v1323_v57 = vmul.f32 %v1319_v44, %v4476_v47  ;;  %v1458_v47 = vld [vmem:[#allocation16 + $0x190] sm:$0xff]  ;;  %v2074_v39 = vcvt.s32.f32 %v1562_v53  ;;  %v1817_v2 = vunpack.c.3.s8 %v4707_v0  ;;  %v2448_v34 = vcvt.s32.f32 %v1936_v27 }
 0x1b3   :  { %v4703_v35 = vpack.c.bf16 %v1406_v8, %v1406_v8  ;;  %v1746_v43 = vunpack.c.2.s8 %v1458_v47  ;;  %v1754_v5 = vunpack.c.3.s8 %v1458_v47  ;;  %2893 = vmatmul.bf16.vlgmr.msra.gmra.mxu1 %v4678_v42  ;;  %v2456_v30 = vcvt.s32.f32 %v1944_v22  ;;  %2903 = vmatpush.bf16.msra.mxu2 %v2705_v18 }
 0x1b4   :  { %v4701_v24 = vadd.f32 1e-05, %v1323_v57  ;;  %v2570_v52 = vpack.c.bf16 %v2074_v39, %v2066_v33  ;;  %v2321_v1 = vcvt.s32.f32 %v1809_v60  ;;  %v2329_v55 = vcvt.s32.f32 %v1817_v2 }
 0x1b5   :  { %2854 = vmatmul.bf16.vlgmr.msrb.gmra.mxu2 %v4703_v35  ;;  %v2258_v37 = vcvt.s32.f32 %v1746_v43  ;;  %v2266_v7 = vcvt.s32.f32 %v1754_v5  ;;  %v1538_v50 = vunpack.c.0.s8 %v1410_v17  ;;  %v2760_v12 = vpack.c.bf16 %v2456_v30, %v2448_v34 }
 0x1b6   :  { %3573 = vrsqrt.f32 %v4701_v24  ;;  %v1546_v19 = vunpack.c.1.s8 %v1410_v17  ;;  %v1730_v9 = vunpack.c.0.s8 %v1458_v47  ;;  %vm1364_vm11 = vweird.f32 %v4701_v24  ;;  %2930 = vmatpush.bf16.msrb.mxu0 %v2570_v52 }
 0x1b7   :  { %v2666_v63 = vpack.c.bf16 %v2266_v7, %v2258_v37  ;;  %v2697_v61 = vpack.c.bf16 %v2329_v55, %v2321_v1  ;;  %v2050_v44 = vcvt.s32.f32 %v1538_v50  ;;  %2865 = vmatpush.bf16.msrb.mxu3 %v2760_v12  ;;  %v1738_v29 = vunpack.c.1.s8 %v1458_v47  ;;  %v1498_v47 = vld [vmem:[#allocation16 + $0x2d0] sm:$0xff] }
 0x1b8   :  { %v2058_v48 = vcvt.s32.f32 %v1546_v19  ;;  %v2242_v58 = vcvt.s32.f32 %v1730_v9  ;;  %v1651_v40 = vunpack.c.2.s8 %v4713_v25  ;;  %v1659_v10 = vunpack.c.3.s8 %v4713_v25 }
 0x1b9   :  { %2939 = vmatpush.bf16.msrb.mxu1 %v2666_v63  ;;  %2904 = vmatpush.bf16.msra.mxu2 %v2697_v61  ;;  %v1920_v3 = vunpack.c.0.s8 %v1504_v28  ;;  %v1928_v57 = vunpack.c.1.s8 %v1504_v28  ;;  %v2250_v17 = vcvt.s32.f32 %v1738_v29  ;;  %v1793_v56 = vunpack.c.0.s8 %v4707_v0 }
 0x1ba   :  { %v2562_v4 = vpack.c.bf16 %v2058_v48, %v2050_v44  ;;  %v2163_v23 = vcvt.s32.f32 %v1651_v40  ;;  %v2171_v31 = vcvt.s32.f32 %v1659_v10  ;;  %v1801_v59 = vunpack.c.1.s8 %v4707_v0  ;;  %v1427_v48 = vld [vmem:[#allocation16 + $0x98] sm:$0xff] }
 0x1bb   :  { %v2432_v8 = vcvt.s32.f32 %v1920_v3  ;;  %v2440_v14 = vcvt.s32.f32 %v1928_v57  ;;  %v2658_v16 = vpack.c.bf16 %v2250_v17, %v2242_v58  ;;  %v2305_v54 = vcvt.s32.f32 %v1793_v56 }
 0x1bc   :  { %v4715_v26 = vpop.eup %3573  ;;  %2931 = vmatpush.bf16.msrb.mxu0 %v2562_v4  ;;  %v2033_v49 = vunpack.c.2.s8 %v1529_v51  ;;  %v2619_v28 = vpack.c.bf16 %v2171_v31, %v2163_v23  ;;  %v2041_v38 = vunpack.c.3.s8 %v1529_v51  ;;  %v2313_v53 = vcvt.s32.f32 %v1801_v59 }
 0x1bd   :  { %v1359_v20 = vmul.f32 %v4715_v26, %v4701_v24  ;;  %vm1365_vm12 = vweird.f32 %v4715_v26  ;;  %v2752_v36 = vpack.c.bf16 %v2440_v14, %v2432_v8  ;;  %2940 = vmatpush.bf16.msrb.mxu1 %v2658_v16  ;;  %v1714_v43 = vunpack.c.2.s8 %v1450_v13  ;;  %v1490_v8 = vld [vmem:[#allocation16 + $0x290] sm:$0xff] }
 0x1be   :  { %v2545_v33 = vcvt.s32.f32 %v2033_v49  ;;  %v1722_v5 = vunpack.c.3.s8 %v1450_v13  ;;  %v2553_v22 = vcvt.s32.f32 %v2041_v38  ;;  %v1906_v18 = vunpack.c.2.s8 %v1498_v47  ;;  %vm1366_vm13 = vmor %vm1364_vm11, %vm1365_vm12 }
 0x1bf   :  { %v1360_v11 = vmul.f32 %v4715_v26, %v1359_v20  ;;  %2866 = vmatpush.bf16.msrb.mxu3 %v2752_v36  ;;  %v1914_v39 = vunpack.c.3.s8 %v1498_v47  ;;  %v2689_v0 = vpack.c.bf16 %v2313_v53, %v2305_v54  ;;  %2932 = vmatmul.bf16.vlgmr.msrb.gmra.mxu0 %v4622_v46  ;;  %v2226_v60 = vcvt.s32.f32 %v1714_v43 }
 0x1c0   :  { %2976 = vmatpush.bf16.msra.mxu0 %v2619_v28  ;;  %v2234_v2 = vcvt.s32.f32 %v1722_v5  ;;  %v1635_v37 = vunpack.c.0.s8 %v4713_v25  ;;  %v2809_v34 = vpack.c.bf16 %v2553_v22, %v2545_v33  ;;  %v2418_v30 = vcvt.s32.f32 %v1906_v18 }
 0x1c1   :  { %v1361_v41 = vmul.f32 0.5, %v1360_v11  ;;  %v2426_v52 = vcvt.s32.f32 %v1914_v39  ;;  %2905 = vmatpush.bf16.msra.mxu2 %v2689_v0  ;;  %v1643_v50 = vunpack.c.1.s8 %v4713_v25  ;;  %v2017_v12 = vunpack.c.0.s8 %v1529_v51  ;;  %v1521_v25 = vld [vmem:[#allocation16 + $0x388] sm:$0xff] }
 0x1c2   :  { %v2650_v55 = vpack.c.bf16 %v2234_v2, %v2226_v60  ;;  %v2147_v24 = vcvt.s32.f32 %v1635_v37  ;;  %v2025_v19 = vunpack.c.1.s8 %v1529_v51  ;;  %v1698_v9 = vunpack.c.0.s8 %v1450_v13  ;;  %v1442_v51 = vld [vmem:[#allocation16 + $0x110] sm:$0xff]  ;;  %v1419_v37 = vld [vmem:[#allocation16 + $0x58] sm:$0xff] }
 0x1c3   :  { %v1362_v62 = vsub.f32 1.5, %v1361_v41  ;;  %2911 = vmatpush.bf16.msra.mxu3 %v2809_v34  ;;  %v2746_v63 = vpack.c.bf16 %v2426_v52, %v2418_v30  ;;  %v1706_v61 = vunpack.c.1.s8 %v1450_v13  ;;  %v1890_v44 = vunpack.c.0.s8 %v1498_v47 }
 0x1c4   :  { %2941 = vmatpush.bf16.msrb.mxu1 %v2650_v55  ;;  %v2537_v29 = vcvt.s32.f32 %v2025_v19  ;;  %v2210_v58 = vcvt.s32.f32 %v1698_v9  ;;  %v1898_v40 = vunpack.c.1.s8 %v1498_v47  ;;  %v1619_v4 = vunpack.c.2.s8 %v1427_v48 }
 0x1c5   :  { %v1363_v27 = vmul.f32 %v4715_v26, %v1362_v62  ;;  %2950 = vmatpush.bf16.msrb.mxu2 %v2746_v63  ;;  %v2218_v3 = vcvt.s32.f32 %v1706_v61  ;;  %v2402_v57 = vcvt.s32.f32 %v1890_v44  ;;  %v1627_v17 = vunpack.c.3.s8 %v1427_v48 }
 0x1c6   :  { %2906 = vmatmul.bf16.vlgmr.msra.gmra.mxu2 %v4703_v35  ;;  %v2001_v41 = vunpack.c.2.s8 %v1521_v25  ;;  %v2009_v31 = vunpack.c.3.s8 %v1521_v25  ;;  %v2131_v32 = vcvt.s32.f32 %v1619_v4  ;;  %v1682_v13 = vunpack.c.2.s8 %v1442_v51 }
 0x1c7   :  { %v1367_v7 = vsel %vm1366_vm13, %v4715_v26, %v1363_v27  ;;  %v2155_v26 = vcvt.s32.f32 %v1643_v50  ;;  %v2642_v56 = vpack.c.bf16 %v2218_v3, %v2210_v58  ;;  %v1690_v49 = vunpack.c.3.s8 %v1442_v51 }
 0x1c8   :  { %v1371_v1 = vmul.f32 %v1367_v7, %v4668_v6  ;;  %v2529_v6 = vcvt.s32.f32 %v2017_v12  ;;  %v2513_v59 = vcvt.s32.f32 %v2001_v41  ;;  %v2521_v54 = vcvt.s32.f32 %v2009_v31 }
 0x1c9   :  { %v2611_v10 = vpack.c.bf16 %v2155_v26, %v2147_v24  ;;  %2942 = vmatpush.bf16.msrb.mxu1 %v2642_v56  ;;  %v2194_v62 = vcvt.s32.f32 %v1682_v13  ;;  %v1874_v28 = vunpack.c.2.s8 %v1490_v8  ;;  %v1882_v36 = vunpack.c.3.s8 %v1490_v8  ;;  %v1513_v26 = vld [vmem:[#allocation16 + $0x348] sm:$0xff] }
 0x1ca   :  { %v1385_v20 = vmul.f32 %v1377_v21, %v1371_v1  ;;  %v2801_v45 = vpack.c.bf16 %v2537_v29, %v2529_v6  ;;  %v2410_v21 = vcvt.s32.f32 %v1898_v40  ;;  %v2793_v53 = vpack.c.bf16 %v2521_v54, %v2513_v59  ;;  %v1467_v1 = vld [vmem:[#allocation16 + $0x1d8] sm:$0xff]  ;;  %v1482_v29 = vld [vmem:[#allocation16 + $0x250] sm:$0xff] }
 0x1cb   :  { %2977 = vmatpush.bf16.msra.mxu0 %v2611_v10  ;;  %v2202_v33 = vcvt.s32.f32 %v1690_v49  ;;  %v1603_v43 = vunpack.c.0.s8 %v1427_v48  ;;  %v2386_v5 = vcvt.s32.f32 %v1874_v28  ;;  %v2394_v27 = vcvt.s32.f32 %v1882_v36  ;;  %v1411_v49 = vld [vmem:[#allocation16 + $0x18] sm:$0xff] }
 0x1cc   :  { %v1399_v11 = vadd.f32 %v1391_v15, %v1385_v20  ;;  %2912 = vmatpush.bf16.msra.mxu3 %v2801_v45  ;;  %v2738_v14 = vpack.c.bf16 %v2410_v21, %v2402_v57  ;;  %v2139_v15 = vcvt.s32.f32 %v1627_v17  ;;  %v1611_v22 = vunpack.c.1.s8 %v1427_v48 }
 0x1cd   :  { %v1985_v18 = vunpack.c.0.s8 %v1521_v25  ;;  %v2634_v39 = vpack.c.bf16 %v2202_v33, %v2194_v62  ;;  %v2115_v0 = vcvt.s32.f32 %v1603_v43  ;;  %v1993_v60 = vunpack.c.1.s8 %v1521_v25 }
 0x1ce   :  { %v1403_v23 = vmul.f32 0.2, %v1399_v11  ;;  %2951 = vmatpush.bf16.msrb.mxu2 %v2738_v14  ;;  %v2603_v47 = vpack.c.bf16 %v2139_v15, %v2131_v32  ;;  %v1666_v2 = vunpack.c.0.s8 %v1442_v51  ;;  %v2730_v7 = vpack.c.bf16 %v2394_v27, %v2386_v5 }
 0x1cf   :  { %v2123_v34 = vcvt.s32.f32 %v1611_v22  ;;  %v2497_v30 = vcvt.s32.f32 %v1985_v18  ;;  %v1674_v52 = vunpack.c.1.s8 %v1442_v51  ;;  %2943 = vmatpush.bf16.msrb.mxu1 %v2634_v39  ;;  %v2505_v55 = vcvt.s32.f32 %v1993_v60  ;;  %v1505_v60 = vld [vmem:[#allocation16 + $0x308] sm:$0xff] }
 0x1d0   :  { %v1407_v16 = vmax.f32 %v1399_v11, %v1403_v23  ;;  %2978 = vmatpush.bf16.msra.mxu0 %v2603_v47  ;;  %2913 = vmatpush.bf16.msra.mxu3 %v2793_v53  ;;  %v2178_v50 = vcvt.s32.f32 %v1666_v2  ;;  %v1858_v24 = vunpack.c.0.s8 %v1490_v8  ;;  %v1866_v63 = vunpack.c.1.s8 %v1490_v8  ;;  %v1459_v53 = vld [vmem:[#allocation16 + $0x198] sm:$0xff] }
 0x1d1   :  { %v2595_v12 = vpack.c.bf16 %v2123_v34, %v2115_v0  ;;  %v2186_v19 = vcvt.s32.f32 %v1674_v52  ;;  %v1587_v9 = vunpack.c.2.s8 %v1419_v37  ;;  %v1595_v20 = vunpack.c.3.s8 %v1419_v37 }
 0x1d2   :  { %v4741_v38 = vpack.c.bf16 %v1407_v16, %v1407_v16  ;;  %2952 = vmatpush.bf16.msrb.mxu2 %v2730_v7  ;;  %v2785_v61 = vpack.c.bf16 %v2505_v55, %v2497_v30  ;;  %v2370_v44 = vcvt.s32.f32 %v1858_v24  ;;  %v2378_v48 = vcvt.s32.f32 %v1866_v63  ;;  %v1474_v30 = vld [vmem:[#allocation16 + $0x210] sm:$0xff] }
 0x1d3   :  { %v1779_v6 = vunpack.c.2.s8 %v1467_v1  ;;  %v2626_v58 = vpack.c.bf16 %v2186_v19, %v2178_v50  ;;  %v2099_v40 = vcvt.s32.f32 %v1587_v9  ;;  %v2107_v25 = vcvt.s32.f32 %v1595_v20 }
 0x1d4   :  { %2867 = vmatmul.bf16.vlgmr.msrb.gmra.mxu3 %v4741_v38  ;;  %2979 = vmatpush.bf16.msra.mxu0 %v2595_v12  ;;  %v1787_v11 = vunpack.c.3.s8 %v1467_v1  ;;  %v2722_v10 = vpack.c.bf16 %v2378_v48, %v2370_v44  ;;  %v1969_v57 = vunpack.c.2.s8 %v1513_v26  ;;  %v1977_v51 = vunpack.c.3.s8 %v1513_v26 }
 0x1d5   :  { %2914 = vmatpush.bf16.msra.mxu3 %v2785_v61  ;;  %v2291_v3 = vcvt.s32.f32 %v1779_v6  ;;  %2944 = vmatpush.bf16.msrb.mxu1 %v2626_v58  ;;  %v2587_v45 = vpack.c.bf16 %v2107_v25, %v2099_v40  ;;  %v1842_v4 = vunpack.c.2.s8 %v1482_v29  ;;  %v1850_v17 = vunpack.c.3.s8 %v1482_v29  ;;  %v1436_v58 = vld [vmem:[#allocation16 + $0xe0] sm:$0xff] }
 0x1d6   :  { %v2299_v21 = vcvt.s32.f32 %v1787_v11  ;;  %2953 = vmatpush.bf16.msrb.mxu2 %v2722_v10  ;;  %v2481_v23 = vcvt.s32.f32 %v1969_v57  ;;  %v2489_v56 = vcvt.s32.f32 %v1977_v51  ;;  %v1571_v41 = vunpack.c.0.s8 %v1419_v37 }
 0x1d7   :  { %v1579_v31 = vunpack.c.1.s8 %v1419_v37  ;;  %v2354_v14 = vcvt.s32.f32 %v1842_v4  ;;  %v2362_v32 = vcvt.s32.f32 %v1850_v17  ;;  %v1763_v15 = vunpack.c.0.s8 %v1467_v1 }
 0x1d8   :  { %2980 = vmatpush.bf16.msra.mxu0 %v2587_v45  ;;  %v2683_v8 = vpack.c.bf16 %v2299_v21, %v2291_v3  ;;  %v2777_v13 = vpack.c.bf16 %v2489_v56, %v2481_v23  ;;  %2945 = vmatmul.bf16.vlgmr.msrb.gmra.mxu1 %v4678_v42  ;;  %v2083_v16 = vcvt.s32.f32 %v1571_v41  ;;  %v1771_v54 = vunpack.c.1.s8 %v1467_v1  ;;  %v1530_v56 = vld [vmem:[#allocation16 + $0x3d0] sm:$0xff] }
 0x1d9   :  { %v2091_v59 = vcvt.s32.f32 %v1579_v31  ;;  %v2714_v47 = vpack.c.bf16 %v2362_v32, %v2354_v14  ;;  %v2275_v62 = vcvt.s32.f32 %v1763_v15  ;;  %v1953_v28 = vunpack.c.0.s8 %v1513_v26 }
 0x1da   :  { %2989 = vmatpush.bf16.msra.mxu1 %v2683_v8  ;;  %v1961_v36 = vunpack.c.1.s8 %v1513_v26  ;;  %2915 = vmatpush.bf16.msra.mxu3 %v2777_v13  ;;  %v2283_v43 = vcvt.s32.f32 %v1771_v54  ;;  %v1826_v5 = vunpack.c.0.s8 %v1482_v29  ;;  %v1834_v27 = vunpack.c.1.s8 %v1482_v29 }
 0x1db   :  { %v2579_v33 = vpack.c.bf16 %v2091_v59, %v2083_v16  ;;  %2954 = vmatpush.bf16.msrb.mxu2 %v2714_v47  ;;  %v2465_v22 = vcvt.s32.f32 %v1953_v28  ;;  %v1555_v39 = vunpack.c.2.s8 %v1411_v49  ;;  %v1563_v0 = vunpack.c.3.s8 %v1411_v49  ;;  %v1451_v59 = vld [vmem:[#allocation16 + $0x158] sm:$0xff] }
 0x1dc   :  { %v2473_v18 = vcvt.s32.f32 %v1961_v36  ;;  %v2675_v2 = vpack.c.bf16 %v2283_v43, %v2275_v62  ;;  %v2338_v37 = vcvt.s32.f32 %v1826_v5  ;;  %v2346_v7 = vcvt.s32.f32 %v1834_v27  ;;  %v1499_v28 = vld [vmem:[#allocation16 + $0x2d8] sm:$0xff] }
 0x1dd   :  { %2981 = vmatpush.bf16.msra.mxu0 %v2579_v33  ;;  %v1747_v34 = vunpack.c.2.s8 %v1459_v53  ;;  %v2067_v1 = vcvt.s32.f32 %v1555_v39  ;;  %v2075_v55 = vcvt.s32.f32 %v1563_v0  ;;  %v1755_v50 = vunpack.c.3.s8 %v1459_v53 }
 0x1de   :  { %v2769_v52 = vpack.c.bf16 %v2473_v18, %v2465_v22  ;;  %2990 = vmatpush.bf16.msra.mxu1 %v2675_v2  ;;  %v2706_v24 = vpack.c.bf16 %v2346_v7, %v2338_v37  ;;  %v1937_v12 = vunpack.c.2.s8 %v1505_v60  ;;  %v1945_v19 = vunpack.c.3.s8 %v1505_v60 }
 0x1df   :  { %v2259_v63 = vcvt.s32.f32 %v1747_v34  ;;  %v2571_v9 = vpack.c.bf16 %v2075_v55, %v2067_v1  ;;  %v2267_v20 = vcvt.s32.f32 %v1755_v50  ;;  %v1810_v26 = vunpack.c.2.s8 %v1474_v30 }
 0x1e0   :  { %2916 = vmatpush.bf16.msra.mxu3 %v2769_v52  ;;  %v1818_v61 = vunpack.c.3.s8 %v1474_v30  ;;  %2955 = vmatpush.bf16.msrb.mxu2 %v2706_v24  ;;  %v2449_v44 = vcvt.s32.f32 %v1937_v12  ;;  %v2457_v48 = vcvt.s32.f32 %v1945_v19  ;;  %v1539_v6 = vunpack.c.0.s8 %v1411_v49 }
 0x1e1   :  { %v1547_v29 = vunpack.c.1.s8 %v1411_v49  ;;  %2982 = vmatpush.bf16.msra.mxu0 %v2571_v9  ;;  %v2667_v40 = vpack.c.bf16 %v2267_v20, %v2259_v63  ;;  %v2322_v25 = vcvt.s32.f32 %v1810_v26  ;;  %v1731_v10 = vunpack.c.0.s8 %v1459_v53  ;;  %v1428_v9 = vld [vmem:[#allocation16 + $0xa0] sm:$0xff] }
 0x1e2   :  { %v2330_v11 = vcvt.s32.f32 %v1818_v61  ;;  %v2761_v3 = vpack.c.bf16 %v2457_v48, %v2449_v44  ;;  %v2051_v57 = vcvt.s32.f32 %v1539_v6  ;;  %v1739_v45 = vunpack.c.1.s8 %v1459_v53  ;;  %v1522_v48 = vld [vmem:[#allocation16 + $0x390] sm:$0xff] }
 0x1e3   :  { %v2059_v51 = vcvt.s32.f32 %v1547_v29  ;;  %2991 = vmatpush.bf16.msra.mxu1 %v2667_v40  ;;  %v2243_v4 = vcvt.s32.f32 %v1731_v10  ;;  %v1652_v17 = vunpack.c.2.s8 %v1436_v58  ;;  %v1660_v23 = vunpack.c.3.s8 %v1436_v58 }
 0x1e4   :  { %v2698_v21 = vpack.c.bf16 %v2330_v11, %v2322_v25  ;;  %2917 = vmatpush.bf16.msra.mxu3 %v2761_v3  ;;  %v2251_v31 = vcvt.s32.f32 %v1739_v45  ;;  %v1921_v8 = vunpack.c.0.s8 %v1505_v60  ;;  %v1929_v14 = vunpack.c.1.s8 %v1505_v60 }
 0x1e5   :  { %v2563_v41 = vpack.c.bf16 %v2059_v51, %v2051_v57  ;;  %v2164_v32 = vcvt.s32.f32 %v1652_v17  ;;  %v2172_v15 = vcvt.s32.f32 %v1660_v23  ;;  %v1794_v13 = vunpack.c.0.s8 %v1474_v30  ;;  %v1443_v57 = vld [vmem:[#allocation16 + $0x118] sm:$0xff] }
 0x1e6   :  { %2956 = vmatpush.bf16.msrb.mxu2 %v2698_v21  ;;  %v1802_v16 = vunpack.c.1.s8 %v1474_v30  ;;  %v2659_v54 = vpack.c.bf16 %v2251_v31, %v2243_v4  ;;  %v2433_v49 = vcvt.s32.f32 %v1921_v8  ;;  %v2441_v47 = vcvt.s32.f32 %v1929_v14  ;;  %v1491_v17 = vld [vmem:[#allocation16 + $0x298] sm:$0xff] }
 0x1e7   :  { %2983 = vmatpush.bf16.msra.mxu0 %v2563_v41  ;;  %v2034_v62 = vunpack.c.2.s8 %v1530_v56  ;;  %v2620_v36 = vpack.c.bf16 %v2172_v15, %v2164_v32  ;;  %v2306_v53 = vcvt.s32.f32 %v1794_v13  ;;  %v2042_v43 = vunpack.c.3.s8 %v1530_v56 }
 0x1e8   :  { %v2314_v33 = vcvt.s32.f32 %v1802_v16  ;;  %2992 = vmatpush.bf16.msra.mxu1 %v2659_v54  ;;  %v2753_v5 = vpack.c.bf16 %v2441_v47, %v2433_v49  ;;  %v1715_v22 = vunpack.c.2.s8 %v1451_v59  ;;  %v1723_v18 = vunpack.c.3.s8 %v1451_v59 }
 0x1e9   :  { %v2546_v27 = vcvt.s32.f32 %v2034_v62  ;;  %v2554_v0 = vcvt.s32.f32 %v2042_v43  ;;  %v1907_v60 = vunpack.c.2.s8 %v1499_v28  ;;  %v1915_v2 = vunpack.c.3.s8 %v1499_v28 }
 0x1ea   :  { %v2690_v39 = vpack.c.bf16 %v2314_v33, %v2306_v53  ;;  %2918 = vmatpush.bf16.msra.mxu3 %v2753_v5  ;;  %2984 = vmatmul.bf16.vlgmr.msra.gmra.mxu0 %v4622_v46  ;;  %v2227_v37 = vcvt.s32.f32 %v1715_v22  ;;  %v2235_v7 = vcvt.s32.f32 %v1723_v18  ;;  %v1636_v34 = vunpack.c.0.s8 %v1436_v58 }
 0x1eb   :  { %3028 = vmatpush.bf16.msrb.mxu0 %v2620_v36  ;;  %v1644_v30 = vunpack.c.1.s8 %v1436_v58  ;;  %v2810_v52 = vpack.c.bf16 %v2554_v0, %v2546_v27  ;;  %v2419_v1 = vcvt.s32.f32 %v1907_v60  ;;  %v2427_v55 = vcvt.s32.f32 %v1915_v2 }
 0x1ec   :  { %2957 = vmatpush.bf16.msrb.mxu2 %v2690_v39  ;;  %v2018_v50 = vunpack.c.0.s8 %v1530_v56  ;;  %v2651_v24 = vpack.c.bf16 %v2235_v7, %v2227_v37  ;;  %v2148_v63 = vcvt.s32.f32 %v1636_v34  ;;  %v2026_v19 = vunpack.c.1.s8 %v1530_v56  ;;  %v1420_v39 = vld [vmem:[#allocation16 + $0x60] sm:$0xff] }
 0x1ed   :  { %v2156_v12 = vcvt.s32.f32 %v1644_v30  ;;  %v2747_v20 = vpack.c.bf16 %v2427_v55, %v2419_v1  ;;  %v1699_v61 = vunpack.c.0.s8 %v1451_v59  ;;  %v1707_v44 = vunpack.c.1.s8 %v1451_v59  ;;  %2919 = vmatmul.bf16.vlgmr.msra.gmra.mxu3 %v4741_v38  ;;  %v1468_v7 = vld [vmem:[#allocation16 + $0x1e0] sm:$0xff] }
 0x1ee   :  { %2963 = vmatpush.bf16.msrb.mxu3 %v2810_v52  ;;  %v2530_v26 = vcvt.s32.f32 %v2018_v50  ;;  %2993 = vmatpush.bf16.msra.mxu1 %v2651_v24  ;;  %v2538_v29 = vcvt.s32.f32 %v2026_v19  ;;  %v1891_v58 = vunpack.c.0.s8 %v1499_v28  ;;  %v1899_v40 = vunpack.c.1.s8 %v1499_v28 }
 0x1ef   :  { %v2612_v6 = vpack.c.bf16 %v2156_v12, %v2148_v63  ;;  %2958 = vmatmul.bf16.vlgmr.msrb.gmra.mxu2 %v4703_v35  ;;  %v2211_v25 = vcvt.s32.f32 %v1699_v61  ;;  %v2219_v11 = vcvt.s32.f32 %v1707_v44  ;;  %v1620_v10 = vunpack.c.2.s8 %v1428_v9  ;;  %v1514_v12 = vld [vmem:[#allocation16 + $0x350] sm:$0xff]  ;;  %v1483_v61 = vld [vmem:[#allocation16 + $0x258] sm:$0xff] }
 0x1f0   :  { %3002 = vmatpush.bf16.msra.mxu2 %v2747_v20  ;;  %v1628_v3 = vunpack.c.3.s8 %v1428_v9  ;;  %v2802_v51 = vpack.c.bf16 %v2538_v29, %v2530_v26  ;;  %v2403_v45 = vcvt.s32.f32 %v1891_v58  ;;  %v2411_v21 = vcvt.s32.f32 %v1899_v40 }
 0x1f1   :  { %3029 = vmatpush.bf16.msrb.mxu0 %v2612_v6  ;;  %v2002_v4 = vunpack.c.2.s8 %v1522_v48  ;;  %v2643_v23 = vpack.c.bf16 %v2219_v11, %v2211_v25  ;;  %v2132_v56 = vcvt.s32.f32 %v1620_v10  ;;  %v2010_v31 = vunpack.c.3.s8 %v1522_v48 }
 0x1f2   :  { %v2140_v41 = vcvt.s32.f32 %v1628_v3  ;;  %2964 = vmatpush.bf16.msrb.mxu3 %v2802_v51  ;;  %v2739_v8 = vpack.c.bf16 %v2411_v21, %v2403_v45  ;;  %v1683_v32 = vunpack.c.2.s8 %v1443_v57  ;;  %v1691_v15 = vunpack.c.3.s8 %v1443_v57 }
 0x1f3   :  { %v2514_v14 = vcvt.s32.f32 %v2002_v4  ;;  %2994 = vmatpush.bf16.msra.mxu1 %v2643_v23  ;;  %v2522_v16 = vcvt.s32.f32 %v2010_v31  ;;  %v1875_v59 = vunpack.c.2.s8 %v1491_v17  ;;  %v1883_v54 = vunpack.c.3.s8 %v1491_v17 }
 0x1f4   :  { %v2604_v13 = vpack.c.bf16 %v2140_v41, %v2132_v56  ;;  %3003 = vmatpush.bf16.msra.mxu2 %v2739_v8  ;;  %v2195_v49 = vcvt.s32.f32 %v1683_v32  ;;  %v2203_v47 = vcvt.s32.f32 %v1691_v15  ;;  %v1604_v62 = vunpack.c.0.s8 %v1428_v9 }
 0x1f5   :  { %v1612_v28 = vunpack.c.1.s8 %v1428_v9  ;;  %v2794_v36 = vpack.c.bf16 %v2522_v16, %v2514_v14  ;;  %v2387_v53 = vcvt.s32.f32 %v1875_v59  ;;  %v2395_v33 = vcvt.s32.f32 %v1883_v54 }
 0x1f6   :  { %3030 = vmatpush.bf16.msrb.mxu0 %v2604_v13  ;;  %v1986_v43 = vunpack.c.0.s8 %v1522_v48  ;;  %v2635_v5 = vpack.c.bf16 %v2203_v47, %v2195_v49  ;;  %v2116_v27 = vcvt.s32.f32 %v1604_v62  ;;  %v1994_v18 = vunpack.c.1.s8 %v1522_v48  ;;  %v1412_v13 = vld [vmem:[#allocation16 + $0x20] sm:$0xff] }
 0x1f7   :  { %v2124_v22 = vcvt.s32.f32 %v1612_v28  ;;  %2965 = vmatpush.bf16.msrb.mxu3 %v2794_v36  ;;  %v2731_v0 = vpack.c.bf16 %v2395_v33, %v2387_v53  ;;  %v1667_v2 = vunpack.c.0.s8 %v1443_v57  ;;  %v1675_v37 = vunpack.c.1.s8 %v1443_v57  ;;  %v1460_v47 = vld [vmem:[#allocation16 + $0x1a0] sm:$0xff] }
 0x1f8   :  { %v2498_v60 = vcvt.s32.f32 %v1986_v43  ;;  %2995 = vmatpush.bf16.msra.mxu1 %v2635_v5  ;;  %v2506_v30 = vcvt.s32.f32 %v1994_v18  ;;  %v1859_v52 = vunpack.c.0.s8 %v1491_v17  ;;  %v1867_v1 = vunpack.c.1.s8 %v1491_v17 }
 0x1f9   :  { %v2596_v34 = vpack.c.bf16 %v2124_v22, %v2116_v27  ;;  %3004 = vmatpush.bf16.msra.mxu2 %v2731_v0  ;;  %v2179_v55 = vcvt.s32.f32 %v1667_v2  ;;  %v2187_v50 = vcvt.s32.f32 %v1675_v37  ;;  %v1588_v24 = vunpack.c.2.s8 %v1420_v39  ;;  %v1506_v22 = vld [vmem:[#allocation16 + $0x310] sm:$0xff]  ;;  %v1475_v2 = vld [vmem:[#allocation16 + $0x218] sm:$0xff] }
 0x1fa   :  { %v1596_v63 = vunpack.c.3.s8 %v1420_v39  ;;  %v2786_v19 = vpack.c.bf16 %v2506_v30, %v2498_v60  ;;  %v2371_v9 = vcvt.s32.f32 %v1859_v52  ;;  %v2379_v20 = vcvt.s32.f32 %v1867_v1 }
 0x1fb   :  { %3031 = vmatpush.bf16.msrb.mxu0 %v2596_v34  ;;  %v1780_v26 = vunpack.c.2.s8 %v1468_v7  ;;  %v2627_v44 = vpack.c.bf16 %v2187_v50, %v2179_v55  ;;  %v2100_v48 = vcvt.s32.f32 %v1588_v24  ;;  %v1788_v29 = vunpack.c.3.s8 %v1468_v7 }
 0x1fc   :  { %v2108_v6 = vcvt.s32.f32 %v1596_v63  ;;  %2966 = vmatpush.bf16.msrb.mxu3 %v2786_v19  ;;  %v2723_v58 = vpack.c.bf16 %v2379_v20, %v2371_v9  ;;  %v1970_v25 = vunpack.c.2.s8 %v1514_v12  ;;  %v1978_v11 = vunpack.c.3.s8 %v1514_v12 }
 0x1fd   :  { %v2292_v40 = vcvt.s32.f32 %v1780_v26  ;;  %2996 = vmatpush.bf16.msra.mxu1 %v2627_v44  ;;  %v2300_v3 = vcvt.s32.f32 %v1788_v29  ;;  %v1843_v57 = vunpack.c.2.s8 %v1483_v61  ;;  %v1851_v51 = vunpack.c.3.s8 %v1483_v61  ;;  %v1437_v44 = vld [vmem:[#allocation16 + $0xe8] sm:$0xff] }
 0x1fe   :  { %v2588_v10 = vpack.c.bf16 %v2108_v6, %v2100_v48  ;;  %3005 = vmatpush.bf16.msra.mxu2 %v2723_v58  ;;  %v2482_v45 = vcvt.s32.f32 %v1970_v25  ;;  %v2490_v21 = vcvt.s32.f32 %v1978_v11  ;;  %v1572_v4 = vunpack.c.0.s8 %v1420_v39 }
 0x1ff   :  { %v1580_v17 = vunpack.c.1.s8 %v1420_v39  ;;  %v2684_v23 = vpack.c.bf16 %v2300_v3, %v2292_v40  ;;  %v2355_v56 = vcvt.s32.f32 %v1843_v57  ;;  %v2363_v41 = vcvt.s32.f32 %v1851_v51 }
 0x200   :  { %3032 = vmatpush.bf16.msrb.mxu0 %v2588_v10  ;;  %v1764_v31 = vunpack.c.0.s8 %v1468_v7  ;;  %v2778_v8 = vpack.c.bf16 %v2490_v21, %v2482_v45  ;;  %2997 = vmatmul.bf16.vlgmr.msra.gmra.mxu1 %v4678_v42  ;;  %v2084_v14 = vcvt.s32.f32 %v1572_v4  ;;  %v1772_v15 = vunpack.c.1.s8 %v1468_v7  ;;  %v1531_v21 = vld [vmem:[#allocation16 + $0x3d8] sm:$0xff] }
 0x201   :  { %v2092_v32 = vcvt.s32.f32 %v1580_v17  ;;  %3041 = vmatpush.bf16.msrb.mxu1 %v2684_v23  ;;  %v2715_v16 = vpack.c.bf16 %v2363_v41, %v2355_v56  ;;  %v1954_v54 = vunpack.c.0.s8 %v1514_v12  ;;  %v1962_v49 = vunpack.c.1.s8 %v1514_v12 }
 0x202   :  { %v2276_v59 = vcvt.s32.f32 %v1764_v31  ;;  %2967 = vmatpush.bf16.msrb.mxu3 %v2778_v8  ;;  %v2284_v28 = vcvt.s32.f32 %v1772_v15  ;;  %v1827_v36 = vunpack.c.0.s8 %v1483_v61  ;;  %v1835_v53 = vunpack.c.1.s8 %v1483_v61 }
 0x203   :  { %v2580_v62 = vpack.c.bf16 %v2092_v32, %v2084_v14  ;;  %3006 = vmatpush.bf16.msra.mxu2 %v2715_v16  ;;  %v2466_v33 = vcvt.s32.f32 %v1954_v54  ;;  %v2474_v43 = vcvt.s32.f32 %v1962_v49  ;;  %v1556_v5 = vunpack.c.2.s8 %v1412_v13  ;;  %v1452_v32 = vld [vmem:[#allocation16 + $0x160] sm:$0xff] }
 0x204   :  { %v1564_v27 = vunpack.c.3.s8 %v1412_v13  ;;  %v2676_v18 = vpack.c.bf16 %v2284_v28, %v2276_v59  ;;  %v2339_v39 = vcvt.s32.f32 %v1827_v36  ;;  %v2347_v0 = vcvt.s32.f32 %v1835_v53  ;;  %v1500_v54 = vld [vmem:[#allocation16 + $0x2e0] sm:$0xff] }
 0x205   :  { %3033 = vmatpush.bf16.msrb.mxu0 %v2580_v62  ;;  %v1748_v60 = vunpack.c.2.s8 %v1460_v47  ;;  %v2770_v37 = vpack.c.bf16 %v2474_v43, %v2466_v33  ;;  %v2068_v7 = vcvt.s32.f32 %v1556_v5  ;;  %v1756_v30 = vunpack.c.3.s8 %v1460_v47 }
 0x206   :  { %v2076_v34 = vcvt.s32.f32 %v1564_v27  ;;  %3042 = vmatpush.bf16.msrb.mxu1 %v2676_v18  ;;  %v2707_v52 = vpack.c.bf16 %v2347_v0, %v2339_v39  ;;  %v1938_v55 = vunpack.c.2.s8 %v1506_v22  ;;  %v1946_v50 = vunpack.c.3.s8 %v1506_v22 }
 0x207   :  { %v2260_v1 = vcvt.s32.f32 %v1748_v60  ;;  %2968 = vmatpush.bf16.msrb.mxu3 %v2770_v37  ;;  %v2268_v63 = vcvt.s32.f32 %v1756_v30  ;;  %v1811_v12 = vunpack.c.2.s8 %v1475_v2  ;;  %v1819_v19 = vunpack.c.3.s8 %v1475_v2 }
 0x208   :  { %v2572_v24 = vpack.c.bf16 %v2076_v34, %v2068_v7  ;;  %3007 = vmatpush.bf16.msra.mxu2 %v2707_v52  ;;  %v2450_v9 = vcvt.s32.f32 %v1938_v55  ;;  %v2458_v20 = vcvt.s32.f32 %v1946_v50  ;;  %v1540_v26 = vunpack.c.0.s8 %v1412_v13 }
 0x209   :  { %v1548_v61 = vunpack.c.1.s8 %v1412_v13  ;;  %v2668_v48 = vpack.c.bf16 %v2268_v63, %v2260_v1  ;;  %v2323_v6 = vcvt.s32.f32 %v1811_v12  ;;  %v2331_v29 = vcvt.s32.f32 %v1819_v19 }
 0x20a   :  { %3034 = vmatpush.bf16.msrb.mxu0 %v2572_v24  ;;  %v1732_v58 = vunpack.c.0.s8 %v1460_v47  ;;  %v2762_v40 = vpack.c.bf16 %v2458_v20, %v2450_v9  ;;  %v2052_v25 = vcvt.s32.f32 %v1540_v26  ;;  %v1740_v10 = vunpack.c.1.s8 %v1460_v47  ;;  %v1429_v24 = vld [vmem:[#allocation16 + $0xa8] sm:$0xff]  ;;  %v1523_v20 = vld [vmem:[#allocation16 + $0x398] sm:$0xff] }
 0x20b   :  { %v2060_v11 = vcvt.s32.f32 %v1548_v61  ;;  %3043 = vmatpush.bf16.msrb.mxu1 %v2668_v48  ;;  %v2699_v3 = vpack.c.bf16 %v2331_v29, %v2323_v6  ;;  %v1653_v51 = vunpack.c.2.s8 %v1437_v44  ;;  %v1661_v45 = vunpack.c.3.s8 %v1437_v44 }
 0x20c   :  { %v2244_v57 = vcvt.s32.f32 %v1732_v58  ;;  %2969 = vmatpush.bf16.msrb.mxu3 %v2762_v40  ;;  %v2252_v17 = vcvt.s32.f32 %v1740_v10  ;;  %v1922_v23 = vunpack.c.0.s8 %v1506_v22  ;;  %v1930_v56 = vunpack.c.1.s8 %v1506_v22 }
 0x20d   :  { %v2564_v4 = vpack.c.bf16 %v2060_v11, %v2052_v25  ;;  %3008 = vmatpush.bf16.msra.mxu2 %v2699_v3  ;;  %v2165_v41 = vcvt.s32.f32 %v1653_v51  ;;  %v2173_v31 = vcvt.s32.f32 %v1661_v45  ;;  %v1795_v8 = vunpack.c.0.s8 %v1475_v2  ;;  %v1444_v25 = vld [vmem:[#allocation16 + $0x120] sm:$0xff] }
 0x20e   :  { %v1803_v14 = vunpack.c.1.s8 %v1475_v2  ;;  %v2660_v15 = vpack.c.bf16 %v2252_v17, %v2244_v57  ;;  %v2434_v13 = vcvt.s32.f32 %v1922_v23  ;;  %v2442_v16 = vcvt.s32.f32 %v1930_v56  ;;  %v1492_v51 = vld [vmem:[#allocation16 + $0x2a0] sm:$0xff] }
 0x20f   :  { %3035 = vmatpush.bf16.msrb.mxu0 %v2564_v4  ;;  %v2035_v59 = vunpack.c.2.s8 %v1531_v21  ;;  %v2621_v49 = vpack.c.bf16 %v2173_v31, %v2165_v41  ;;  %v2307_v47 = vcvt.s32.f32 %v1795_v8  ;;  %v2043_v28 = vunpack.c.3.s8 %v1531_v21 }
 0x210   :  { %v2315_v62 = vcvt.s32.f32 %v1803_v14  ;;  %3044 = vmatpush.bf16.msrb.mxu1 %v2660_v15  ;;  %v2754_v36 = vpack.c.bf16 %v2442_v16, %v2434_v13  ;;  %v1716_v33 = vunpack.c.2.s8 %v1452_v32  ;;  %v1724_v43 = vunpack.c.3.s8 %v1452_v32 }
 0x211   :  { %v2547_v53 = vcvt.s32.f32 %v2035_v59  ;;  %v2555_v27 = vcvt.s32.f32 %v2043_v28  ;;  %v1908_v22 = vunpack.c.2.s8 %v1500_v54  ;;  %v1916_v18 = vunpack.c.3.s8 %v1500_v54 }
 0x212   :  { %v2691_v5 = vpack.c.bf16 %v2315_v62, %v2307_v47  ;;  %2970 = vmatpush.bf16.msrb.mxu3 %v2754_v36  ;;  %3036 = vmatmul.bf16.vlgmr.msrb.gmra.mxu0 %v4622_v46  ;;  %v2228_v39 = vcvt.s32.f32 %v1716_v33  ;;  %v2236_v0 = vcvt.s32.f32 %v1724_v43  ;;  %v1637_v60 = vunpack.c.0.s8 %v1437_v44 }
 0x213   :  { %3080 = vmatpush.bf16.msra.mxu0 %v2621_v49  ;;  %v1645_v2 = vunpack.c.1.s8 %v1437_v44  ;;  %v2811_v37 = vpack.c.bf16 %v2555_v27, %v2547_v53  ;;  %v2420_v7 = vcvt.s32.f32 %v1908_v22  ;;  %v2428_v34 = vcvt.s32.f32 %v1916_v18 }
 0x214   :  { %3009 = vmatpush.bf16.msra.mxu2 %v2691_v5  ;;  %v2019_v30 = vunpack.c.0.s8 %v1531_v21  ;;  %v2652_v52 = vpack.c.bf16 %v2236_v0, %v2228_v39  ;;  %v2149_v1 = vcvt.s32.f32 %v1637_v60  ;;  %v2027_v50 = vunpack.c.1.s8 %v1531_v21  ;;  %v1421_v5 = vld [vmem:[#allocation16 + $0x68] sm:$0xff] }
 0x215   :  { %v2157_v55 = vcvt.s32.f32 %v1645_v2  ;;  %v2748_v63 = vpack.c.bf16 %v2428_v34, %v2420_v7  ;;  %v1700_v19 = vunpack.c.0.s8 %v1452_v32  ;;  %v1708_v9 = vunpack.c.1.s8 %v1452_v32  ;;  %2971 = vmatmul.bf16.vlgmr.msrb.gmra.mxu3 %v4741_v38  ;;  %v1469_v0 = vld [vmem:[#allocation16 + $0x1e8] sm:$0xff] }
 0x216   :  { %3015 = vmatpush.bf16.msra.mxu3 %v2811_v37  ;;  %v2531_v12 = vcvt.s32.f32 %v2019_v30  ;;  %3045 = vmatpush.bf16.msrb.mxu1 %v2652_v52  ;;  %v2539_v61 = vcvt.s32.f32 %v2027_v50  ;;  %v1892_v44 = vunpack.c.0.s8 %v1500_v54  ;;  %v1900_v48 = vunpack.c.1.s8 %v1500_v54 }
 0x217   :  { %v2613_v26 = vpack.c.bf16 %v2157_v55, %v2149_v1  ;;  %v2212_v6 = vcvt.s32.f32 %v1700_v19  ;;  %v2220_v29 = vcvt.s32.f32 %v1708_v9  ;;  %v1621_v58 = vunpack.c.2.s8 %v1429_v24  ;;  %3010 = vmatmul.bf16.vlgmr.msra.gmra.mxu2 %v4703_v35  ;;  %v1515_v55 = vld [vmem:[#allocation16 + $0x358] sm:$0xff]  ;;  %v1484_v19 = vld [vmem:[#allocation16 + $0x260] sm:$0xff] }
 0x218   :  { %3054 = vmatpush.bf16.msrb.mxu2 %v2748_v63  ;;  %v1629_v40 = vunpack.c.3.s8 %v1429_v24  ;;  %v2803_v11 = vpack.c.bf16 %v2539_v61, %v2531_v12  ;;  %v2404_v10 = vcvt.s32.f32 %v1892_v44  ;;  %v2412_v3 = vcvt.s32.f32 %v1900_v48 }
 0x219   :  { %3081 = vmatpush.bf16.msra.mxu0 %v2613_v26  ;;  %v2003_v57 = vunpack.c.2.s8 %v1523_v20  ;;  %v2644_v45 = vpack.c.bf16 %v2220_v29, %v2212_v6  ;;  %v2133_v21 = vcvt.s32.f32 %v1621_v58  ;;  %v2011_v17 = vunpack.c.3.s8 %v1523_v20 }
 0x21a   :  { %v2141_v4 = vcvt.s32.f32 %v1629_v40  ;;  %3016 = vmatpush.bf16.msra.mxu3 %v2803_v11  ;;  %v2740_v23 = vpack.c.bf16 %v2412_v3, %v2404_v10  ;;  %v1684_v41 = vunpack.c.2.s8 %v1444_v25  ;;  %v1692_v31 = vunpack.c.3.s8 %v1444_v25  ;;  %v4752_v10 = vpop.f32.mrf.mxu0 }
 0x21b   :  { %v2515_v56 = vcvt.s32.f32 %v2003_v57  ;;  %3046 = vmatpush.bf16.msrb.mxu1 %v2644_v45  ;;  %v2523_v14 = vcvt.s32.f32 %v2011_v17  ;;  %v1876_v32 = vunpack.c.2.s8 %v1492_v51  ;;  %v1884_v15 = vunpack.c.3.s8 %v1492_v51 }
 0x21c   :  { %v2605_v8 = vpack.c.bf16 %v2141_v4, %v2133_v21  ;;  %3055 = vmatpush.bf16.msrb.mxu2 %v2740_v23  ;;  %v2196_v13 = vcvt.s32.f32 %v1684_v41  ;;  %v2204_v16 = vcvt.s32.f32 %v1692_v31  ;;  %v1605_v59 = vunpack.c.0.s8 %v1429_v24 }
 0x21d   :  { %v1613_v54 = vunpack.c.1.s8 %v1429_v24  ;;  %v2795_v49 = vpack.c.bf16 %v2523_v14, %v2515_v56  ;;  %v2388_v47 = vcvt.s32.f32 %v1876_v32  ;;  %v2396_v62 = vcvt.s32.f32 %v1884_v15  ;;  %v1413_v14 = vld [vmem:[#allocation16 + $0x28] sm:$0xff] }
 0x21e   :  { %3082 = vmatpush.bf16.msra.mxu0 %v2605_v8  ;;  %v1987_v28 = vunpack.c.0.s8 %v1523_v20  ;;  %v2636_v36 = vpack.c.bf16 %v2204_v16, %v2196_v13  ;;  %v2117_v53 = vcvt.s32.f32 %v1605_v59  ;;  %v1995_v43 = vunpack.c.1.s8 %v1523_v20  ;;  %v1461_v59 = vld [vmem:[#allocation16 + $0x1a8] sm:$0xff] }
 0x21f   :  { %v2125_v33 = vcvt.s32.f32 %v1613_v54  ;;  %3017 = vmatpush.bf16.msra.mxu3 %v2795_v49  ;;  %v2732_v27 = vpack.c.bf16 %v2396_v62, %v2388_v47  ;;  %v1668_v18 = vunpack.c.0.s8 %v1444_v25  ;;  %v1676_v39 = vunpack.c.1.s8 %v1444_v25 }
 0x220   :  { %v2499_v22 = vcvt.s32.f32 %v1987_v28  ;;  %3047 = vmatpush.bf16.msrb.mxu1 %v2636_v36  ;;  %v2507_v2 = vcvt.s32.f32 %v1995_v43  ;;  %v1860_v37 = vunpack.c.0.s8 %v1492_v51  ;;  %v1868_v7 = vunpack.c.1.s8 %v1492_v51  ;;  %v1507_v43 = vld [vmem:[#allocation16 + $0x318] sm:$0xff] }
 0x221   :  { %v2597_v60 = vpack.c.bf16 %v2125_v33, %v2117_v53  ;;  %3056 = vmatpush.bf16.msrb.mxu2 %v2732_v27  ;;  %v2180_v34 = vcvt.s32.f32 %v1668_v18  ;;  %v2188_v30 = vcvt.s32.f32 %v1676_v39  ;;  %v1589_v52 = vunpack.c.2.s8 %v1421_v5  ;;  %v1476_v39 = vld [vmem:[#allocation16 + $0x220] sm:$0xff] }
 0x222   :  { %v1597_v1 = vunpack.c.3.s8 %v1421_v5  ;;  %v2787_v50 = vpack.c.bf16 %v2507_v2, %v2499_v22  ;;  %v2372_v24 = vcvt.s32.f32 %v1860_v37  ;;  %v2380_v63 = vcvt.s32.f32 %v1868_v7  ;;  %v2831_v7 = vpop.f32.mrf.mxu0 }
 0x223   :  { %3083 = vmatpush.bf16.msra.mxu0 %v2597_v60  ;;  %v1781_v12 = vunpack.c.2.s8 %v1469_v0  ;;  %v2628_v9 = vpack.c.bf16 %v2188_v30, %v2180_v34  ;;  %v2101_v20 = vcvt.s32.f32 %v1589_v52  ;;  %v1789_v61 = vunpack.c.3.s8 %v1469_v0 }
 0x224   :  { %v2109_v26 = vcvt.s32.f32 %v1597_v1  ;;  %3018 = vmatpush.bf16.msra.mxu3 %v2787_v50  ;;  %v2724_v44 = vpack.c.bf16 %v2380_v63, %v2372_v24  ;;  %v1971_v6 = vunpack.c.2.s8 %v1515_v55  ;;  %v1979_v29 = vunpack.c.3.s8 %v1515_v55 }
 0x225   :  { %v2293_v48 = vcvt.s32.f32 %v1781_v12  ;;  %3048 = vmatpush.bf16.msrb.mxu1 %v2628_v9  ;;  %v2301_v40 = vcvt.s32.f32 %v1789_v61  ;;  %v1844_v25 = vunpack.c.2.s8 %v1484_v19  ;;  %v1852_v11 = vunpack.c.3.s8 %v1484_v19 }
 0x226   :  { %v2589_v58 = vpack.c.bf16 %v2109_v26, %v2101_v20  ;;  %3057 = vmatpush.bf16.msrb.mxu2 %v2724_v44  ;;  %v2483_v3 = vcvt.s32.f32 %v1971_v6  ;;  %v2491_v57 = vcvt.s32.f32 %v1979_v29  ;;  %v1573_v51 = vunpack.c.0.s8 %v1421_v5  ;;  %v1438_v26 = vld [vmem:[#allocation16 + $0xf0] sm:$0xff] }
 0x227   :  { %v1581_v45 = vunpack.c.1.s8 %v1421_v5  ;;  %v2685_v21 = vpack.c.bf16 %v2301_v40, %v2293_v48  ;;  %v2356_v4 = vcvt.s32.f32 %v1844_v25  ;;  %v2364_v17 = vcvt.s32.f32 %v1852_v11 }
 0x228   :  { %3084 = vmatpush.bf16.msra.mxu0 %v2589_v58  ;;  %v1765_v23 = vunpack.c.0.s8 %v1469_v0  ;;  %v2779_v56 = vpack.c.bf16 %v2491_v57, %v2483_v3  ;;  %3049 = vmatmul.bf16.vlgmr.msrb.gmra.mxu1 %v4678_v42  ;;  %v2085_v41 = vcvt.s32.f32 %v1573_v51  ;;  %v1773_v8 = vunpack.c.1.s8 %v1469_v0 }
 0x229   :  { %v2093_v31 = vcvt.s32.f32 %v1581_v45  ;;  %3093 = vmatpush.bf16.msra.mxu1 %v2685_v21  ;;  %v2716_v32 = vpack.c.bf16 %v2364_v17, %v2356_v4  ;;  %v1955_v13 = vunpack.c.0.s8 %v1515_v55  ;;  %v1963_v16 = vunpack.c.1.s8 %v1515_v55  ;;  %v1532_v45 = vld [vmem:[#allocation16 + $0x3e0] sm:$0xff] }
 0x22a   :  { %v2277_v15 = vcvt.s32.f32 %v1765_v23  ;;  %3019 = vmatpush.bf16.msra.mxu3 %v2779_v56  ;;  %v2285_v49 = vcvt.s32.f32 %v1773_v8  ;;  %v1828_v47 = vunpack.c.0.s8 %v1484_v19  ;;  %v1836_v62 = vunpack.c.1.s8 %v1484_v19 }
 0x22b   :  { %v2581_v54 = vpack.c.bf16 %v2093_v31, %v2085_v41  ;;  %3058 = vmatpush.bf16.msrb.mxu2 %v2716_v32  ;;  %v2467_v28 = vcvt.s32.f32 %v1955_v13  ;;  %v2475_v36 = vcvt.s32.f32 %v1963_v16  ;;  %v1557_v53 = vunpack.c.2.s8 %v1413_v14 }
 0x22c   :  { %v1565_v33 = vunpack.c.3.s8 %v1413_v14  ;;  %v2677_v5 = vpack.c.bf16 %v2285_v49, %v2277_v15  ;;  %v2340_v27 = vcvt.s32.f32 %v1828_v47  ;;  %v2348_v22 = vcvt.s32.f32 %v1836_v62 }
 0x22d   :  { %3085 = vmatpush.bf16.msra.mxu0 %v2581_v54  ;;  %v1749_v18 = vunpack.c.2.s8 %v1461_v59  ;;  %v2771_v0 = vpack.c.bf16 %v2475_v36, %v2467_v28  ;;  %v2069_v60 = vcvt.s32.f32 %v1557_v53  ;;  %v1757_v37 = vunpack.c.3.s8 %v1461_v59 }
 0x22e   :  { %v2077_v2 = vcvt.s32.f32 %v1565_v33  ;;  %3094 = vmatpush.bf16.msra.mxu1 %v2677_v5  ;;  %v2708_v34 = vpack.c.bf16 %v2348_v22, %v2340_v27  ;;  %v1939_v52 = vunpack.c.2.s8 %v1507_v43  ;;  %v1947_v1 = vunpack.c.3.s8 %v1507_v43 }
 0x22f   :  { %v2261_v30 = vcvt.s32.f32 %v1749_v18  ;;  %3020 = vmatpush.bf16.msra.mxu3 %v2771_v0  ;;  %v2269_v50 = vcvt.s32.f32 %v1757_v37  ;;  %v1812_v24 = vunpack.c.2.s8 %v1476_v39  ;;  %v1820_v63 = vunpack.c.3.s8 %v1476_v39 }
 0x230   :  { %v2573_v55 = vpack.c.bf16 %v2077_v2, %v2069_v60  ;;  %3059 = vmatpush.bf16.msrb.mxu2 %v2708_v34  ;;  %v2451_v12 = vcvt.s32.f32 %v1939_v52  ;;  %v2459_v19 = vcvt.s32.f32 %v1947_v1  ;;  %v1541_v9 = vunpack.c.0.s8 %v1413_v14  ;;  %v4758_v52 = vpop.f32.mrf.mxu0 }
 0x231   :  { %v1549_v20 = vunpack.c.1.s8 %v1413_v14  ;;  %v2669_v61 = vpack.c.bf16 %v2269_v50, %v2261_v30  ;;  %v2324_v44 = vcvt.s32.f32 %v1812_v24  ;;  %v2332_v48 = vcvt.s32.f32 %v1820_v63  ;;  %v1453_v14 = vld [vmem:[#allocation16 + $0x168] sm:$0xff]  ;;  %v4756_v30 = vpop.f32.mrf.mxu1  ;;  %v1430_v63 = vld [vmem:[#allocation16 + $0xb0] sm:$0xff] }
 0x232   :  { %3086 = vmatpush.bf16.msra.mxu0 %v2573_v55  ;;  %v1733_v6 = vunpack.c.0.s8 %v1461_v59  ;;  %v2763_v29 = vpack.c.bf16 %v2459_v19, %v2451_v12  ;;  %v2053_v58 = vcvt.s32.f32 %v1541_v9  ;;  %v1741_v25 = vunpack.c.1.s8 %v1461_v59  ;;  %v1501_v59 = vld [vmem:[#allocation16 + $0x2e8] sm:$0xff] }
 0x233   :  { %v2061_v40 = vcvt.s32.f32 %v1549_v20  ;;  %3095 = vmatpush.bf16.msra.mxu1 %v2669_v61  ;;  %v2700_v11 = vpack.c.bf16 %v2332_v48, %v2324_v44  ;;  %v1654_v57 = vunpack.c.2.s8 %v1438_v26  ;;  %v1662_v51 = vunpack.c.3.s8 %v1438_v26 }
 0x234   :  { %v2245_v3 = vcvt.s32.f32 %v1733_v6  ;;  %3021 = vmatpush.bf16.msra.mxu3 %v2763_v29  ;;  %v2253_v4 = vcvt.s32.f32 %v1741_v25  ;;  %v1923_v17 = vunpack.c.0.s8 %v1507_v43  ;;  %v1931_v23 = vunpack.c.1.s8 %v1507_v43 }
 0x235   :  { %v2565_v21 = vpack.c.bf16 %v2061_v40, %v2053_v58  ;;  %3060 = vmatpush.bf16.msrb.mxu2 %v2700_v11  ;;  %v2166_v56 = vcvt.s32.f32 %v1654_v57  ;;  %v2174_v41 = vcvt.s32.f32 %v1662_v51  ;;  %v1796_v31 = vunpack.c.0.s8 %v1476_v39  ;;  %v1445_v11 = vld [vmem:[#allocation16 + $0x128] sm:$0xff] }
 0x236   :  { %v1804_v8 = vunpack.c.1.s8 %v1476_v39  ;;  %v2661_v32 = vpack.c.bf16 %v2253_v4, %v2245_v3  ;;  %v2435_v15 = vcvt.s32.f32 %v1923_v17  ;;  %v2443_v13 = vcvt.s32.f32 %v1931_v23 }
 0x237   :  { %3087 = vmatpush.bf16.msra.mxu0 %v2565_v21  ;;  %v2036_v16 = vunpack.c.2.s8 %v1532_v45  ;;  %v2622_v54 = vpack.c.bf16 %v2174_v41, %v2166_v56  ;;  %v2308_v49 = vcvt.s32.f32 %v1796_v31  ;;  %v2044_v62 = vunpack.c.3.s8 %v1532_v45  ;;  %v1493_v21 = vld [vmem:[#allocation16 + $0x2a8] sm:$0xff] }
 0x238   :  { %v2316_v47 = vcvt.s32.f32 %v1804_v8  ;;  %3096 = vmatpush.bf16.msra.mxu1 %v2661_v32  ;;  %v2755_v28 = vpack.c.bf16 %v2443_v13, %v2435_v15  ;;  %v1717_v53 = vunpack.c.2.s8 %v1453_v14  ;;  %v1725_v33 = vunpack.c.3.s8 %v1453_v14 }
 0x239   :  { %v2548_v36 = vcvt.s32.f32 %v2036_v16  ;;  %v2556_v5 = vcvt.s32.f32 %v2044_v62  ;;  %v1909_v27 = vunpack.c.2.s8 %v1501_v59  ;;  %v1917_v22 = vunpack.c.3.s8 %v1501_v59 }
 0x23a   :  { %v2692_v43 = vpack.c.bf16 %v2316_v47, %v2308_v49  ;;  %3022 = vmatpush.bf16.msra.mxu3 %v2755_v28  ;;  %3088 = vmatmul.bf16.vlgmr.msra.gmra.mxu0 %v4622_v46  ;;  %v2229_v18 = vcvt.s32.f32 %v1717_v53  ;;  %v2237_v39 = vcvt.s32.f32 %v1725_v33  ;;  %v1638_v0 = vunpack.c.0.s8 %v1438_v26 }
 0x23b   :  { %3132 = vmatpush.bf16.msrb.mxu0 %v2622_v54  ;;  %v1646_v60 = vunpack.c.1.s8 %v1438_v26  ;;  %v2812_v2 = vpack.c.bf16 %v2556_v5, %v2548_v36  ;;  %v2421_v37 = vcvt.s32.f32 %v1909_v27  ;;  %v2429_v7 = vcvt.s32.f32 %v1917_v22  ;;  %v1524_v26 = vld [vmem:[#allocation16 + $0x3a0] sm:$0xff]  ;;  %v2883_v54 = vpop.f32.mrf.mxu0 }
 0x23c   :  { %3061 = vmatpush.bf16.msrb.mxu2 %v2692_v43  ;;  %v2020_v34 = vunpack.c.0.s8 %v1532_v45  ;;  %v2653_v1 = vpack.c.bf16 %v2237_v39, %v2229_v18  ;;  %v2150_v55 = vcvt.s32.f32 %v1638_v0  ;;  %v2028_v24 = vunpack.c.1.s8 %v1532_v45  ;;  %v1422_v39 = vld [vmem:[#allocation16 + $0x70] sm:$0xff] }
 0x23d   :  { %v2158_v50 = vcvt.s32.f32 %v1646_v60  ;;  %v2749_v12 = vpack.c.bf16 %v2429_v7, %v2421_v37  ;;  %v1701_v9 = vunpack.c.0.s8 %v1453_v14  ;;  %v1709_v20 = vunpack.c.1.s8 %v1453_v14  ;;  %3023 = vmatmul.bf16.vlgmr.msra.gmra.mxu3 %v4741_v38  ;;  %v1470_v7 = vld [vmem:[#allocation16 + $0x1f0] sm:$0xff] }
 0x23e   :  { %3067 = vmatpush.bf16.msrb.mxu3 %v2812_v2  ;;  %v2532_v19 = vcvt.s32.f32 %v2020_v34  ;;  %3097 = vmatpush.bf16.msra.mxu1 %v2653_v1  ;;  %v2540_v44 = vcvt.s32.f32 %v2028_v24  ;;  %v1893_v48 = vunpack.c.0.s8 %v1501_v59  ;;  %v1901_v6 = vunpack.c.1.s8 %v1501_v59  ;;  %v2844_v59 = vpop.f32.mrf.mxu1  ;;  %v1414_v54 = vld [vmem:[#allocation16 + $0x30] sm:$0xff] }
 0x23f   :  { %v2614_v61 = vpack.c.bf16 %v2158_v50, %v2150_v55  ;;  %v2213_v29 = vcvt.s32.f32 %v1701_v9  ;;  %v2221_v58 = vcvt.s32.f32 %v1709_v20  ;;  %v1622_v40 = vunpack.c.2.s8 %v1430_v63  ;;  %3062 = vmatmul.bf16.vlgmr.msrb.gmra.mxu2 %v4703_v35  ;;  %v1516_v9 = vld [vmem:[#allocation16 + $0x360] sm:$0xff] }
 0x240   :  { %3106 = vmatpush.bf16.msra.mxu2 %v2749_v12  ;;  %v1630_v25 = vunpack.c.3.s8 %v1430_v63  ;;  %v2804_v3 = vpack.c.bf16 %v2540_v44, %v2532_v19  ;;  %v2405_v57 = vcvt.s32.f32 %v1893_v48  ;;  %v2413_v51 = vcvt.s32.f32 %v1901_v6  ;;  %v1485_v48 = vld [vmem:[#allocation16 + $0x268] sm:$0xff] }
 0x241   :  { %3133 = vmatpush.bf16.msrb.mxu0 %v2614_v61  ;;  %v2004_v45 = vunpack.c.2.s8 %v1524_v26  ;;  %v2645_v4 = vpack.c.bf16 %v2221_v58, %v2213_v29  ;;  %v2134_v17 = vcvt.s32.f32 %v1622_v40  ;;  %v2012_v56 = vunpack.c.3.s8 %v1524_v26 }
 0x242   :  { %v2142_v23 = vcvt.s32.f32 %v1630_v25  ;;  %3068 = vmatpush.bf16.msrb.mxu3 %v2804_v3  ;;  %v2741_v41 = vpack.c.bf16 %v2413_v51, %v2405_v57  ;;  %v1685_v8 = vunpack.c.2.s8 %v1445_v11  ;;  %v1693_v14 = vunpack.c.3.s8 %v1445_v11 }
 0x243   :  { %v2516_v31 = vcvt.s32.f32 %v2004_v45  ;;  %3098 = vmatpush.bf16.msra.mxu1 %v2645_v4  ;;  %v2524_v15 = vcvt.s32.f32 %v2012_v56  ;;  %v1877_v13 = vunpack.c.2.s8 %v1493_v21  ;;  %v1885_v16 = vunpack.c.3.s8 %v1493_v21 }
 0x244   :  { %v2606_v32 = vpack.c.bf16 %v2142_v23, %v2134_v17  ;;  %3107 = vmatpush.bf16.msra.mxu2 %v2741_v41  ;;  %v2197_v49 = vcvt.s32.f32 %v1685_v8  ;;  %v2205_v47 = vcvt.s32.f32 %v1693_v14  ;;  %v1606_v62 = vunpack.c.0.s8 %v1430_v63 }
 0x245   :  { %v1614_v28 = vunpack.c.1.s8 %v1430_v63  ;;  %v2796_v36 = vpack.c.bf16 %v2524_v15, %v2516_v31  ;;  %v2389_v53 = vcvt.s32.f32 %v1877_v13  ;;  %v2397_v33 = vcvt.s32.f32 %v1885_v16 }
 0x246   :  { %3134 = vmatpush.bf16.msrb.mxu0 %v2606_v32  ;;  %v1988_v43 = vunpack.c.0.s8 %v1524_v26  ;;  %v2637_v5 = vpack.c.bf16 %v2205_v47, %v2197_v49  ;;  %v2118_v27 = vcvt.s32.f32 %v1606_v62  ;;  %v1996_v18 = vunpack.c.1.s8 %v1524_v26 }
 0x247   :  { %v2126_v22 = vcvt.s32.f32 %v1614_v28  ;;  %3069 = vmatpush.bf16.msrb.mxu3 %v2796_v36  ;;  %v2733_v0 = vpack.c.bf16 %v2397_v33, %v2389_v53  ;;  %v1669_v2 = vunpack.c.0.s8 %v1445_v11  ;;  %v1677_v37 = vunpack.c.1.s8 %v1445_v11  ;;  %v1462_v36 = vld [vmem:[#allocation16 + $0x1b0] sm:$0xff]  ;;  %v4763_v53 = vpop.f32.mrf.mxu1  ;;  %v4765_v33 = vpop.f32.mrf.mxu0 }
 0x248   :  { %v2500_v60 = vcvt.s32.f32 %v1988_v43  ;;  %3099 = vmatpush.bf16.msra.mxu1 %v2637_v5  ;;  %v2508_v1 = vcvt.s32.f32 %v1996_v18  ;;  %v1861_v55 = vunpack.c.0.s8 %v1493_v21  ;;  %v1869_v50 = vunpack.c.1.s8 %v1493_v21 }
 0x249   :  { %v2598_v34 = vpack.c.bf16 %v2126_v22, %v2118_v27  ;;  %3108 = vmatpush.bf16.msra.mxu2 %v2733_v0  ;;  %v2181_v24 = vcvt.s32.f32 %v1669_v2  ;;  %v2189_v63 = vcvt.s32.f32 %v1677_v37  ;;  %v1590_v12 = vunpack.c.2.s8 %v1422_v39  ;;  %v4767_v2 = vld [vmem:[#allocation16 + $0x320] sm:$0xff] }
 0x24a   :  { %v1598_v19 = vunpack.c.3.s8 %v1422_v39  ;;  %v2788_v20 = vpack.c.bf16 %v2508_v1, %v2500_v60  ;;  %v2373_v26 = vcvt.s32.f32 %v1861_v55  ;;  %v2381_v61 = vcvt.s32.f32 %v1869_v50  ;;  %v1477_v55 = vld [vmem:[#allocation16 + $0x228] sm:$0xff] }
 0x24b   :  { %3135 = vmatpush.bf16.msrb.mxu0 %v2598_v34  ;;  %v1782_v44 = vunpack.c.2.s8 %v1470_v7  ;;  %v2629_v6 = vpack.c.bf16 %v2189_v63, %v2181_v24  ;;  %v2102_v29 = vcvt.s32.f32 %v1590_v12  ;;  %v1790_v40 = vunpack.c.3.s8 %v1470_v7 }
 0x24c   :  { %v2110_v58 = vcvt.s32.f32 %v1598_v19  ;;  %3070 = vmatpush.bf16.msrb.mxu3 %v2788_v20  ;;  %v2725_v25 = vpack.c.bf16 %v2381_v61, %v2373_v26  ;;  %v1972_v3 = vunpack.c.2.s8 %v1516_v9  ;;  %v1980_v57 = vunpack.c.3.s8 %v1516_v9 }
 0x24d   :  { %v2294_v11 = vcvt.s32.f32 %v1782_v44  ;;  %3100 = vmatpush.bf16.msra.mxu1 %v2629_v6  ;;  %v2302_v45 = vcvt.s32.f32 %v1790_v40  ;;  %v1845_v21 = vunpack.c.2.s8 %v1485_v48  ;;  %v1853_v4 = vunpack.c.3.s8 %v1485_v48 }
 0x24e   :  { %v2590_v51 = vpack.c.bf16 %v2110_v58, %v2102_v29  ;;  %3109 = vmatpush.bf16.msra.mxu2 %v2725_v25  ;;  %v2484_v17 = vcvt.s32.f32 %v1972_v3  ;;  %v2492_v23 = vcvt.s32.f32 %v1980_v57  ;;  %v1574_v56 = vunpack.c.0.s8 %v1422_v39 }
 0x24f   :  { %v1582_v41 = vunpack.c.1.s8 %v1422_v39  ;;  %v2686_v31 = vpack.c.bf16 %v2302_v45, %v2294_v11  ;;  %v2357_v8 = vcvt.s32.f32 %v1845_v21  ;;  %v2365_v14 = vcvt.s32.f32 %v1853_v4  ;;  %v4775_v11 = vld [vmem:[#allocation16 + $0xf8] sm:$0xff]  ;;  %v2935_v45 = vpop.f32.mrf.mxu0 }
 0x250   :  { %3136 = vmatpush.bf16.msrb.mxu0 %v2590_v51  ;;  %v1766_v32 = vunpack.c.0.s8 %v1470_v7  ;;  %v2780_v15 = vpack.c.bf16 %v2492_v23, %v2484_v17  ;;  %3101 = vmatmul.bf16.vlgmr.msra.gmra.mxu1 %v4678_v42  ;;  %v2086_v13 = vcvt.s32.f32 %v1574_v56  ;;  %v1774_v59 = vunpack.c.1.s8 %v1470_v7  ;;  %v2896_v51 = vpop.f32.mrf.mxu1  ;;  %v4777_v56 = vpop.f32.mrf.mxu2 }
 0x251   :  { %v2094_v16 = vcvt.s32.f32 %v1582_v41  ;;  %3145 = vmatpush.bf16.msrb.mxu1 %v2686_v31  ;;  %v2717_v49 = vpack.c.bf16 %v2365_v14, %v2357_v8  ;;  %v1956_v62 = vunpack.c.0.s8 %v1516_v9  ;;  %v1964_v28 = vunpack.c.1.s8 %v1516_v9 }
 0x252   :  { %v2278_v47 = vcvt.s32.f32 %v1766_v32  ;;  %3071 = vmatpush.bf16.msrb.mxu3 %v2780_v15  ;;  %v2286_v5 = vcvt.s32.f32 %v1774_v59  ;;  %v1829_v27 = vunpack.c.0.s8 %v1485_v48  ;;  %v1837_v22 = vunpack.c.1.s8 %v1485_v48  ;;  %v1533_v32 = vld [vmem:[#allocation16 + $0x3e8] sm:$0xff] }
 0x253   :  { %v2582_v43 = vpack.c.bf16 %v2094_v16, %v2086_v13  ;;  %3110 = vmatpush.bf16.msra.mxu2 %v2717_v49  ;;  %v2468_v18 = vcvt.s32.f32 %v1956_v62  ;;  %v2476_v39 = vcvt.s32.f32 %v1964_v28  ;;  %v1558_v0 = vunpack.c.2.s8 %v1414_v54  ;;  %v1454_v28 = vld [vmem:[#allocation16 + $0x170] sm:$0xff] }
 0x254   :  { %v1566_v60 = vunpack.c.3.s8 %v1414_v54  ;;  %v2678_v37 = vpack.c.bf16 %v2286_v5, %v2278_v47  ;;  %v2341_v7 = vcvt.s32.f32 %v1829_v27  ;;  %v2349_v34 = vcvt.s32.f32 %v1837_v22  ;;  %v1502_v22 = vld [vmem:[#allocation16 + $0x2f0] sm:$0xff] }
 0x255   :  { %3137 = vmatpush.bf16.msrb.mxu0 %v2582_v43  ;;  %v1750_v1 = vunpack.c.2.s8 %v1462_v36  ;;  %v2772_v50 = vpack.c.bf16 %v2476_v39, %v2468_v18  ;;  %v2070_v24 = vcvt.s32.f32 %v1558_v0  ;;  %v1758_v12 = vunpack.c.3.s8 %v1462_v36 }
 0x256   :  { %v2078_v63 = vcvt.s32.f32 %v1566_v60  ;;  %3146 = vmatpush.bf16.msrb.mxu1 %v2678_v37  ;;  %v2709_v19 = vpack.c.bf16 %v2349_v34, %v2341_v7  ;;  %v4771_v20 = vadd.f32 %v4756_v30, %v4752_v10  ;;  %v1940_v26 = vunpack.c.2.s8 %v4767_v2 }
 0x257   :  { %v2262_v9 = vcvt.s32.f32 %v1750_v1  ;;  %3072 = vmatpush.bf16.msrb.mxu3 %v2772_v50  ;;  %v2270_v44 = vcvt.s32.f32 %v1758_v12  ;;  %v1948_v48 = vunpack.c.3.s8 %v4767_v2  ;;  %v1813_v6 = vunpack.c.2.s8 %v1477_v55 }
 0x258   :  { %v2574_v61 = vpack.c.bf16 %v2078_v63, %v2070_v24  ;;  %3111 = vmatpush.bf16.msra.mxu2 %v2709_v19  ;;  %v2452_v29 = vcvt.s32.f32 %v1940_v26  ;;  %v1821_v58 = vunpack.c.3.s8 %v1477_v55  ;;  %v1542_v40 = vunpack.c.0.s8 %v1414_v54  ;;  %v2857_v26 = vpop.f32.mrf.mxu2 }
 0x259   :  { %v1550_v25 = vunpack.c.1.s8 %v1414_v54  ;;  %v2670_v3 = vpack.c.bf16 %v2270_v44, %v2262_v9  ;;  %v2460_v57 = vcvt.s32.f32 %v1948_v48  ;;  %v2325_v10 = vcvt.s32.f32 %v1813_v6 }
 0x25a   :  { %3138 = vmatpush.bf16.msrb.mxu0 %v2574_v61  ;;  %v1734_v30 = vunpack.c.0.s8 %v1462_v36  ;;  %v2333_v21 = vcvt.s32.f32 %v1821_v58  ;;  %v2054_v4 = vcvt.s32.f32 %v1542_v40  ;;  %v1742_v23 = vunpack.c.1.s8 %v1462_v36 }
 0x25b   :  { %v2062_v17 = vcvt.s32.f32 %v1550_v25  ;;  %3147 = vmatpush.bf16.msrb.mxu1 %v2670_v3  ;;  %v2764_v41 = vpack.c.bf16 %v2460_v57, %v2452_v29  ;;  %v1655_v8 = vunpack.c.2.s8 %v4775_v11  ;;  %v1663_v14 = vunpack.c.3.s8 %v4775_v11  ;;  %v4786_v3 = vld [vmem:[#allocation16 + $0xb8] sm:$0xff] }
 0x25c   :  { %v2246_v31 = vcvt.s32.f32 %v1734_v30  ;;  %v2701_v15 = vpack.c.bf16 %v2333_v21, %v2325_v10  ;;  %v2254_v16 = vcvt.s32.f32 %v1742_v23  ;;  %v1924_v59 = vunpack.c.0.s8 %v4767_v2  ;;  %v4789_v23 = vpop.f32.mrf.mxu1 }
 0x25d   :  { %v2566_v13 = vpack.c.bf16 %v2062_v17, %v2054_v4  ;;  %3073 = vmatpush.bf16.msrb.mxu3 %v2764_v41  ;;  %v2167_v54 = vcvt.s32.f32 %v1655_v8  ;;  %v2175_v49 = vcvt.s32.f32 %v1663_v14  ;;  %v1932_v47 = vunpack.c.1.s8 %v4767_v2 }
 0x25e   :  { %v1797_v62 = vunpack.c.0.s8 %v1477_v55  ;;  %3112 = vmatpush.bf16.msra.mxu2 %v2701_v15  ;;  %v2662_v36 = vpack.c.bf16 %v2254_v16, %v2246_v31  ;;  %v2436_v43 = vcvt.s32.f32 %v1924_v59  ;;  %v1805_v5 = vunpack.c.1.s8 %v1477_v55 }
 0x25f   :  { %3139 = vmatpush.bf16.msrb.mxu0 %v2566_v13  ;;  %v2037_v27 = vunpack.c.2.s8 %v1533_v32  ;;  %v2623_v18 = vpack.c.bf16 %v2175_v49, %v2167_v54  ;;  %v2444_v39 = vcvt.s32.f32 %v1932_v47  ;;  %v2045_v60 = vunpack.c.3.s8 %v1533_v32  ;;  %v1494_v54 = vld [vmem:[#allocation16 + $0x2b0] sm:$0xff] }
 0x260   :  { %v2309_v0 = vcvt.s32.f32 %v1797_v62  ;;  %3148 = vmatpush.bf16.msrb.mxu1 %v2662_v36  ;;  %v2317_v37 = vcvt.s32.f32 %v1805_v5  ;;  %v1718_v34 = vunpack.c.2.s8 %v1454_v28  ;;  %v1726_v1 = vunpack.c.3.s8 %v1454_v28 }
 0x261   :  { %v2549_v7 = vcvt.s32.f32 %v2037_v27  ;;  %v2756_v2 = vpack.c.bf16 %v2444_v39, %v2436_v43  ;;  %v2557_v50 = vcvt.s32.f32 %v2045_v60  ;;  %v1910_v24 = vunpack.c.2.s8 %v1502_v22 }
 0x262   :  { %v1918_v63 = vunpack.c.3.s8 %v1502_v22  ;;  %v2693_v12 = vpack.c.bf16 %v2317_v37, %v2309_v0  ;;  %3140 = vmatmul.bf16.vlgmr.msrb.gmra.mxu0 %v4622_v46  ;;  %v2230_v55 = vcvt.s32.f32 %v1718_v34  ;;  %v2238_v19 = vcvt.s32.f32 %v1726_v1 }
 0x263   :  { %3184 = vmatpush.bf16.msra.mxu0 %v2623_v18  ;;  %v1639_v9 = vunpack.c.0.s8 %v4775_v11  ;;  %3074 = vmatpush.bf16.msrb.mxu3 %v2756_v2  ;;  %v2813_v61 = vpack.c.bf16 %v2557_v50, %v2549_v7  ;;  %v2422_v44 = vcvt.s32.f32 %v1910_v24  ;;  %v1647_v6 = vunpack.c.1.s8 %v4775_v11  ;;  %v1525_v11 = vld [vmem:[#allocation16 + $0x3a8] sm:$0xff] }
 0x264   :  { %v2430_v48 = vcvt.s32.f32 %v1918_v63  ;;  %3113 = vmatpush.bf16.msra.mxu2 %v2693_v12  ;;  %v2654_v29 = vpack.c.bf16 %v2238_v19, %v2230_v55  ;;  %v2021_v40 = vunpack.c.0.s8 %v1533_v32  ;;  %v2029_v25 = vunpack.c.1.s8 %v1533_v32  ;;  %v1446_v32 = vld [vmem:[#allocation16 + $0x130] sm:$0xff]  ;;  %v2948_v26 = vpop.f32.mrf.mxu1 }
 0x265   :  { %v2151_v58 = vcvt.s32.f32 %v1639_v9  ;;  %v2159_v10 = vcvt.s32.f32 %v1647_v6  ;;  %v1702_v30 = vunpack.c.0.s8 %v1454_v28  ;;  %v1710_v51 = vunpack.c.1.s8 %v1454_v28  ;;  %v1423_v9 = vld [vmem:[#allocation16 + $0x78] sm:$0xff] }
 0x266   :  { %v2750_v57 = vpack.c.bf16 %v2430_v48, %v2422_v44  ;;  %3149 = vmatpush.bf16.msrb.mxu1 %v2654_v29  ;;  %3075 = vmatmul.bf16.vlgmr.msrb.gmra.mxu3 %v4741_v38  ;;  %v2533_v45 = vcvt.s32.f32 %v2021_v40  ;;  %v2541_v21 = vcvt.s32.f32 %v2029_v25  ;;  %v1894_v4 = vunpack.c.0.s8 %v1502_v22  ;;  %v1471_v25 = vld [vmem:[#allocation16 + $0x1f8] sm:$0xff] }
 0x267   :  { %3119 = vmatpush.bf16.msra.mxu3 %v2813_v61  ;;  %v1902_v17 = vunpack.c.1.s8 %v1502_v22  ;;  %v2615_v41 = vpack.c.bf16 %v2159_v10, %v2151_v58  ;;  %v2214_v31 = vcvt.s32.f32 %v1702_v30  ;;  %v2222_v8 = vcvt.s32.f32 %v1710_v51  ;;  %3114 = vmatmul.bf16.vlgmr.msra.gmra.mxu2 %v4703_v35  ;;  %v1517_v51 = vld [vmem:[#allocation16 + $0x368] sm:$0xff] }
 0x268   :  { %3158 = vmatpush.bf16.msrb.mxu2 %v2750_v57  ;;  %v1623_v14 = vunpack.c.2.s8 %v4786_v3  ;;  %v2805_v15 = vpack.c.bf16 %v2541_v21, %v2533_v45  ;;  %v2406_v13 = vcvt.s32.f32 %v1894_v4  ;;  %v1631_v59 = vunpack.c.3.s8 %v4786_v3 }
 0x269   :  { %v2414_v16 = vcvt.s32.f32 %v1902_v17  ;;  %3185 = vmatpush.bf16.msra.mxu0 %v2615_v41  ;;  %v2646_v49 = vpack.c.bf16 %v2222_v8, %v2214_v31  ;;  %v2005_v62 = vunpack.c.2.s8 %v1525_v11  ;;  %v2013_v28 = vunpack.c.3.s8 %v1525_v11 }
 0x26a   :  { %v2135_v47 = vcvt.s32.f32 %v1623_v14  ;;  %v2143_v43 = vcvt.s32.f32 %v1631_v59  ;;  %v1686_v5 = vunpack.c.2.s8 %v1446_v32  ;;  %v1694_v27 = vunpack.c.3.s8 %v1446_v32 }
 0x26b   :  { %3120 = vmatpush.bf16.msra.mxu3 %v2805_v15  ;;  %v2742_v36 = vpack.c.bf16 %v2414_v16, %v2406_v13  ;;  %3150 = vmatpush.bf16.msrb.mxu1 %v2646_v49  ;;  %v2517_v22 = vcvt.s32.f32 %v2005_v62  ;;  %v2525_v18 = vcvt.s32.f32 %v2013_v28  ;;  %v1878_v39 = vunpack.c.2.s8 %v1494_v54 }
 0x26c   :  { %v1886_v0 = vunpack.c.3.s8 %v1494_v54  ;;  %v2607_v60 = vpack.c.bf16 %v2143_v43, %v2135_v47  ;;  %v2198_v37 = vcvt.s32.f32 %v1686_v5  ;;  %v2206_v7 = vcvt.s32.f32 %v1694_v27  ;;  %v4802_v47 = vpop.f32.mrf.mxu0 }
 0x26d   :  { %3159 = vmatpush.bf16.msrb.mxu2 %v2742_v36  ;;  %v4796_v34 = vadd.f32 %v4763_v53, %v4758_v52  ;;  %v2797_v1 = vpack.c.bf16 %v2525_v18, %v2517_v22  ;;  %v2390_v2 = vcvt.s32.f32 %v1878_v39  ;;  %v1607_v24 = vunpack.c.0.s8 %v4786_v3  ;;  %v4800_v52 = vpop.f32.mrf.mxu2 }
 0x26e   :  { %v2398_v50 = vcvt.s32.f32 %v1886_v0  ;;  %3186 = vmatpush.bf16.msra.mxu0 %v2607_v60  ;;  %v2638_v63 = vpack.c.bf16 %v2206_v7, %v2198_v37  ;;  %v1615_v12 = vunpack.c.1.s8 %v4786_v3  ;;  %v1989_v55 = vunpack.c.0.s8 %v1525_v11 }
 0x26f   :  { %v1997_v19 = vunpack.c.1.s8 %v1525_v11  ;;  %3121 = vmatpush.bf16.msra.mxu3 %v2797_v1  ;;  %v2119_v44 = vcvt.s32.f32 %v1607_v24  ;;  %v1670_v48 = vunpack.c.0.s8 %v1446_v32  ;;  %v1678_v6 = vunpack.c.1.s8 %v1446_v32  ;;  %v1486_v11 = vld [vmem:[#allocation16 + $0x270] sm:$0xff] }
 0x270   :  { %v2734_v61 = vpack.c.bf16 %v2398_v50, %v2390_v2  ;;  %3151 = vmatpush.bf16.msrb.mxu1 %v2638_v63  ;;  %v2127_v53 = vcvt.s32.f32 %v1615_v12  ;;  %v2501_v29 = vcvt.s32.f32 %v1989_v55  ;;  %v1862_v40 = vunpack.c.0.s8 %v1494_v54  ;;  %v1415_v63 = vld [vmem:[#allocation16 + $0x38] sm:$0xff] }
 0x271   :  { %v2509_v58 = vcvt.s32.f32 %v1997_v19  ;;  %v2182_v57 = vcvt.s32.f32 %v1670_v48  ;;  %v2190_v3 = vcvt.s32.f32 %v1678_v6  ;;  %v1870_v10 = vunpack.c.1.s8 %v1494_v54 }
 0x272   :  { %3160 = vmatpush.bf16.msrb.mxu2 %v2734_v61  ;;  %v1591_v30 = vunpack.c.2.s8 %v1423_v9  ;;  %v2599_v45 = vpack.c.bf16 %v2127_v53, %v2119_v44  ;;  %v2374_v4 = vcvt.s32.f32 %v1862_v40  ;;  %v1599_v17 = vunpack.c.3.s8 %v1423_v9  ;;  %v1463_v61 = vld [vmem:[#allocation16 + $0x1b8] sm:$0xff]  ;;  %v1509_v53 = vld [vmem:[#allocation16 + $0x328] sm:$0xff] }
 0x273   :  { %v2789_v21 = vpack.c.bf16 %v2509_v58, %v2501_v29  ;;  %v2630_v41 = vpack.c.bf16 %v2190_v3, %v2182_v57  ;;  %v2382_v31 = vcvt.s32.f32 %v1870_v10  ;;  %v1783_v14 = vunpack.c.2.s8 %v1471_v25  ;;  %v4805_v29 = vpop.f32.mrf.mxu3 }
 0x274   :  { %v2103_v8 = vcvt.s32.f32 %v1591_v30  ;;  %3187 = vmatpush.bf16.msra.mxu0 %v2599_v45  ;;  %v2111_v32 = vcvt.s32.f32 %v1599_v17  ;;  %v1791_v15 = vunpack.c.3.s8 %v1471_v25  ;;  %v1973_v13 = vunpack.c.2.s8 %v1517_v51 }
 0x275   :  { %3122 = vmatpush.bf16.msra.mxu3 %v2789_v21  ;;  %3152 = vmatpush.bf16.msrb.mxu1 %v2630_v41  ;;  %v2726_v16 = vpack.c.bf16 %v2382_v31, %v2374_v4  ;;  %v2295_v59 = vcvt.s32.f32 %v1783_v14  ;;  %v1981_v54 = vunpack.c.3.s8 %v1517_v51  ;;  %v1846_v49 = vunpack.c.2.s8 %v1486_v11  ;;  %v2909_v39 = vpop.f32.mrf.mxu2  ;;  %v2987_v21 = vpop.f32.mrf.mxu0 }
 0x276   :  { %v2591_v62 = vpack.c.bf16 %v2111_v32, %v2103_v8  ;;  %v2303_v28 = vcvt.s32.f32 %v1791_v15  ;;  %v2485_v36 = vcvt.s32.f32 %v1973_v13  ;;  %v1854_v43 = vunpack.c.3.s8 %v1486_v11 }
 0x277   :  { %3161 = vmatpush.bf16.msrb.mxu2 %v2726_v16  ;;  %v2493_v5 = vcvt.s32.f32 %v1981_v54  ;;  %v2358_v27 = vcvt.s32.f32 %v1846_v49  ;;  %v1575_v22 = vunpack.c.0.s8 %v1423_v9  ;;  %v1583_v18 = vunpack.c.1.s8 %v1423_v9 }
 0x278   :  { %3188 = vmatpush.bf16.msra.mxu0 %v2591_v62  ;;  %v2687_v0 = vpack.c.bf16 %v2303_v28, %v2295_v59  ;;  %3153 = vmatmul.bf16.vlgmr.msrb.gmra.mxu1 %v4678_v42  ;;  %v2366_v60 = vcvt.s32.f32 %v1854_v43  ;;  %v1767_v37 = vunpack.c.0.s8 %v1471_v25  ;;  %v1775_v7 = vunpack.c.1.s8 %v1471_v25 }
 0x279   :  { %v2781_v1 = vpack.c.bf16 %v2493_v5, %v2485_v36  ;;  %v2087_v2 = vcvt.s32.f32 %v1575_v22  ;;  %v2095_v50 = vcvt.s32.f32 %v1583_v18  ;;  %v1957_v24 = vunpack.c.0.s8 %v1517_v51 }
 0x27a   :  { %3197 = vmatpush.bf16.msra.mxu1 %v2687_v0  ;;  %v2718_v12 = vpack.c.bf16 %v2366_v60, %v2358_v27  ;;  %v2279_v55 = vcvt.s32.f32 %v1767_v37  ;;  %v2287_v19 = vcvt.s32.f32 %v1775_v7  ;;  %v1965_v26 = vunpack.c.1.s8 %v1517_v51  ;;  %v1478_v51 = vld [vmem:[#allocation16 + $0x230] sm:$0xff] }
 0x27b   :  { %3123 = vmatpush.bf16.msra.mxu3 %v2781_v1  ;;  %v2583_v9 = vpack.c.bf16 %v2095_v50, %v2087_v2  ;;  %v2469_v44 = vcvt.s32.f32 %v1957_v24  ;;  %v1830_v48 = vunpack.c.0.s8 %v1486_v11  ;;  %v1838_v6 = vunpack.c.1.s8 %v1486_v11  ;;  %v1534_v60 = vld [vmem:[#allocation16 + $0x3f0] sm:$0xff]  ;;  %v2870_v37 = vpop.f32.mrf.mxu3  ;;  %v1455_v24 = vld [vmem:[#allocation16 + $0x178] sm:$0xff] }
 0x27c   :  { %3162 = vmatpush.bf16.msrb.mxu2 %v2718_v12  ;;  %v2679_v58 = vpack.c.bf16 %v2287_v19, %v2279_v55  ;;  %v2477_v40 = vcvt.s32.f32 %v1965_v26  ;;  %v1559_v25 = vunpack.c.2.s8 %v1415_v63  ;;  %v1567_v57 = vunpack.c.3.s8 %v1415_v63 }
 0x27d   :  { %3189 = vmatpush.bf16.msra.mxu0 %v2583_v9  ;;  %v2342_v3 = vcvt.s32.f32 %v1830_v48  ;;  %v2350_v10 = vcvt.s32.f32 %v1838_v6  ;;  %v1751_v30 = vunpack.c.2.s8 %v1463_v61  ;;  %v1759_v45 = vunpack.c.3.s8 %v1463_v61  ;;  %v4807_v28 = vpop.f32.mrf.mxu2  ;;  %v1503_v6 = vld [vmem:[#allocation16 + $0x2f8] sm:$0xff] }
 0x27e   :  { %3198 = vmatpush.bf16.msra.mxu1 %v2679_v58  ;;  %v2773_v4 = vpack.c.bf16 %v2477_v40, %v2469_v44  ;;  %v2071_v17 = vcvt.s32.f32 %v1559_v25  ;;  %v2079_v41 = vcvt.s32.f32 %v1567_v57  ;;  %v1941_v11 = vunpack.c.2.s8 %v1509_v53  ;;  %v4809_v57 = vpop.f32.mrf.mxu1 }
 0x27f   :  { %v2710_v31 = vpack.c.bf16 %v2350_v10, %v2342_v3  ;;  %v2263_v8 = vcvt.s32.f32 %v1751_v30  ;;  %v2271_v14 = vcvt.s32.f32 %v1759_v45  ;;  %v1949_v32 = vunpack.c.3.s8 %v1509_v53 }
 0x280   :  { %3124 = vmatpush.bf16.msra.mxu3 %v2773_v4  ;;  %v2575_v15 = vpack.c.bf16 %v2079_v41, %v2071_v17  ;;  %v2453_v13 = vcvt.s32.f32 %v1941_v11  ;;  %v1814_v16 = vunpack.c.2.s8 %v1478_v51  ;;  %v1822_v59 = vunpack.c.3.s8 %v1478_v51 }
 0x281   :  { %3163 = vmatpush.bf16.msrb.mxu2 %v2710_v31  ;;  %v2671_v54 = vpack.c.bf16 %v2271_v14, %v2263_v8  ;;  %v2461_v49 = vcvt.s32.f32 %v1949_v32  ;;  %v1543_v62 = vunpack.c.0.s8 %v1415_v63  ;;  %v1551_v5 = vunpack.c.1.s8 %v1415_v63 }
 0x282   :  { %3190 = vmatpush.bf16.msra.mxu0 %v2575_v15  ;;  %v2326_v36 = vcvt.s32.f32 %v1814_v16  ;;  %v2334_v43 = vcvt.s32.f32 %v1822_v59  ;;  %v1735_v27 = vunpack.c.0.s8 %v1463_v61  ;;  %v1743_v39 = vunpack.c.1.s8 %v1463_v61  ;;  %v1526_v16 = vld [vmem:[#allocation16 + $0x3b0] sm:$0xff] }
 0x283   :  { %3199 = vmatpush.bf16.msra.mxu1 %v2671_v54  ;;  %v2765_v22 = vpack.c.bf16 %v2461_v49, %v2453_v13  ;;  %v2055_v18 = vcvt.s32.f32 %v1543_v62  ;;  %v1925_v0 = vunpack.c.0.s8 %v1509_v53  ;;  %v2063_v1 = vcvt.s32.f32 %v1551_v5 }
 0x284   :  { %v2702_v7 = vpack.c.bf16 %v2334_v43, %v2326_v36  ;;  %v2247_v2 = vcvt.s32.f32 %v1735_v27  ;;  %v1933_v50 = vunpack.c.1.s8 %v1509_v53  ;;  %v2255_v12 = vcvt.s32.f32 %v1743_v39  ;;  %v1447_v36 = vld [vmem:[#allocation16 + $0x138] sm:$0xff] }
 0x285   :  { %3125 = vmatpush.bf16.msra.mxu3 %v2765_v22  ;;  %v2437_v55 = vcvt.s32.f32 %v1925_v0  ;;  %v1798_v19 = vunpack.c.0.s8 %v1478_v51  ;;  %v1806_v26 = vunpack.c.1.s8 %v1478_v51  ;;  %v2567_v63 = vpack.c.bf16 %v2063_v1, %v2055_v18  ;;  %v2961_v17 = vpop.f32.mrf.mxu2  ;;  %v1495_v27 = vld [vmem:[#allocation16 + $0x2b8] sm:$0xff]  ;;  %v4817_v22 = vpop.f32.mrf.mxu3 }
 0x286   :  { %3164 = vmatpush.bf16.msrb.mxu2 %v2702_v7  ;;  %v2445_v9 = vcvt.s32.f32 %v1933_v50  ;;  %v2038_v44 = vunpack.c.2.s8 %v1534_v60  ;;  %v2046_v48 = vunpack.c.3.s8 %v1534_v60  ;;  %v2663_v61 = vpack.c.bf16 %v2255_v12, %v2247_v2  ;;  %v3000_v2 = vpop.f32.mrf.mxu1 }
 0x287   :  { %v2310_v58 = vcvt.s32.f32 %v1798_v19  ;;  %v2318_v40 = vcvt.s32.f32 %v1806_v26  ;;  %v1719_v25 = vunpack.c.2.s8 %v1455_v24  ;;  %3191 = vmatpush.bf16.msra.mxu0 %v2567_v63  ;;  %v1727_v30 = vunpack.c.3.s8 %v1455_v24 }
 0x288   :  { %v2757_v53 = vpack.c.bf16 %v2445_v9, %v2437_v55  ;;  %v2550_v3 = vcvt.s32.f32 %v2038_v44  ;;  %v2558_v10 = vcvt.s32.f32 %v2046_v48  ;;  %3200 = vmatpush.bf16.msra.mxu1 %v2663_v61  ;;  %v1911_v21 = vunpack.c.2.s8 %v1503_v6 }
 0x289   :  { %v2694_v45 = vpack.c.bf16 %v2318_v40, %v2310_v58  ;;  %v2231_v51 = vcvt.s32.f32 %v1719_v25  ;;  %v1919_v4 = vunpack.c.3.s8 %v1503_v6  ;;  %v4813_v41 = vadd.f32 %v4777_v56, %v4771_v20 }
 0x28a   :  { %3126 = vmatpush.bf16.msra.mxu3 %v2757_v53  ;;  %v2814_v11 = vpack.c.bf16 %v2558_v10, %v2550_v3  ;;  %v2239_v31 = vcvt.s32.f32 %v1727_v30  ;;  %v2022_v8 = vunpack.c.0.s8 %v1534_v60  ;;  %3192 = vmatmul.bf16.vlgmr.msra.gmra.mxu0 %v4622_v46  ;;  %v2423_v14 = vcvt.s32.f32 %v1911_v21  ;;  %v4823_v3 = vld [vmem:[%s4920_s9] sm:$0xff]  ;;  %s3928_s9 = smov [#allocation19]  }
 0x28b   :  { %3165 = vmatpush.bf16.msrb.mxu2 %v2694_v45  ;;  %v2431_v32 = vcvt.s32.f32 %v1919_v4  ;;  %v2030_v15 = vunpack.c.1.s8 %v1534_v60  ;;  %v1703_v13 = vunpack.c.0.s8 %v1455_v24  ;;  %v1711_v49 = vunpack.c.1.s8 %v1455_v24  ;;  %v4825_v21 = vld [vmem:[#allocation17] sm:$0xff]  ;;  %v1518_v4 = vld [vmem:[#allocation16 + $0x370] sm:$0xff]  ;;  %s3461_s30 = sshll.u32 %s3928_s9, 4  ;;  %s3462_s30 = int_to_ptr.vmem [resolvable:$true] %s3461_s30 }
 0x28c   :  { %v2655_v59 = vpack.c.bf16 %v2239_v31, %v2231_v51  ;;  %v2534_v54 = vcvt.s32.f32 %v2022_v8  ;;  %v1895_v62 = vunpack.c.0.s8 %v1503_v6  ;;  %v1903_v5 = vunpack.c.1.s8 %v1503_v6 }
 0x28d   :  { %v2751_v20 = vpack.c.bf16 %v2431_v32, %v2423_v14  ;;  %3127 = vmatmul.bf16.vlgmr.msra.gmra.mxu3 %v4741_v38  ;;  %v2542_v56 = vcvt.s32.f32 %v2030_v15  ;;  %v2215_v43 = vcvt.s32.f32 %v1703_v13  ;;  %v2223_v46 = vcvt.s32.f32 %v1711_v49  ;;  %v1487_v32 = vld [vmem:[#allocation16 + $0x278] sm:$0xff]  ;;  %v2922_v15 = vpop.f32.mrf.mxu3 }
 0x28e   :  { %3171 = vmatpush.bf16.msrb.mxu3 %v2814_v11  ;;  %3201 = vmatpush.bf16.msra.mxu1 %v2655_v59  ;;  %v2407_v18 = vcvt.s32.f32 %v1895_v62  ;;  %v2006_v39 = vunpack.c.2.s8 %v1526_v16  ;;  %v2014_v0 = vunpack.c.3.s8 %v1526_v16  ;;  %v2415_v37 = vcvt.s32.f32 %v1903_v5 }
 0x28f   :  { %3166 = vmatmul.bf16.vlgmr.msrb.gmra.mxu2 %v4703_v35  ;;  %v2806_v60 = vpack.c.bf16 %v2542_v56, %v2534_v54  ;;  %v1687_v7 = vunpack.c.2.s8 %v1447_v36  ;;  %v1695_v1 = vunpack.c.3.s8 %v1447_v36  ;;  %v2647_v50 = vpack.c.bf16 %v2223_v46, %v2215_v43  ;;  %v4827_v17 = vpop.f32.mrf.mxu0 }
 0x290   :  { %3210 = vmatpush.bf16.msra.mxu2 %v2751_v20  ;;  %v2518_v24 = vcvt.s32.f32 %v2006_v39  ;;  %v2526_v12 = vcvt.s32.f32 %v2014_v0  ;;  %v1879_v55 = vunpack.c.2.s8 %v1495_v27  ;;  %v2743_v19 = vpack.c.bf16 %v2415_v37, %v2407_v18  ;;  %v1510_v18 = vld [vmem:[#allocation16 + $0x330] sm:$0xff] }
 0x291   :  { %v2199_v26 = vcvt.s32.f32 %v1687_v7  ;;  %v2207_v63 = vcvt.s32.f32 %v1695_v1  ;;  %v1887_v9 = vunpack.c.3.s8 %v1495_v27  ;;  %v1990_v6 = vunpack.c.0.s8 %v1526_v16 }
 0x292   :  { %3172 = vmatpush.bf16.msrb.mxu3 %v2806_v60  ;;  %3202 = vmatpush.bf16.msra.mxu1 %v2647_v50  ;;  %v2798_v44 = vpack.c.bf16 %v2526_v12, %v2518_v24  ;;  %v2391_v48 = vcvt.s32.f32 %v1879_v55  ;;  %v1998_v61 = vunpack.c.1.s8 %v1526_v16  ;;  %v1671_v25 = vunpack.c.0.s8 %v1447_v36  ;;  %v1479_v24 = vld [vmem:[#allocation16 + $0x238] sm:$0xff] }
 0x293   :  { %v2639_v58 = vpack.c.bf16 %v2207_v63, %v2199_v26  ;;  %v2399_v40 = vcvt.s32.f32 %v1887_v9  ;;  %v1679_v53 = vunpack.c.1.s8 %v1447_v36  ;;  %v2502_v10 = vcvt.s32.f32 %v1990_v6 }
 0x294   :  { %3211 = vmatpush.bf16.msra.mxu2 %v2743_v19  ;;  %v2510_v30 = vcvt.s32.f32 %v1998_v61  ;;  %v1863_v45 = vunpack.c.0.s8 %v1495_v27  ;;  %v1871_v51 = vunpack.c.1.s8 %v1495_v27  ;;  %v2183_v31 = vcvt.s32.f32 %v1671_v25 }
 0x295   :  { %v2735_v11 = vpack.c.bf16 %v2399_v40, %v2391_v48  ;;  %v2191_v8 = vcvt.s32.f32 %v1679_v53  ;;  %v2869_v14 = vadd.f32 %v4805_v29, %v4813_v41  ;;  %v3238_v54 = vperm.slane %v4823_v3, 0 }
 0x296   :  { %3173 = vmatpush.bf16.msrb.mxu3 %v2798_v44  ;;  %3203 = vmatpush.bf16.msra.mxu1 %v2639_v58  ;;  %v2790_v13 = vpack.c.bf16 %v2510_v30, %v2502_v10  ;;  %v2375_v16 = vcvt.s32.f32 %v1863_v45  ;;  %v2383_v59 = vcvt.s32.f32 %v1871_v51  ;;  %v3264_v62 = vperm.slane %v4825_v21, 0  ;;  %v1535_v10 = vld [vmem:[#allocation16 + $0x3f8] sm:$0xff] }
 0x297   :  { %v2631_v49 = vpack.c.bf16 %v2191_v8, %v2183_v31  ;;  %v1974_v36 = vunpack.c.2.s8 %v1518_v4  ;;  %v1982_v20 = vunpack.c.3.s8 %v1518_v4  ;;  %v3254_v43 = vmul.f32 %v3238_v54, %v2869_v14  ;;  %v3039_v63 = vpop.f32.mrf.mxu0 }
 0x298   :  { %3212 = vmatpush.bf16.msra.mxu2 %v2735_v11  ;;  %v2727_v56 = vpack.c.bf16 %v2383_v59, %v2375_v16  ;;  %v1847_v5 = vunpack.c.2.s8 %v1487_v32  ;;  %v1855_v27 = vunpack.c.3.s8 %v1487_v32  ;;  %v1958_v46 = vunpack.c.0.s8 %v1518_v4  ;;  %v4836_v61 = vpop.f32.mrf.mxu3 }
 0x299   :  { %v2486_v29 = vcvt.s32.f32 %v1974_v36  ;;  %v2494_v41 = vcvt.s32.f32 %v1982_v20  ;;  %v3280_v39 = vadd.f32 %v3264_v62, %v3254_v43  ;;  %v1966_v37 = vunpack.c.1.s8 %v1518_v4  ;;  %v1527_v20 = vld [vmem:[#allocation16 + $0x3b8] sm:$0xff] }
 0x29a   :  { %3174 = vmatpush.bf16.msrb.mxu3 %v2790_v13  ;;  %3204 = vmatpush.bf16.msra.mxu1 %v2631_v49  ;;  %v2359_v0 = vcvt.s32.f32 %v1847_v5  ;;  %v2367_v60 = vcvt.s32.f32 %v1855_v27  ;;  %v2470_v1 = vcvt.s32.f32 %v1958_v46  ;;  %v1831_v2 = vunpack.c.0.s8 %v1487_v32  ;;  %v4838_v58 = vpop.f32.mrf.mxu2 }
 0x29b   :  { %v2782_v7 = vpack.c.bf16 %v2494_v41, %v2486_v29  ;;  %v1839_v50 = vunpack.c.1.s8 %v1487_v32  ;;  %3288 = vst [vmem:[#allocation19] sm:$0xff] %v3280_v39  ;;  %v3530_v12 = vmul.f32 -1.442695, %v3280_v39  ;;  %v2478_v19 = vcvt.s32.f32 %v1966_v37 }
 0x29c   :  { %3213 = vmatpush.bf16.msra.mxu2 %v2727_v56  ;;  %v2719_v55 = vpack.c.bf16 %v2367_v60, %v2359_v0  ;;  %v1942_v26 = vunpack.c.2.s8 %v1510_v18  ;;  %v2908_v9 = vadd.f32 %v4800_v52, %v4796_v34  ;;  %v2343_v44 = vcvt.s32.f32 %v1831_v2 }
 0x29d   :  { %3205 = vmatmul.bf16.vlgmr.msra.gmra.mxu1 %v4678_v42  ;;  %v2351_v48 = vcvt.s32.f32 %v1839_v50  ;;  %v1950_v6 = vunpack.c.3.s8 %v1510_v18  ;;  %3575 = vpow2.f32 %v3530_v12  ;;  %v2774_v40 = vpack.c.bf16 %v2478_v19, %v2470_v1 }
 0x29e   :  { %3175 = vmatpush.bf16.msrb.mxu3 %v2782_v7  ;;  %v2454_v25 = vcvt.s32.f32 %v1942_v26  ;;  %v1815_v53 = vunpack.c.2.s8 %v1479_v24  ;;  %v1823_v51 = vunpack.c.3.s8 %v1479_v24  ;;  %v1926_v34 = vunpack.c.0.s8 %v1510_v18 }
 0x29f   :  { %v2711_v30 = vpack.c.bf16 %v2351_v48, %v2343_v44  ;;  %v2462_v45 = vcvt.s32.f32 %v1950_v6  ;;  %v1934_v4 = vunpack.c.1.s8 %v1510_v18  ;;  %v1799_v42 = vunpack.c.0.s8 %v1479_v24  ;;  %v1519_v44 = vld [vmem:[#allocation16 + $0x378] sm:$0xff] }
 0x2a0   :  { %3214 = vmatpush.bf16.msra.mxu2 %v2719_v55  ;;  %v2327_v52 = vcvt.s32.f32 %v1815_v53  ;;  %v1807_v11 = vunpack.c.1.s8 %v1479_v24  ;;  %v2335_v8 = vcvt.s32.f32 %v1823_v51  ;;  %v2438_v14 = vcvt.s32.f32 %v1926_v34  ;;  %v2974_v0 = vpop.f32.mrf.mxu3 }
 0x2a1   :  { %v2766_v31 = vpack.c.bf16 %v2462_v45, %v2454_v25  ;;  %v2039_v32 = vunpack.c.2.s8 %v1535_v10  ;;  %v2446_v15 = vcvt.s32.f32 %v1934_v4  ;;  %v2311_v13 = vcvt.s32.f32 %v1799_v42 }
 0x2a2   :  { %3176 = vmatpush.bf16.msrb.mxu3 %v2774_v40  ;;  %v2319_v16 = vcvt.s32.f32 %v1807_v11  ;;  %v2047_v59 = vunpack.c.3.s8 %v1535_v10  ;;  %v2703_v54 = vpack.c.bf16 %v2335_v8, %v2327_v52  ;;  %v2921_v62 = vadd.f32 %v4817_v22, %v2908_v9  ;;  %v3013_v1 = vpop.f32.mrf.mxu2  ;;  %v1511_v8 = vld [vmem:[#allocation16 + $0x338] sm:$0xff] }
 0x2a3   :  { %v2551_v49 = vcvt.s32.f32 %v2039_v32  ;;  %v3239_v36 = vperm.slane %v4823_v3, 1  ;;  %v3576_v56 = vpop.eup %3575  ;;  %v2758_v43 = vpack.c.bf16 %v2446_v15, %v2438_v14  ;;  %v3265_v27 = vperm.slane %v4825_v21, 1 }
 0x2a4   :  { %3215 = vmatpush.bf16.msra.mxu2 %v2711_v30  ;;  %v2559_v5 = vcvt.s32.f32 %v2047_v59  ;;  %v4843_v29 = vadd.f32 1.0, %v3576_v56  ;;  %v2023_v46 = vunpack.c.0.s8 %v1535_v10  ;;  %v2031_v18 = vunpack.c.1.s8 %v1535_v10 }
 0x2a5   :  { %v3255_v41 = vmul.f32 %v3239_v36, %v2921_v62  ;;  %v3050_v39 = vpop.f32.mrf.mxu1  ;;  %v2947_v60 = vadd.f32 %v4789_v23, %v4765_v33  ;;  %v2007_v37 = vunpack.c.2.s8 %v1527_v20  ;;  %v2015_v7 = vunpack.c.3.s8 %v1527_v20 }
 0x2a6   :  { %3177 = vmatpush.bf16.msrb.mxu3 %v2766_v31  ;;  %v2815_v22 = vpack.c.bf16 %v2559_v5, %v2551_v49  ;;  %v2695_v2 = vpack.c.bf16 %v2319_v16, %v2311_v13  ;;  %v2535_v24 = vcvt.s32.f32 %v2023_v46  ;;  %v2543_v12 = vcvt.s32.f32 %v2031_v18 }
 0x2a7   :  { %v3281_v50 = vadd.f32 %v3265_v27, %v3255_v41  ;;  %3577 = vrcp.f32 %v4843_v29  ;;  %v2960_v55 = vadd.f32 %v4807_v28, %v2947_v60  ;;  %v2519_v26 = vcvt.s32.f32 %v2007_v37 }
 0x2a8   :  { %3216 = vmatpush.bf16.msra.mxu2 %v2703_v54  ;;  %v2527_v63 = vcvt.s32.f32 %v2015_v7  ;;  %v1991_v9 = vunpack.c.0.s8 %v1527_v20  ;;  %v2807_v33 = vpack.c.bf16 %v2543_v12, %v2535_v24  ;;  %v1999_v23 = vunpack.c.1.s8 %v1527_v20 }
 0x2a9   :  { %3289 = vst [vmem:[#allocation19 + $0x8] sm:$0xff] %v3281_v50  ;;  %v3531_v19 = vmul.f32 -1.442695, %v3281_v50  ;;  %v2973_v48 = vadd.f32 %v4836_v61, %v2960_v55  ;;  %v3240_v6 = vperm.slane %v4823_v3, 2  ;;  %v3266_v40 = vperm.slane %v4825_v21, 2 }
 0x2aa   :  { %3178 = vmatpush.bf16.msrb.mxu3 %v2758_v43  ;;  %v2503_v25 = vcvt.s32.f32 %v1991_v9  ;;  %v1975_v53 = vunpack.c.2.s8 %v1519_v44  ;;  %v1983_v10 = vunpack.c.3.s8 %v1519_v44  ;;  %v2799_v51 = vpack.c.bf16 %v2527_v63, %v2519_v26 }
 0x2ab   :  { %3579 = vpow2.f32 %v3531_v19  ;;  %v3256_v28 = vmul.f32 %v3240_v6, %v2973_v48  ;;  %v2511_v61 = vcvt.s32.f32 %v1999_v23  ;;  %v4857_v52 = vadd.f32 %v3050_v39, %v4827_v17 }
 0x2ac   :  { %3217 = vmatpush.bf16.msra.mxu2 %v2695_v2  ;;  %v2487_v11 = vcvt.s32.f32 %v1975_v53  ;;  %v2495_v31 = vcvt.s32.f32 %v1983_v10  ;;  %v1959_v15 = vunpack.c.0.s8 %v1519_v44  ;;  %v1943_v13 = vunpack.c.2.s8 %v1511_v8 }
 0x2ad   :  { %3179 = vmatmul.bf16.vlgmr.msrb.gmra.mxu3 %v4741_v38  ;;  %v3052_v30 = vpop.f32.mrf.mxu1  ;;  %v4853_v45 = vpop.eup %3577  ;;  %v3282_v34 = vadd.f32 %v3266_v40, %v3256_v28  ;;  %v2791_v32 = vpack.c.bf16 %v2511_v61, %v2503_v25  ;;  %v1951_v16 = vunpack.c.3.s8 %v1511_v8  ;;  %v1927_v43 = vunpack.c.0.s8 %v1511_v8 }
 0x2ae   :  { %3223 = vmatpush.bf16.msra.mxu3 %v2815_v22  ;;  %v3329_v42 = vmul.f32 %v4853_v45, %v4843_v29  ;;  %v2783_v17 = vpack.c.bf16 %v2495_v31, %v2487_v11  ;;  %v2471_v49 = vcvt.s32.f32 %v1959_v15  ;;  %v2455_v20 = vcvt.s32.f32 %v1943_v13 }
 0x2af   :  { %3218 = vmatmul.bf16.vlgmr.msra.gmra.mxu2 %v4703_v35  ;;  %3290 = vst [vmem:[#allocation19 + $0x10] sm:$0xff] %v3282_v34  ;;  %v1967_v35 = vunpack.c.1.s8 %v1519_v44  ;;  %v3532_v54 = vmul.f32 -1.442695, %v3282_v34  ;;  %v2463_v56 = vcvt.s32.f32 %v1951_v16  ;;  %v1935_v46 = vunpack.c.1.s8 %v1511_v8 }
 0x2b0   :  { %v3330_v59 = vsub.f32 1.0, %v3329_v42  ;;  %v2999_v39 = vadd.f32 %v4809_v57, %v4802_v47  ;;  %v2439_v22 = vcvt.s32.f32 %v1927_v43  ;;  %vm3334_vm14 = vweird.f32 %v4853_v45 }
 0x2b1   :  { %v3580_v4 = vpop.eup %3579  ;;  %v2479_v62 = vcvt.s32.f32 %v1967_v35  ;;  %v2767_v0 = vpack.c.bf16 %v2463_v56, %v2455_v20  ;;  %v2447_v7 = vcvt.s32.f32 %v1935_v46  ;;  %vm3333_vm15 = vweird.f32 %v4843_v29 }
 0x2b2   :  { %3224 = vmatpush.bf16.msra.mxu3 %v2807_v33  ;;  %v3321_v14 = vadd.f32 1.0, %v3580_v4  ;;  %v3331_v5 = vmul.f32 %v4853_v45, %v3330_v59  ;;  %v3339_v1 = vand.u32 2147483648, %v4843_v29  ;;  %v3337_v24 = vand.u32 2147483647, %v4843_v29  ;;  %vm4873_vm1 = vmor %vm3333_vm15, %vm3334_vm14 }
 0x2b3   :  { %v2775_v41 = vpack.c.bf16 %v2479_v62, %v2471_v49  ;;  %v3012_v55 = vadd.f32 %v4838_v58, %v2999_v39  ;;  %v3241_v19 = vperm.slane %v4823_v3, 3  ;;  %v3267_v9 = vperm.slane %v4825_v21, 3 }
 0x2b4   :  { %3581 = vrcp.f32 %v3321_v14  ;;  %v3332_v37 = vadd.f32 %v4853_v45, %v3331_v5  ;;  %v3354_v2 = vand.u32 2147483648, %v3321_v14  ;;  %v3352_v47 = vand.u32 2147483647, %v3321_v14 }
 0x2b5   :  { %3583 = vpow2.f32 %v3532_v54  ;;  %vm3348_vm2 = vweird.f32 %v3321_v14  ;;  %v2759_v23 = vpack.c.bf16 %v2447_v7, %v2439_v22  ;;  %v3340_v48 = vor.u32 1.1754944e-38, %v3339_v1 }
 0x2b6   :  { %3225 = vmatpush.bf16.msra.mxu3 %v2799_v51  ;;  %v3336_v33 = vsel %vm4873_vm1, %v4853_v45, %v3332_v37  ;;  %v3355_v58 = vor.u32 1.1754944e-38, %v3354_v2  ;;  %vm3338_vm4 = vcmp.eq.f32.partialorder %v3337_v24, 8.507059e+37  ;;  %vm3353_vm5 = vcmp.eq.f32.partialorder %v3352_v47, 8.507059e+37 }
 0x2b7   :  { %v4861_v36 = vpop.f32.mrf.mxu0  ;;  %v3341_v53 = vsel %vm3338_vm4, %v3340_v48, %v3336_v33  ;;  %v3242_v22 = vperm.slane %v4823_v3, 4  ;;  %v3268_v1 = vperm.slane %v4825_v21, 4  ;;  %v3243_v33 = vperm.slane %v4823_v3, 5 }
 0x2b8   :  { %v3269_v48 = vperm.slane %v4825_v21, 5 }
 0x2ba   :  { %3226 = vmatpush.bf16.msra.mxu3 %v2791_v32  ;;  %v3582_v27 = vpop.eup %3581 }
 0x2bb   :  { %v3344_v18 = vmul.f32 %v3582_v27, %v3321_v14  ;;  %vm3349_vm0 = vweird.f32 %v3582_v27  ;;  %v3584_v57 = vpop.eup %3583 }
 0x2bc   :  { %vm3350_vm3 = vmor %vm3348_vm2, %vm3349_vm0  ;;  %v3322_v6 = vadd.f32 1.0, %v3584_v57 }
 0x2bd   :  { %v3345_v60 = vsub.f32 1.0, %v3344_v18 }
 0x2be   :  { %3227 = vmatpush.bf16.msra.mxu3 %v2783_v17  ;;  %3585 = vrcp.f32 %v3322_v6  ;;  %vm3363_vm7 = vweird.f32 %v3322_v6  ;;  %v3369_v17 = vand.u32 2147483648, %v3322_v6  ;;  %v3367_v54 = vand.u32 2147483647, %v3322_v6 }
 0x2bf   :  { %v3091_v50 = vpop.f32.mrf.mxu0  ;;  %v3346_v12 = vmul.f32 %v3582_v27, %v3345_v60 }
 0x2c0   :  { %v3024_v63 = vpop.f32.mrf.mxu3  ;;  %v3370_v5 = vor.u32 1.1754944e-38, %v3369_v17  ;;  %vm3368_vm12 = vcmp.eq.f32.partialorder %v3367_v54, 8.507059e+37 }
 0x2c1   :  { %v3347_v29 = vadd.f32 %v3582_v27, %v3346_v12  ;;  %v3025_v44 = vadd.f32 %v3024_v63, %v3012_v55 }
 0x2c2   :  { %3228 = vmatpush.bf16.msra.mxu3 %v2775_v41  ;;  %v3063_v40 = vpop.f32.mrf.mxu2 }
 0x2c3   :  { %v3351_v28 = vsel %vm3350_vm3, %v3582_v27, %v3347_v29  ;;  %v3257_v25 = vmul.f32 %v3241_v19, %v3025_v44  ;;  %v3064_v60 = vadd.f32 %v3063_v40, %v4857_v52 }
 0x2c4   :  { %v3356_v10 = vsel %vm3353_vm5, %v3355_v58, %v3351_v28  ;;  %v3586_v4 = vpop.eup %3585 }
 0x2c5   :  { %v3448_v30 = vpack.c.bf16 %v3356_v10, %v3341_v53  ;;  %v3283_v45 = vadd.f32 %v3267_v9, %v3257_v25  ;;  %v3359_v31 = vmul.f32 %v3586_v4, %v3322_v6  ;;  %vm3364_vm6 = vweird.f32 %v3586_v4 }
 0x2c6   :  { %3229 = vmatpush.bf16.msra.mxu3 %v2767_v0  ;;  %vm3365_vm9 = vmor %vm3363_vm7, %vm3364_vm6 }
 0x2c7   :  { %3452 = vst [vmem:[#allocation20] sm:$0xff] %v3448_v30  ;;  %v3533_v51 = vmul.f32 -1.442695, %v3283_v45  ;;  %v3360_v14 = vsub.f32 1.0, %v3359_v31 }
 0x2c8   :  { %3291 = vst [vmem:[#allocation19 + $0x18] sm:$0xff] %v3283_v45  ;;  %v3026_v61 = vpop.f32.mrf.mxu3 }
 0x2c9   :  { %3587 = vpow2.f32 %v3533_v51  ;;  %v3361_v15 = vmul.f32 %v3586_v4, %v3360_v14 }
 0x2ca   :  { %3230 = vmatpush.bf16.msra.mxu3 %v2759_v23  ;;  %v3065_v34 = vpop.f32.mrf.mxu2 }
 0x2cb   :  { %v3362_v59 = vadd.f32 %v3586_v4, %v3361_v15 }
 0x2cd   :  { %3231 = vmatmul.bf16.vlgmr.msra.gmra.mxu3 %v4741_v38  ;;  %v3102_v42 = vpop.f32.mrf.mxu1  ;;  %v3366_v56 = vsel %vm3365_vm9, %v3586_v4, %v3362_v59 }
 0x2ce   :  { %v3371_v46 = vsel %vm3368_vm12, %v3370_v5, %v3366_v56  ;;  %v3103_v52 = vadd.f32 %v3102_v42, %v4861_v36 }
 0x2cf   :  { %v3588_v11 = vpop.eup %3587 }
 0x2d0   :  { %v3323_v8 = vadd.f32 1.0, %v3588_v11 }
 0x2d2   :  { %3589 = vrcp.f32 %v3323_v8  ;;  %v3384_v38 = vand.u32 2147483648, %v3323_v8  ;;  %v3382_v62 = vand.u32 2147483647, %v3323_v8  ;;  %vm3378_vm10 = vweird.f32 %v3323_v8 }
 0x2d4   :  { %v3385_v27 = vor.u32 1.1754944e-38, %v3384_v38  ;;  %vm3383_vm13 = vcmp.eq.f32.partialorder %v3382_v62, 8.507059e+37  ;;  %v3244_v38 = vperm.slane %v4823_v3, 6 }
 0x2d5   :  { %v3104_v32 = vpop.f32.mrf.mxu1 }
 0x2d8   :  { %v3590_v35 = vpop.eup %3589 }
 0x2d9   :  { %v3374_v13 = vmul.f32 %v3590_v35, %v3323_v8  ;;  %vm3379_vm8 = vweird.f32 %v3590_v35 }
 0x2da   :  { %vm3380_vm11 = vmor %vm3378_vm10, %vm3379_vm8 }
 0x2db   :  { %v3375_v16 = vsub.f32 1.0, %v3374_v13 }
 0x2dd   :  { %v3376_v49 = vmul.f32 %v3590_v35, %v3375_v16 }
 0x2df   :  { %v4883_v20 = vpop.f32.mrf.mxu0  ;;  %v3377_v43 = vadd.f32 %v3590_v35, %v3376_v49 }
 0x2e1   :  { %v3381_v41 = vsel %vm3380_vm11, %v3590_v35, %v3377_v43  ;;  %v3270_v43 = vperm.slane %v4825_v21, 6 }
 0x2e2   :  { %v3386_v18 = vsel %vm3383_vm13, %v3385_v27, %v3381_v41 }
 0x2e3   :  { %v3449_v39 = vpack.c.bf16 %v3386_v18, %v3371_v46 }
 0x2e5   :  { %3453 = vst [vmem:[#allocation20 + $0x8] sm:$0xff] %v3449_v39 }
 0x2e7   :  { %v3143_v0 = vpop.f32.mrf.mxu0 }
 0x2e9   :  { %v3076_v37 = vpop.f32.mrf.mxu3 }
 0x2ea   :  { %v3077_v7 = vadd.f32 %v3076_v37, %v3064_v60  ;;  %v3115_v2 = vpop.f32.mrf.mxu2 }
 0x2eb   :  { %v3116_v9 = vadd.f32 %v3115_v2, %v3103_v52 }
 0x2ec   :  { %v3258_v50 = vmul.f32 %v3242_v22, %v3077_v7 }
 0x2ee   :  { %v3284_v24 = vadd.f32 %v3268_v1, %v3258_v50 }
 0x2f0   :  { %3292 = vst [vmem:[#allocation19 + $0x20] sm:$0xff] %v3284_v24  ;;  %v3534_v19 = vmul.f32 -1.442695, %v3284_v24 }
 0x2f1   :  { %v3078_v12 = vpop.f32.mrf.mxu3 }
 0x2f2   :  { %v3117_v47 = vpop.f32.mrf.mxu2  ;;  %3591 = vpow2.f32 %v3534_v19  ;;  %v3245_v12 = vperm.slane %v4823_v3, 7 }
 0x2f5   :  { %v3154_v57 = vpop.f32.mrf.mxu1 }
 0x2f6   :  { %v3155_v32 = vadd.f32 %v3154_v57, %v4883_v20 }
 0x2f8   :  { %v3592_v63 = vpop.eup %3591 }
 0x2f9   :  { %v3324_v6 = vadd.f32 1.0, %v3592_v63 }
 0x2fb   :  { %3593 = vrcp.f32 %v3324_v6  ;;  %vm3393_vm15 = vweird.f32 %v3324_v6  ;;  %v3399_v15 = vand.u32 2147483648, %v3324_v6  ;;  %v3397_v13 = vand.u32 2147483647, %v3324_v6 }
 0x2fd   :  { %v3156_v55 = vpop.f32.mrf.mxu1  ;;  %v3400_v5 = vor.u32 1.1754944e-38, %v3399_v15  ;;  %vm3398_vm4 = vcmp.eq.f32.partialorder %v3397_v13, 8.507059e+37 }
 0x2fe   :  { %v3271_v55 = vperm.slane %v4825_v21, 7 }
 0x301   :  { %v3594_v30 = vpop.eup %3593 }
 0x302   :  { %v3389_v51 = vmul.f32 %v3594_v30, %v3324_v6  ;;  %vm3394_vm14 = vweird.f32 %v3594_v30 }
 0x303   :  { %vm4895_vm1 = vmor %vm3393_vm15, %vm3394_vm14 }
 0x304   :  { %v3390_v4 = vsub.f32 1.0, %v3389_v51 }
 0x306   :  { %v3391_v42 = vmul.f32 %v3594_v30, %v3390_v4 }
 0x307   :  { %v4888_v26 = vpop.f32.mrf.mxu0 }
 0x308   :  { %v3392_v14 = vadd.f32 %v3594_v30, %v3391_v42 }
 0x30a   :  { %v3396_v62 = vsel %vm4895_vm1, %v3594_v30, %v3392_v14 }
 0x30b   :  { %v3401_v39 = vsel %vm3398_vm4, %v3400_v5, %v3396_v62 }
 0x30f   :  { %v3195_v23 = vpop.f32.mrf.mxu0 }
 0x310   :  { %v3128_v29 = vpop.f32.mrf.mxu3 }
 0x311   :  { %v3129_v44 = vadd.f32 %v3128_v29, %v3116_v9 }
 0x312   :  { %v3167_v58 = vpop.f32.mrf.mxu2 }
 0x313   :  { %v3259_v40 = vmul.f32 %v3243_v33, %v3129_v44  ;;  %v3168_v17 = vadd.f32 %v3167_v58, %v3155_v32 }
 0x315   :  { %v3285_v28 = vadd.f32 %v3269_v48, %v3259_v40 }
 0x317   :  { %3293 = vst [vmem:[#allocation19 + $0x28] sm:$0xff] %v3285_v28  ;;  %v3535_v25 = vmul.f32 -1.442695, %v3285_v28 }
 0x318   :  { %v3130_v53 = vpop.f32.mrf.mxu3 }
 0x319   :  { %3595 = vpow2.f32 %v3535_v25 }
 0x31a   :  { %v3169_v10 = vpop.f32.mrf.mxu2  ;;  %v3206_v36 = vpop.f32.mrf.mxu1 }
 0x31b   :  { %v3207_v2 = vadd.f32 %v3206_v36, %v4888_v26 }
 0x31f   :  { %v3596_v45 = vpop.eup %3595 }
 0x320   :  { %v3325_v61 = vadd.f32 1.0, %v3596_v45 }
 0x322   :  { %3597 = vrcp.f32 %v3325_v61  ;;  %v3208_v34 = vpop.f32.mrf.mxu1  ;;  %v3414_v35 = vand.u32 2147483648, %v3325_v61  ;;  %v3412_v59 = vand.u32 2147483647, %v3325_v61  ;;  %vm3408_vm2 = vweird.f32 %v3325_v61 }
 0x324   :  { %v3415_v27 = vor.u32 1.1754944e-38, %v3414_v35  ;;  %vm3413_vm5 = vcmp.eq.f32.partialorder %v3412_v59, 8.507059e+37 }
 0x328   :  { %v3598_v11 = vpop.eup %3597 }
 0x329   :  { %v3404_v31 = vmul.f32 %v3598_v11, %v3325_v61  ;;  %vm3409_vm0 = vweird.f32 %v3598_v11 }
 0x32a   :  { %vm3410_vm3 = vmor %vm3408_vm2, %vm3409_vm0 }
 0x32b   :  { %v3405_v8 = vsub.f32 1.0, %v3404_v31 }
 0x32d   :  { %v3406_v16 = vmul.f32 %v3598_v11, %v3405_v8 }
 0x32f   :  { %v3407_v56 = vadd.f32 %v3598_v11, %v3406_v16 }
 0x330   :  { %v3180_v49 = vpop.f32.mrf.mxu3 }
 0x331   :  { %v3181_v20 = vadd.f32 %v3180_v49, %v3168_v17  ;;  %v3411_v46 = vsel %vm3410_vm3, %v3598_v11, %v3407_v56 }
 0x332   :  { %v3219_v41 = vpop.f32.mrf.mxu2  ;;  %v3416_v0 = vsel %vm3413_vm5, %v3415_v27, %v3411_v46 }
 0x333   :  { %v3260_v18 = vmul.f32 %v3244_v38, %v3181_v20  ;;  %v3450_v60 = vpack.c.bf16 %v3416_v0, %v3401_v39  ;;  %v3220_v24 = vadd.f32 %v3219_v41, %v3207_v2 }
 0x335   :  { %v3286_v22 = vadd.f32 %v3270_v43, %v3260_v18  ;;  %3454 = vst [vmem:[#allocation20 + $0x10] sm:$0xff] %v3450_v60 }
 0x337   :  { %3294 = vst [vmem:[#allocation19 + $0x30] sm:$0xff] %v3286_v22  ;;  %v3536_v1 = vmul.f32 -1.442695, %v3286_v22 }
 0x338   :  { %v3182_v37 = vpop.f32.mrf.mxu3 }
 0x339   :  { %3599 = vpow2.f32 %v3536_v1 }
 0x33a   :  { %v3221_v7 = vpop.f32.mrf.mxu2 }
 0x33f   :  { %v3600_v50 = vpop.eup %3599 }
 0x340   :  { %v3326_v19 = vadd.f32 1.0, %v3600_v50 }
 0x342   :  { %3601 = vrcp.f32 %v3326_v19  ;;  %vm3423_vm7 = vweird.f32 %v3326_v19  ;;  %v3429_v28 = vand.u32 2147483648, %v3326_v19  ;;  %v3427_v53 = vand.u32 2147483647, %v3326_v19 }
 0x344   :  { %v3430_v51 = vor.u32 1.1754944e-38, %v3429_v28  ;;  %vm3428_vm12 = vcmp.eq.f32.partialorder %v3427_v53, 8.507059e+37 }
 0x348   :  { %v3602_v3 = vpop.eup %3601 }
 0x349   :  { %v3419_v21 = vmul.f32 %v3602_v3, %v3326_v19  ;;  %vm3424_vm6 = vweird.f32 %v3602_v3 }
 0x34a   :  { %vm3425_vm9 = vmor %vm3423_vm7, %vm3424_vm6 }
 0x34b   :  { %v3420_v23 = vsub.f32 1.0, %v3419_v21 }
 0x34d   :  { %v3421_v44 = vmul.f32 %v3602_v3, %v3420_v23 }
 0x34f   :  { %v3422_v40 = vadd.f32 %v3602_v3, %v3421_v44 }
 0x350   :  { %v3232_v47 = vpop.f32.mrf.mxu3 }
 0x351   :  { %v3233_v57 = vadd.f32 %v3232_v47, %v3220_v24  ;;  %v3426_v30 = vsel %vm3425_vm9, %v3602_v3, %v3422_v40 }
 0x352   :  { %v3431_v4 = vsel %vm3428_vm12, %v3430_v51, %v3426_v30 }
 0x353   :  { %v3261_v52 = vmul.f32 %v3245_v12, %v3233_v57 }
 0x355   :  { %v3287_v63 = vadd.f32 %v3271_v55, %v3261_v52 }
 0x357   :  { %3295 = vst [vmem:[#allocation19 + $0x38] sm:$0xff] %v3287_v63  ;;  %v3537_v26 = vmul.f32 -1.442695, %v3287_v63 }
 0x358   :  { %v3234_v9 = vpop.f32.mrf.mxu3  ;;  %3466 = dma.vmem_to_hbm [thread:$0]  %s3462_s30, 1024, %s3464_s14, [#allocation4]  }
 0x359   :  { %3603 = vpow2.f32 %v3537_v26 }
 0x35f   :  { %v3604_v33 = vpop.eup %3603 }
 0x360   :  { %v3327_v29 = vadd.f32 1.0, %v3604_v33 }
 0x362   :  { %3605 = vrcp.f32 %v3327_v29  ;;  %v3444_v25 = vand.u32 2147483648, %v3327_v29  ;;  %v3442_v36 = vand.u32 2147483647, %v3327_v29  ;;  %vm3438_vm10 = vweird.f32 %v3327_v29 }
 0x364   :  { %v3445_v61 = vor.u32 1.1754944e-38, %v3444_v25  ;;  %vm3443_vm13 = vcmp.eq.f32.partialorder %v3442_v36, 8.507059e+37 }
 0x368   :  { %v3606_v48 = vpop.eup %3605 }
 0x369   :  { %v3434_v58 = vmul.f32 %v3606_v48, %v3327_v29  ;;  %vm3439_vm8 = vweird.f32 %v3606_v48 }
 0x36a   :  { %vm3440_vm11 = vmor %vm3438_vm10, %vm3439_vm8 }
 0x36b   :  { %v3435_v6 = vsub.f32 1.0, %v3434_v58 }
 0x36d   :  { %v3436_v10 = vmul.f32 %v3606_v48, %v3435_v6 }
 0x36f   :  { %v3437_v45 = vadd.f32 %v3606_v48, %v3436_v10 }
 0x371   :  { %v3441_v34 = vsel %vm3440_vm11, %v3606_v48, %v3437_v45 }
 0x372   :  { %v3446_v42 = vsel %vm3443_vm13, %v3445_v61, %v3441_v34 }
 0x373   :  { %v3451_v11 = vpack.c.bf16 %v3446_v42, %v3431_v4 }
 0x375   :  { %3455 = vst [vmem:[#allocation20 + $0x18] sm:$0xff] %v3451_v11 }
 0x376   :  { %3477 = dma.vmem_to_hbm [thread:$0]  %s3473_s15, 512, %s3475_s0, [#allocation21]  }
 0x377   :  { %3907 = dma.done.wait [#allocation4], 1024  }
 0x378   :  { %3908 = vsyncadd [#allocation4], 4294966272 }
 0x379   :  { %3909 = dma.done.wait [#allocation21], 512  }
 0x37a   :  { %3910 = vsyncadd [#allocation21], 4294966784 }
 0x37b   :  { %3486 = vsyncpa [#allocation3], 1 }
 0x37c   :  { %3487 = vsyncpa [#allocation6], 1 }
 0x37d   :  { %3488 = vsyncpa [#allocation9], 1 }
 0x37e   :  { %3489 = vsyncpa [#allocation12], 1 }
 0x37f   :  { %3490 = vsyncpa [#allocation15], 1 }
 0x380   :  { %3491 = vsyncpa [#allocation18], 1 }
 0x381   :  { %3492 = vsyncpa [#allocation4], 1 }
 0x382   :  { %3493 = vsyncpa [#allocation21], 1 }

</bundles_post_ra>
